<compile_context>
chip_gen: v7x
topology: tpu7x:2x2x1
jax: 0.10.0
libtpu: 0.0.40
codegen_flags: <defaults>
</compile_context>

<pallas_src>
import jax
import jax.numpy as jnp
from jax import lax
from jax.experimental import pallas as pl
from jax.experimental.pallas import tpu as pltpu

# ApproxReLU(x) = 0.117071 x^2 + 0.5 x + 0.375373
C1, C2, C3 = 0.117071, 0.5, 0.375373


def _approx_relu(x):
    return C1 * (x * x) + C2 * x + C3


# ---------------- fused Pallas kernel ----------------

def m3_fused_kernel(cw_ref, xp_ref, w1s_ref, w2t_ref, bb_ref, o_ref):
    # cw_ref : SMEM f32[60]        conv weights (c*9 + di*3 + dj) then conv bias (54+c)
    # xp_ref : VMEM f32[16, B, 169] im2col slabs: slab k=u*4+v holds x[b, 2i+u, 2j+v]
    # w1s_ref: VMEM f32[6, 169, 120] per-channel FC1 weight slabs, 1/4 pool factor folded in
    # w2t_ref: VMEM f32[120, 10]   FC2 weight (transposed)
    # bb_ref : VMEM f32[2, 128]    row0[:120] = FC1 bias, row1[:10] = FC2 bias
    # o_ref  : VMEM f32[B, 10]
    nb = o_ref.shape[0]

    # Hoist all conv scalars (54 weights + 6 biases) out of the unrolled loops.
    w = [[cw_ref[c * 9 + t] for t in range(9)] for c in range(6)]
    bconv = [cw_ref[54 + c] for c in range(6)]
    # Load the 16 input slabs once; everything below is vreg arithmetic.
    slabs = [xp_ref[k] for k in range(16)]            # each (B, 169)

    acc = jnp.zeros((nb, 120), jnp.float32)
    for c in range(6):
        z = None
        for a in range(2):            # pooling sub-row
            for b in range(2):        # pooling sub-col
                # Conv1 output at spatial (2i+a, 2j+b): 9 VPU FMAs on (B,169) slabs.
                y = None
                for di in range(3):
                    for dj in range(3):
                        t = slabs[(a + di) * 4 + (b + dj)] * w[c][di * 3 + dj]
                        y = t if y is None else y + t
                y = y + bconv[c]
                ya = _approx_relu(y)                  # ApproxReLU1
                z = ya if z is None else z + ya       # pool-sum (1/4 folded into w1s)
        # FC1 partial contraction for this channel -> MXU (flatten order folded in).
        acc = acc + jnp.dot(z, w1s_ref[c], preferred_element_type=jnp.float32)

    h = acc + bb_ref[0:1, 0:120]                      # FC1 bias
    h = _approx_relu(h)                               # ApproxReLU2
    out = jnp.dot(h, w2t_ref[...], preferred_element_type=jnp.float32)
    o_ref[...] = out + bb_ref[1:2, 0:10]              # FC2 bias


# ---------------- parameter prep (one-time, hoisted) ----------------

def prepare_params(params):
    W1c, b1c, Wfc1, bfc1, Wfc2, bfc2 = params
    # Conv weights + bias packed into one small SMEM array.
    cw = jnp.concatenate([W1c.reshape(6 * 9), b1c]).astype(jnp.float32)       # (60,)
    # FC1 weight regrouped per conv channel (flatten index = c*169 + p),
    # with the 1/4 average-pool factor folded in.
    w1s = (0.25 * jnp.transpose(Wfc1.reshape(120, 6, 169), (1, 2, 0))
           ).astype(jnp.float32)                                              # (6,169,120)
    w2t = Wfc2.T.astype(jnp.float32)                                          # (120,10)
    # Both FC biases packed into one lane-aligned (2,128) array.
    bb = jnp.zeros((2, 128), jnp.float32)
    bb = bb.at[0, :120].set(bfc1)
    bb = bb.at[1, :10].set(bfc2)
    return cw, w1s, w2t, bb


# ---------------- forward wrapper ----------------

@jax.jit
def m3_forward(x, prepped):
    cw, w1s, w2t, bb = prepped
    B = x.shape[0]
    x2 = x[:, 0, :, :]                                                        # (B, 28, 28)
    # im2col at pool granularity: slab k = u*4+v holds x[b, 2i+u, 2j+v] as (B, 13*13).
    # (Cheap one-shot XLA gather on the tiny input; lets the kernel avoid strided slices.)
    slabs = [x2[:, u::2, v::2][:, :13, :13].reshape(B, 169)
             for u in range(4) for v in range(4)]
    xp = jnp.stack(slabs, axis=0)                                             # (16, B, 169)

    vmem = pltpu.MemorySpace.VMEM
    return pl.pallas_call(
        m3_fused_kernel,
        out_shape=jax.ShapeDtypeStruct((B, 10), jnp.float32),
        in_specs=[
            pl.BlockSpec(memory_space=pltpu.MemorySpace.SMEM),   # conv scalars
            pl.BlockSpec(memory_space=vmem),                     # xp
            pl.BlockSpec(memory_space=vmem),                     # w1s
            pl.BlockSpec(memory_space=vmem),                     # w2t
            pl.BlockSpec(memory_space=vmem),                     # fc biases
        ],
        out_specs=pl.BlockSpec(memory_space=vmem),
    )(cw, xp, w1s, w2t, bb)


# ---------------- pure-JAX reference (correctness check) ----------------

def m3_reference(x, params):
    W1c, b1c, Wfc1, bfc1, Wfc2, bfc2 = params
    dn = ('NCHW', 'OIHW', 'NCHW')
    out = lax.conv_general_dilated(x, W1c, window_strides=(1, 1),
                                   padding='VALID', dimension_numbers=dn)
    out = out + b1c[None, :, None, None]
    out = _approx_relu(out)
    Bn, C, Ho, Wo = out.shape
    out = out.reshape(Bn, C, Ho // 2, 2, Wo // 2, 2).mean(axis=(3, 5))   # AvgPool2d(2)
    out = out.reshape(Bn, -1)                                            # torch.flatten(x, 1)
    out = out @ Wfc1.T + bfc1
    out = _approx_relu(out)
    out = out @ Wfc2.T + bfc2
    return out


# ---------------- main ----------------

if __name__ == "__main__":
    key = jax.random.PRNGKey(0)
    ks = jax.random.split(key, 7)

    B, H, W = 2, 28, 28
    x = jax.random.normal(ks[0], (B, 1, H, W), jnp.float32)

    # Deterministic synthetic parameters (shapes match the torch module).
    W1c = 0.2 * jax.random.normal(ks[1], (6, 1, 3, 3), jnp.float32)   # Conv1 weight
    b1c = 0.1 * jax.random.normal(ks[2], (6,), jnp.float32)           # Conv1 bias
    Wfc1 = 0.1 * jax.random.normal(ks[3], (120, 1014), jnp.float32)   # FC1 weight
    bfc1 = 0.1 * jax.random.normal(ks[4], (120,), jnp.float32)        # FC1 bias
    Wfc2 = 0.1 * jax.random.normal(ks[5], (10, 120), jnp.float32)     # FC2 weight
    bfc2 = 0.1 * jax.random.normal(ks[6], (10,), jnp.float32)         # FC2 bias
    params = (W1c, b1c, Wfc1, bfc1, Wfc2, bfc2)

    prepped = prepare_params(params)   # one-time weight prep, hoisted off the hot path

    out = jax.block_until_ready(m3_forward(x, prepped))
    ref = jax.block_until_ready(m3_reference(x, params))

    assert out.shape == (B, 10), out.shape
    assert jnp.allclose(out, ref, atol=2e-3, rtol=2e-3), (out, ref)
    print("KERNEL_OK")
</pallas_src>

<mosaic_0001>
module attributes {stable_mosaic.version = 11 : i64} {
  func.func @m3_fused_kernel(%arg0: memref<60xf32, #tpu.memory_space<smem>>, %arg1: memref<16x2x169xf32, #tpu.memory_space<vmem>>, %arg2: memref<6x169x120xf32, #tpu.memory_space<vmem>>, %arg3: memref<120x10xf32, #tpu.memory_space<vmem>>, %arg4: memref<2x128xf32, #tpu.memory_space<vmem>>, %arg5: memref<2x10xf32, #tpu.memory_space<vmem>>) attributes {dimension_semantics = [], scalar_prefetch = 0 : i64, scratch_operands = 0 : i64, tpu.core_type = #tpu.core_type<tc>} {
    %c0 = arith.constant 0 : index
    %0 = memref.load %arg0[%c0] : memref<60xf32, #tpu.memory_space<smem>>
    %c1 = arith.constant 1 : index
    %1 = memref.load %arg0[%c1] : memref<60xf32, #tpu.memory_space<smem>>
    %c2 = arith.constant 2 : index
    %2 = memref.load %arg0[%c2] : memref<60xf32, #tpu.memory_space<smem>>
    %c3 = arith.constant 3 : index
    %3 = memref.load %arg0[%c3] : memref<60xf32, #tpu.memory_space<smem>>
    %c4 = arith.constant 4 : index
    %4 = memref.load %arg0[%c4] : memref<60xf32, #tpu.memory_space<smem>>
    %c5 = arith.constant 5 : index
    %5 = memref.load %arg0[%c5] : memref<60xf32, #tpu.memory_space<smem>>
    %c6 = arith.constant 6 : index
    %6 = memref.load %arg0[%c6] : memref<60xf32, #tpu.memory_space<smem>>
    %c7 = arith.constant 7 : index
    %7 = memref.load %arg0[%c7] : memref<60xf32, #tpu.memory_space<smem>>
    %c8 = arith.constant 8 : index
    %8 = memref.load %arg0[%c8] : memref<60xf32, #tpu.memory_space<smem>>
    %c9 = arith.constant 9 : index
    %9 = memref.load %arg0[%c9] : memref<60xf32, #tpu.memory_space<smem>>
    %c10 = arith.constant 10 : index
    %10 = memref.load %arg0[%c10] : memref<60xf32, #tpu.memory_space<smem>>
    %c11 = arith.constant 11 : index
    %11 = memref.load %arg0[%c11] : memref<60xf32, #tpu.memory_space<smem>>
    %c12 = arith.constant 12 : index
    %12 = memref.load %arg0[%c12] : memref<60xf32, #tpu.memory_space<smem>>
    %c13 = arith.constant 13 : index
    %13 = memref.load %arg0[%c13] : memref<60xf32, #tpu.memory_space<smem>>
    %c14 = arith.constant 14 : index
    %14 = memref.load %arg0[%c14] : memref<60xf32, #tpu.memory_space<smem>>
    %c15 = arith.constant 15 : index
    %15 = memref.load %arg0[%c15] : memref<60xf32, #tpu.memory_space<smem>>
    %c16 = arith.constant 16 : index
    %16 = memref.load %arg0[%c16] : memref<60xf32, #tpu.memory_space<smem>>
    %c17 = arith.constant 17 : index
    %17 = memref.load %arg0[%c17] : memref<60xf32, #tpu.memory_space<smem>>
    %c18 = arith.constant 18 : index
    %18 = memref.load %arg0[%c18] : memref<60xf32, #tpu.memory_space<smem>>
    %c19 = arith.constant 19 : index
    %19 = memref.load %arg0[%c19] : memref<60xf32, #tpu.memory_space<smem>>
    %c20 = arith.constant 20 : index
    %20 = memref.load %arg0[%c20] : memref<60xf32, #tpu.memory_space<smem>>
    %c21 = arith.constant 21 : index
    %21 = memref.load %arg0[%c21] : memref<60xf32, #tpu.memory_space<smem>>
    %c22 = arith.constant 22 : index
    %22 = memref.load %arg0[%c22] : memref<60xf32, #tpu.memory_space<smem>>
    %c23 = arith.constant 23 : index
    %23 = memref.load %arg0[%c23] : memref<60xf32, #tpu.memory_space<smem>>
    %c24 = arith.constant 24 : index
    %24 = memref.load %arg0[%c24] : memref<60xf32, #tpu.memory_space<smem>>
    %c25 = arith.constant 25 : index
    %25 = memref.load %arg0[%c25] : memref<60xf32, #tpu.memory_space<smem>>
    %c26 = arith.constant 26 : index
    %26 = memref.load %arg0[%c26] : memref<60xf32, #tpu.memory_space<smem>>
    %c27 = arith.constant 27 : index
    %27 = memref.load %arg0[%c27] : memref<60xf32, #tpu.memory_space<smem>>
    %c28 = arith.constant 28 : index
    %28 = memref.load %arg0[%c28] : memref<60xf32, #tpu.memory_space<smem>>
    %c29 = arith.constant 29 : index
    %29 = memref.load %arg0[%c29] : memref<60xf32, #tpu.memory_space<smem>>
    %c30 = arith.constant 30 : index
    %30 = memref.load %arg0[%c30] : memref<60xf32, #tpu.memory_space<smem>>
    %c31 = arith.constant 31 : index
    %31 = memref.load %arg0[%c31] : memref<60xf32, #tpu.memory_space<smem>>
    %c32 = arith.constant 32 : index
    %32 = memref.load %arg0[%c32] : memref<60xf32, #tpu.memory_space<smem>>
    %c33 = arith.constant 33 : index
    %33 = memref.load %arg0[%c33] : memref<60xf32, #tpu.memory_space<smem>>
    %c34 = arith.constant 34 : index
    %34 = memref.load %arg0[%c34] : memref<60xf32, #tpu.memory_space<smem>>
    %c35 = arith.constant 35 : index
    %35 = memref.load %arg0[%c35] : memref<60xf32, #tpu.memory_space<smem>>
    %c36 = arith.constant 36 : index
    %36 = memref.load %arg0[%c36] : memref<60xf32, #tpu.memory_space<smem>>
    %c37 = arith.constant 37 : index
    %37 = memref.load %arg0[%c37] : memref<60xf32, #tpu.memory_space<smem>>
    %c38 = arith.constant 38 : index
    %38 = memref.load %arg0[%c38] : memref<60xf32, #tpu.memory_space<smem>>
    %c39 = arith.constant 39 : index
    %39 = memref.load %arg0[%c39] : memref<60xf32, #tpu.memory_space<smem>>
    %c40 = arith.constant 40 : index
    %40 = memref.load %arg0[%c40] : memref<60xf32, #tpu.memory_space<smem>>
    %c41 = arith.constant 41 : index
    %41 = memref.load %arg0[%c41] : memref<60xf32, #tpu.memory_space<smem>>
    %c42 = arith.constant 42 : index
    %42 = memref.load %arg0[%c42] : memref<60xf32, #tpu.memory_space<smem>>
    %c43 = arith.constant 43 : index
    %43 = memref.load %arg0[%c43] : memref<60xf32, #tpu.memory_space<smem>>
    %c44 = arith.constant 44 : index
    %44 = memref.load %arg0[%c44] : memref<60xf32, #tpu.memory_space<smem>>
    %c45 = arith.constant 45 : index
    %45 = memref.load %arg0[%c45] : memref<60xf32, #tpu.memory_space<smem>>
    %c46 = arith.constant 46 : index
    %46 = memref.load %arg0[%c46] : memref<60xf32, #tpu.memory_space<smem>>
    %c47 = arith.constant 47 : index
    %47 = memref.load %arg0[%c47] : memref<60xf32, #tpu.memory_space<smem>>
    %c48 = arith.constant 48 : index
    %48 = memref.load %arg0[%c48] : memref<60xf32, #tpu.memory_space<smem>>
    %c49 = arith.constant 49 : index
    %49 = memref.load %arg0[%c49] : memref<60xf32, #tpu.memory_space<smem>>
    %c50 = arith.constant 50 : index
    %50 = memref.load %arg0[%c50] : memref<60xf32, #tpu.memory_space<smem>>
    %c51 = arith.constant 51 : index
    %51 = memref.load %arg0[%c51] : memref<60xf32, #tpu.memory_space<smem>>
    %c52 = arith.constant 52 : index
    %52 = memref.load %arg0[%c52] : memref<60xf32, #tpu.memory_space<smem>>
    %c53 = arith.constant 53 : index
    %53 = memref.load %arg0[%c53] : memref<60xf32, #tpu.memory_space<smem>>
    %c54 = arith.constant 54 : index
    %54 = memref.load %arg0[%c54] : memref<60xf32, #tpu.memory_space<smem>>
    %c55 = arith.constant 55 : index
    %55 = memref.load %arg0[%c55] : memref<60xf32, #tpu.memory_space<smem>>
    %c56 = arith.constant 56 : index
    %56 = memref.load %arg0[%c56] : memref<60xf32, #tpu.memory_space<smem>>
    %c57 = arith.constant 57 : index
    %57 = memref.load %arg0[%c57] : memref<60xf32, #tpu.memory_space<smem>>
    %c58 = arith.constant 58 : index
    %58 = memref.load %arg0[%c58] : memref<60xf32, #tpu.memory_space<smem>>
    %c59 = arith.constant 59 : index
    %59 = memref.load %arg0[%c59] : memref<60xf32, #tpu.memory_space<smem>>
    %c0_0 = arith.constant 0 : index
    %c0_1 = arith.constant 0 : index
    %c0_2 = arith.constant 0 : index
    %60 = vector.load %arg1[%c0_0, %c0_1, %c0_2] : memref<16x2x169xf32, #tpu.memory_space<vmem>>, vector<1x2x169xf32>
    %61 = vector.shape_cast %60 : vector<1x2x169xf32> to vector<2x169xf32>
    %c1_3 = arith.constant 1 : index
    %c0_4 = arith.constant 0 : index
    %c0_5 = arith.constant 0 : index
    %62 = vector.load %arg1[%c1_3, %c0_4, %c0_5] : memref<16x2x169xf32, #tpu.memory_space<vmem>>, vector<1x2x169xf32>
    %63 = vector.shape_cast %62 : vector<1x2x169xf32> to vector<2x169xf32>
    %c2_6 = arith.constant 2 : index
    %c0_7 = arith.constant 0 : index
    %c0_8 = arith.constant 0 : index
    %64 = vector.load %arg1[%c2_6, %c0_7, %c0_8] : memref<16x2x169xf32, #tpu.memory_space<vmem>>, vector<1x2x169xf32>
    %65 = vector.shape_cast %64 : vector<1x2x169xf32> to vector<2x169xf32>
    %c3_9 = arith.constant 3 : index
    %c0_10 = arith.constant 0 : index
    %c0_11 = arith.constant 0 : index
    %66 = vector.load %arg1[%c3_9, %c0_10, %c0_11] : memref<16x2x169xf32, #tpu.memory_space<vmem>>, vector<1x2x169xf32>
    %67 = vector.shape_cast %66 : vector<1x2x169xf32> to vector<2x169xf32>
    %c4_12 = arith.constant 4 : index
    %c0_13 = arith.constant 0 : index
    %c0_14 = arith.constant 0 : index
    %68 = vector.load %arg1[%c4_12, %c0_13, %c0_14] : memref<16x2x169xf32, #tpu.memory_space<vmem>>, vector<1x2x169xf32>
    %69 = vector.shape_cast %68 : vector<1x2x169xf32> to vector<2x169xf32>
    %c5_15 = arith.constant 5 : index
    %c0_16 = arith.constant 0 : index
    %c0_17 = arith.constant 0 : index
    %70 = vector.load %arg1[%c5_15, %c0_16, %c0_17] : memref<16x2x169xf32, #tpu.memory_space<vmem>>, vector<1x2x169xf32>
    %71 = vector.shape_cast %70 : vector<1x2x169xf32> to vector<2x169xf32>
    %c6_18 = arith.constant 6 : index
    %c0_19 = arith.constant 0 : index
    %c0_20 = arith.constant 0 : index
    %72 = vector.load %arg1[%c6_18, %c0_19, %c0_20] : memref<16x2x169xf32, #tpu.memory_space<vmem>>, vector<1x2x169xf32>
    %73 = vector.shape_cast %72 : vector<1x2x169xf32> to vector<2x169xf32>
    %c7_21 = arith.constant 7 : index
    %c0_22 = arith.constant 0 : index
    %c0_23 = arith.constant 0 : index
    %74 = vector.load %arg1[%c7_21, %c0_22, %c0_23] : memref<16x2x169xf32, #tpu.memory_space<vmem>>, vector<1x2x169xf32>
    %75 = vector.shape_cast %74 : vector<1x2x169xf32> to vector<2x169xf32>
    %c8_24 = arith.constant 8 : index
    %c0_25 = arith.constant 0 : index
    %c0_26 = arith.constant 0 : index
    %76 = vector.load %arg1[%c8_24, %c0_25, %c0_26] : memref<16x2x169xf32, #tpu.memory_space<vmem>>, vector<1x2x169xf32>
    %77 = vector.shape_cast %76 : vector<1x2x169xf32> to vector<2x169xf32>
    %c9_27 = arith.constant 9 : index
    %c0_28 = arith.constant 0 : index
    %c0_29 = arith.constant 0 : index
    %78 = vector.load %arg1[%c9_27, %c0_28, %c0_29] : memref<16x2x169xf32, #tpu.memory_space<vmem>>, vector<1x2x169xf32>
    %79 = vector.shape_cast %78 : vector<1x2x169xf32> to vector<2x169xf32>
    %c10_30 = arith.constant 10 : index
    %c0_31 = arith.constant 0 : index
    %c0_32 = arith.constant 0 : index
    %80 = vector.load %arg1[%c10_30, %c0_31, %c0_32] : memref<16x2x169xf32, #tpu.memory_space<vmem>>, vector<1x2x169xf32>
    %81 = vector.shape_cast %80 : vector<1x2x169xf32> to vector<2x169xf32>
    %c11_33 = arith.constant 11 : index
    %c0_34 = arith.constant 0 : index
    %c0_35 = arith.constant 0 : index
    %82 = vector.load %arg1[%c11_33, %c0_34, %c0_35] : memref<16x2x169xf32, #tpu.memory_space<vmem>>, vector<1x2x169xf32>
    %83 = vector.shape_cast %82 : vector<1x2x169xf32> to vector<2x169xf32>
    %c12_36 = arith.constant 12 : index
    %c0_37 = arith.constant 0 : index
    %c0_38 = arith.constant 0 : index
    %84 = vector.load %arg1[%c12_36, %c0_37, %c0_38] : memref<16x2x169xf32, #tpu.memory_space<vmem>>, vector<1x2x169xf32>
    %85 = vector.shape_cast %84 : vector<1x2x169xf32> to vector<2x169xf32>
    %c13_39 = arith.constant 13 : index
    %c0_40 = arith.constant 0 : index
    %c0_41 = arith.constant 0 : index
    %86 = vector.load %arg1[%c13_39, %c0_40, %c0_41] : memref<16x2x169xf32, #tpu.memory_space<vmem>>, vector<1x2x169xf32>
    %87 = vector.shape_cast %86 : vector<1x2x169xf32> to vector<2x169xf32>
    %c14_42 = arith.constant 14 : index
    %c0_43 = arith.constant 0 : index
    %c0_44 = arith.constant 0 : index
    %88 = vector.load %arg1[%c14_42, %c0_43, %c0_44] : memref<16x2x169xf32, #tpu.memory_space<vmem>>, vector<1x2x169xf32>
    %89 = vector.shape_cast %88 : vector<1x2x169xf32> to vector<2x169xf32>
    %c15_45 = arith.constant 15 : index
    %c0_46 = arith.constant 0 : index
    %c0_47 = arith.constant 0 : index
    %90 = vector.load %arg1[%c15_45, %c0_46, %c0_47] : memref<16x2x169xf32, #tpu.memory_space<vmem>>, vector<1x2x169xf32>
    %91 = vector.shape_cast %90 : vector<1x2x169xf32> to vector<2x169xf32>
    %cst = arith.constant 0.000000e+00 : f32
    %92 = vector.broadcast %cst : f32 to vector<2x120xf32>
    %93 = vector.broadcast %0 : f32 to vector<2x169xf32>
    %94 = arith.mulf %61, %93 : vector<2x169xf32>
    %95 = vector.broadcast %1 : f32 to vector<2x169xf32>
    %96 = arith.mulf %63, %95 : vector<2x169xf32>
    %97 = arith.addf %94, %96 : vector<2x169xf32>
    %98 = vector.broadcast %2 : f32 to vector<2x169xf32>
    %99 = arith.mulf %65, %98 : vector<2x169xf32>
    %100 = arith.addf %97, %99 : vector<2x169xf32>
    %101 = vector.broadcast %3 : f32 to vector<2x169xf32>
    %102 = arith.mulf %69, %101 : vector<2x169xf32>
    %103 = arith.addf %100, %102 : vector<2x169xf32>
    %104 = vector.broadcast %4 : f32 to vector<2x169xf32>
    %105 = arith.mulf %71, %104 : vector<2x169xf32>
    %106 = arith.addf %103, %105 : vector<2x169xf32>
    %107 = vector.broadcast %5 : f32 to vector<2x169xf32>
    %108 = arith.mulf %73, %107 : vector<2x169xf32>
    %109 = arith.addf %106, %108 : vector<2x169xf32>
    %110 = vector.broadcast %6 : f32 to vector<2x169xf32>
    %111 = arith.mulf %77, %110 : vector<2x169xf32>
    %112 = arith.addf %109, %111 : vector<2x169xf32>
    %113 = vector.broadcast %7 : f32 to vector<2x169xf32>
    %114 = arith.mulf %79, %113 : vector<2x169xf32>
    %115 = arith.addf %112, %114 : vector<2x169xf32>
    %116 = vector.broadcast %8 : f32 to vector<2x169xf32>
    %117 = arith.mulf %81, %116 : vector<2x169xf32>
    %118 = arith.addf %115, %117 : vector<2x169xf32>
    %119 = vector.broadcast %54 : f32 to vector<2x169xf32>
    %120 = arith.addf %118, %119 : vector<2x169xf32>
    %121 = arith.mulf %120, %120 : vector<2x169xf32>
    %cst_48 = arith.constant 1.170710e-01 : f32
    %122 = vector.broadcast %cst_48 : f32 to vector<2x169xf32>
    %123 = arith.mulf %122, %121 : vector<2x169xf32>
    %cst_49 = arith.constant 5.000000e-01 : f32
    %124 = vector.broadcast %cst_49 : f32 to vector<2x169xf32>
    %125 = arith.mulf %124, %120 : vector<2x169xf32>
    %126 = arith.addf %123, %125 : vector<2x169xf32>
    %cst_50 = arith.constant 3.753730e-01 : f32
    %127 = vector.broadcast %cst_50 : f32 to vector<2x169xf32>
    %128 = arith.addf %126, %127 : vector<2x169xf32>
    %129 = vector.broadcast %0 : f32 to vector<2x169xf32>
    %130 = arith.mulf %63, %129 : vector<2x169xf32>
    %131 = vector.broadcast %1 : f32 to vector<2x169xf32>
    %132 = arith.mulf %65, %131 : vector<2x169xf32>
    %133 = arith.addf %130, %132 : vector<2x169xf32>
    %134 = vector.broadcast %2 : f32 to vector<2x169xf32>
    %135 = arith.mulf %67, %134 : vector<2x169xf32>
    %136 = arith.addf %133, %135 : vector<2x169xf32>
    %137 = vector.broadcast %3 : f32 to vector<2x169xf32>
    %138 = arith.mulf %71, %137 : vector<2x169xf32>
    %139 = arith.addf %136, %138 : vector<2x169xf32>
    %140 = vector.broadcast %4 : f32 to vector<2x169xf32>
    %141 = arith.mulf %73, %140 : vector<2x169xf32>
    %142 = arith.addf %139, %141 : vector<2x169xf32>
    %143 = vector.broadcast %5 : f32 to vector<2x169xf32>
    %144 = arith.mulf %75, %143 : vector<2x169xf32>
    %145 = arith.addf %142, %144 : vector<2x169xf32>
    %146 = vector.broadcast %6 : f32 to vector<2x169xf32>
    %147 = arith.mulf %79, %146 : vector<2x169xf32>
    %148 = arith.addf %145, %147 : vector<2x169xf32>
    %149 = vector.broadcast %7 : f32 to vector<2x169xf32>
    %150 = arith.mulf %81, %149 : vector<2x169xf32>
    %151 = arith.addf %148, %150 : vector<2x169xf32>
    %152 = vector.broadcast %8 : f32 to vector<2x169xf32>
    %153 = arith.mulf %83, %152 : vector<2x169xf32>
    %154 = arith.addf %151, %153 : vector<2x169xf32>
    %155 = vector.broadcast %54 : f32 to vector<2x169xf32>
    %156 = arith.addf %154, %155 : vector<2x169xf32>
    %157 = arith.mulf %156, %156 : vector<2x169xf32>
    %cst_51 = arith.constant 1.170710e-01 : f32
    %158 = vector.broadcast %cst_51 : f32 to vector<2x169xf32>
    %159 = arith.mulf %158, %157 : vector<2x169xf32>
    %cst_52 = arith.constant 5.000000e-01 : f32
    %160 = vector.broadcast %cst_52 : f32 to vector<2x169xf32>
    %161 = arith.mulf %160, %156 : vector<2x169xf32>
    %162 = arith.addf %159, %161 : vector<2x169xf32>
    %cst_53 = arith.constant 3.753730e-01 : f32
    %163 = vector.broadcast %cst_53 : f32 to vector<2x169xf32>
    %164 = arith.addf %162, %163 : vector<2x169xf32>
    %165 = arith.addf %128, %164 : vector<2x169xf32>
    %166 = vector.broadcast %0 : f32 to vector<2x169xf32>
    %167 = arith.mulf %69, %166 : vector<2x169xf32>
    %168 = vector.broadcast %1 : f32 to vector<2x169xf32>
    %169 = arith.mulf %71, %168 : vector<2x169xf32>
    %170 = arith.addf %167, %169 : vector<2x169xf32>
    %171 = vector.broadcast %2 : f32 to vector<2x169xf32>
    %172 = arith.mulf %73, %171 : vector<2x169xf32>
    %173 = arith.addf %170, %172 : vector<2x169xf32>
    %174 = vector.broadcast %3 : f32 to vector<2x169xf32>
    %175 = arith.mulf %77, %174 : vector<2x169xf32>
    %176 = arith.addf %173, %175 : vector<2x169xf32>
    %177 = vector.broadcast %4 : f32 to vector<2x169xf32>
    %178 = arith.mulf %79, %177 : vector<2x169xf32>
    %179 = arith.addf %176, %178 : vector<2x169xf32>
    %180 = vector.broadcast %5 : f32 to vector<2x169xf32>
    %181 = arith.mulf %81, %180 : vector<2x169xf32>
    %182 = arith.addf %179, %181 : vector<2x169xf32>
    %183 = vector.broadcast %6 : f32 to vector<2x169xf32>
    %184 = arith.mulf %85, %183 : vector<2x169xf32>
    %185 = arith.addf %182, %184 : vector<2x169xf32>
    %186 = vector.broadcast %7 : f32 to vector<2x169xf32>
    %187 = arith.mulf %87, %186 : vector<2x169xf32>
    %188 = arith.addf %185, %187 : vector<2x169xf32>
    %189 = vector.broadcast %8 : f32 to vector<2x169xf32>
    %190 = arith.mulf %89, %189 : vector<2x169xf32>
    %191 = arith.addf %188, %190 : vector<2x169xf32>
    %192 = vector.broadcast %54 : f32 to vector<2x169xf32>
    %193 = arith.addf %191, %192 : vector<2x169xf32>
    %194 = arith.mulf %193, %193 : vector<2x169xf32>
    %cst_54 = arith.constant 1.170710e-01 : f32
    %195 = vector.broadcast %cst_54 : f32 to vector<2x169xf32>
    %196 = arith.mulf %195, %194 : vector<2x169xf32>
    %cst_55 = arith.constant 5.000000e-01 : f32
    %197 = vector.broadcast %cst_55 : f32 to vector<2x169xf32>
    %198 = arith.mulf %197, %193 : vector<2x169xf32>
    %199 = arith.addf %196, %198 : vector<2x169xf32>
    %cst_56 = arith.constant 3.753730e-01 : f32
    %200 = vector.broadcast %cst_56 : f32 to vector<2x169xf32>
    %201 = arith.addf %199, %200 : vector<2x169xf32>
    %202 = arith.addf %165, %201 : vector<2x169xf32>
    %203 = vector.broadcast %0 : f32 to vector<2x169xf32>
    %204 = arith.mulf %71, %203 : vector<2x169xf32>
    %205 = vector.broadcast %1 : f32 to vector<2x169xf32>
    %206 = arith.mulf %73, %205 : vector<2x169xf32>
    %207 = arith.addf %204, %206 : vector<2x169xf32>
    %208 = vector.broadcast %2 : f32 to vector<2x169xf32>
    %209 = arith.mulf %75, %208 : vector<2x169xf32>
    %210 = arith.addf %207, %209 : vector<2x169xf32>
    %211 = vector.broadcast %3 : f32 to vector<2x169xf32>
    %212 = arith.mulf %79, %211 : vector<2x169xf32>
    %213 = arith.addf %210, %212 : vector<2x169xf32>
    %214 = vector.broadcast %4 : f32 to vector<2x169xf32>
    %215 = arith.mulf %81, %214 : vector<2x169xf32>
    %216 = arith.addf %213, %215 : vector<2x169xf32>
    %217 = vector.broadcast %5 : f32 to vector<2x169xf32>
    %218 = arith.mulf %83, %217 : vector<2x169xf32>
    %219 = arith.addf %216, %218 : vector<2x169xf32>
    %220 = vector.broadcast %6 : f32 to vector<2x169xf32>
    %221 = arith.mulf %87, %220 : vector<2x169xf32>
    %222 = arith.addf %219, %221 : vector<2x169xf32>
    %223 = vector.broadcast %7 : f32 to vector<2x169xf32>
    %224 = arith.mulf %89, %223 : vector<2x169xf32>
    %225 = arith.addf %222, %224 : vector<2x169xf32>
    %226 = vector.broadcast %8 : f32 to vector<2x169xf32>
    %227 = arith.mulf %91, %226 : vector<2x169xf32>
    %228 = arith.addf %225, %227 : vector<2x169xf32>
    %229 = vector.broadcast %54 : f32 to vector<2x169xf32>
    %230 = arith.addf %228, %229 : vector<2x169xf32>
    %231 = arith.mulf %230, %230 : vector<2x169xf32>
    %cst_57 = arith.constant 1.170710e-01 : f32
    %232 = vector.broadcast %cst_57 : f32 to vector<2x169xf32>
    %233 = arith.mulf %232, %231 : vector<2x169xf32>
    %cst_58 = arith.constant 5.000000e-01 : f32
    %234 = vector.broadcast %cst_58 : f32 to vector<2x169xf32>
    %235 = arith.mulf %234, %230 : vector<2x169xf32>
    %236 = arith.addf %233, %235 : vector<2x169xf32>
    %cst_59 = arith.constant 3.753730e-01 : f32
    %237 = vector.broadcast %cst_59 : f32 to vector<2x169xf32>
    %238 = arith.addf %236, %237 : vector<2x169xf32>
    %239 = arith.addf %202, %238 : vector<2x169xf32>
    %c0_60 = arith.constant 0 : index
    %c0_61 = arith.constant 0 : index
    %c0_62 = arith.constant 0 : index
    %240 = vector.load %arg2[%c0_60, %c0_61, %c0_62] : memref<6x169x120xf32, #tpu.memory_space<vmem>>, vector<1x169x120xf32>
    %241 = vector.shape_cast %240 : vector<1x169x120xf32> to vector<169x120xf32>
    %cst_63 = arith.constant dense<0.000000e+00> : vector<2x120xf32>
    %242 = tpu.matmul %239, %241, %cst_63 {dimension_numbers = #tpu.dot_dimension_numbers<[1], [0], [0], [1], [0, 0, 1, 1], [], []>} : vector<2x169xf32>, vector<169x120xf32>, vector<2x120xf32> -> vector<2x120xf32>
    %243 = arith.addf %92, %242 : vector<2x120xf32>
    %244 = vector.broadcast %9 : f32 to vector<2x169xf32>
    %245 = arith.mulf %61, %244 : vector<2x169xf32>
    %246 = vector.broadcast %10 : f32 to vector<2x169xf32>
    %247 = arith.mulf %63, %246 : vector<2x169xf32>
    %248 = arith.addf %245, %247 : vector<2x169xf32>
    %249 = vector.broadcast %11 : f32 to vector<2x169xf32>
    %250 = arith.mulf %65, %249 : vector<2x169xf32>
    %251 = arith.addf %248, %250 : vector<2x169xf32>
    %252 = vector.broadcast %12 : f32 to vector<2x169xf32>
    %253 = arith.mulf %69, %252 : vector<2x169xf32>
    %254 = arith.addf %251, %253 : vector<2x169xf32>
    %255 = vector.broadcast %13 : f32 to vector<2x169xf32>
    %256 = arith.mulf %71, %255 : vector<2x169xf32>
    %257 = arith.addf %254, %256 : vector<2x169xf32>
    %258 = vector.broadcast %14 : f32 to vector<2x169xf32>
    %259 = arith.mulf %73, %258 : vector<2x169xf32>
    %260 = arith.addf %257, %259 : vector<2x169xf32>
    %261 = vector.broadcast %15 : f32 to vector<2x169xf32>
    %262 = arith.mulf %77, %261 : vector<2x169xf32>
    %263 = arith.addf %260, %262 : vector<2x169xf32>
    %264 = vector.broadcast %16 : f32 to vector<2x169xf32>
    %265 = arith.mulf %79, %264 : vector<2x169xf32>
    %266 = arith.addf %263, %265 : vector<2x169xf32>
    %267 = vector.broadcast %17 : f32 to vector<2x169xf32>
    %268 = arith.mulf %81, %267 : vector<2x169xf32>
    %269 = arith.addf %266, %268 : vector<2x169xf32>
    %270 = vector.broadcast %55 : f32 to vector<2x169xf32>
    %271 = arith.addf %269, %270 : vector<2x169xf32>
    %272 = arith.mulf %271, %271 : vector<2x169xf32>
    %cst_64 = arith.constant 1.170710e-01 : f32
    %273 = vector.broadcast %cst_64 : f32 to vector<2x169xf32>
    %274 = arith.mulf %273, %272 : vector<2x169xf32>
    %cst_65 = arith.constant 5.000000e-01 : f32
    %275 = vector.broadcast %cst_65 : f32 to vector<2x169xf32>
    %276 = arith.mulf %275, %271 : vector<2x169xf32>
    %277 = arith.addf %274, %276 : vector<2x169xf32>
    %cst_66 = arith.constant 3.753730e-01 : f32
    %278 = vector.broadcast %cst_66 : f32 to vector<2x169xf32>
    %279 = arith.addf %277, %278 : vector<2x169xf32>
    %280 = vector.broadcast %9 : f32 to vector<2x169xf32>
    %281 = arith.mulf %63, %280 : vector<2x169xf32>
    %282 = vector.broadcast %10 : f32 to vector<2x169xf32>
    %283 = arith.mulf %65, %282 : vector<2x169xf32>
    %284 = arith.addf %281, %283 : vector<2x169xf32>
    %285 = vector.broadcast %11 : f32 to vector<2x169xf32>
    %286 = arith.mulf %67, %285 : vector<2x169xf32>
    %287 = arith.addf %284, %286 : vector<2x169xf32>
    %288 = vector.broadcast %12 : f32 to vector<2x169xf32>
    %289 = arith.mulf %71, %288 : vector<2x169xf32>
    %290 = arith.addf %287, %289 : vector<2x169xf32>
    %291 = vector.broadcast %13 : f32 to vector<2x169xf32>
    %292 = arith.mulf %73, %291 : vector<2x169xf32>
    %293 = arith.addf %290, %292 : vector<2x169xf32>
    %294 = vector.broadcast %14 : f32 to vector<2x169xf32>
    %295 = arith.mulf %75, %294 : vector<2x169xf32>
    %296 = arith.addf %293, %295 : vector<2x169xf32>
    %297 = vector.broadcast %15 : f32 to vector<2x169xf32>
    %298 = arith.mulf %79, %297 : vector<2x169xf32>
    %299 = arith.addf %296, %298 : vector<2x169xf32>
    %300 = vector.broadcast %16 : f32 to vector<2x169xf32>
    %301 = arith.mulf %81, %300 : vector<2x169xf32>
    %302 = arith.addf %299, %301 : vector<2x169xf32>
    %303 = vector.broadcast %17 : f32 to vector<2x169xf32>
    %304 = arith.mulf %83, %303 : vector<2x169xf32>
    %305 = arith.addf %302, %304 : vector<2x169xf32>
    %306 = vector.broadcast %55 : f32 to vector<2x169xf32>
    %307 = arith.addf %305, %306 : vector<2x169xf32>
    %308 = arith.mulf %307, %307 : vector<2x169xf32>
    %cst_67 = arith.constant 1.170710e-01 : f32
    %309 = vector.broadcast %cst_67 : f32 to vector<2x169xf32>
    %310 = arith.mulf %309, %308 : vector<2x169xf32>
    %cst_68 = arith.constant 5.000000e-01 : f32
    %311 = vector.broadcast %cst_68 : f32 to vector<2x169xf32>
    %312 = arith.mulf %311, %307 : vector<2x169xf32>
    %313 = arith.addf %310, %312 : vector<2x169xf32>
    %cst_69 = arith.constant 3.753730e-01 : f32
    %314 = vector.broadcast %cst_69 : f32 to vector<2x169xf32>
    %315 = arith.addf %313, %314 : vector<2x169xf32>
    %316 = arith.addf %279, %315 : vector<2x169xf32>
    %317 = vector.broadcast %9 : f32 to vector<2x169xf32>
    %318 = arith.mulf %69, %317 : vector<2x169xf32>
    %319 = vector.broadcast %10 : f32 to vector<2x169xf32>
    %320 = arith.mulf %71, %319 : vector<2x169xf32>
    %321 = arith.addf %318, %320 : vector<2x169xf32>
    %322 = vector.broadcast %11 : f32 to vector<2x169xf32>
    %323 = arith.mulf %73, %322 : vector<2x169xf32>
    %324 = arith.addf %321, %323 : vector<2x169xf32>
    %325 = vector.broadcast %12 : f32 to vector<2x169xf32>
    %326 = arith.mulf %77, %325 : vector<2x169xf32>
    %327 = arith.addf %324, %326 : vector<2x169xf32>
    %328 = vector.broadcast %13 : f32 to vector<2x169xf32>
    %329 = arith.mulf %79, %328 : vector<2x169xf32>
    %330 = arith.addf %327, %329 : vector<2x169xf32>
    %331 = vector.broadcast %14 : f32 to vector<2x169xf32>
    %332 = arith.mulf %81, %331 : vector<2x169xf32>
    %333 = arith.addf %330, %332 : vector<2x169xf32>
    %334 = vector.broadcast %15 : f32 to vector<2x169xf32>
    %335 = arith.mulf %85, %334 : vector<2x169xf32>
    %336 = arith.addf %333, %335 : vector<2x169xf32>
    %337 = vector.broadcast %16 : f32 to vector<2x169xf32>
    %338 = arith.mulf %87, %337 : vector<2x169xf32>
    %339 = arith.addf %336, %338 : vector<2x169xf32>
    %340 = vector.broadcast %17 : f32 to vector<2x169xf32>
    %341 = arith.mulf %89, %340 : vector<2x169xf32>
    %342 = arith.addf %339, %341 : vector<2x169xf32>
    %343 = vector.broadcast %55 : f32 to vector<2x169xf32>
    %344 = arith.addf %342, %343 : vector<2x169xf32>
    %345 = arith.mulf %344, %344 : vector<2x169xf32>
    %cst_70 = arith.constant 1.170710e-01 : f32
    %346 = vector.broadcast %cst_70 : f32 to vector<2x169xf32>
    %347 = arith.mulf %346, %345 : vector<2x169xf32>
    %cst_71 = arith.constant 5.000000e-01 : f32
    %348 = vector.broadcast %cst_71 : f32 to vector<2x169xf32>
    %349 = arith.mulf %348, %344 : vector<2x169xf32>
    %350 = arith.addf %347, %349 : vector<2x169xf32>
    %cst_72 = arith.constant 3.753730e-01 : f32
    %351 = vector.broadcast %cst_72 : f32 to vector<2x169xf32>
    %352 = arith.addf %350, %351 : vector<2x169xf32>
    %353 = arith.addf %316, %352 : vector<2x169xf32>
    %354 = vector.broadcast %9 : f32 to vector<2x169xf32>
    %355 = arith.mulf %71, %354 : vector<2x169xf32>
    %356 = vector.broadcast %10 : f32 to vector<2x169xf32>
    %357 = arith.mulf %73, %356 : vector<2x169xf32>
    %358 = arith.addf %355, %357 : vector<2x169xf32>
    %359 = vector.broadcast %11 : f32 to vector<2x169xf32>
    %360 = arith.mulf %75, %359 : vector<2x169xf32>
    %361 = arith.addf %358, %360 : vector<2x169xf32>
    %362 = vector.broadcast %12 : f32 to vector<2x169xf32>
    %363 = arith.mulf %79, %362 : vector<2x169xf32>
    %364 = arith.addf %361, %363 : vector<2x169xf32>
    %365 = vector.broadcast %13 : f32 to vector<2x169xf32>
    %366 = arith.mulf %81, %365 : vector<2x169xf32>
    %367 = arith.addf %364, %366 : vector<2x169xf32>
    %368 = vector.broadcast %14 : f32 to vector<2x169xf32>
    %369 = arith.mulf %83, %368 : vector<2x169xf32>
    %370 = arith.addf %367, %369 : vector<2x169xf32>
    %371 = vector.broadcast %15 : f32 to vector<2x169xf32>
    %372 = arith.mulf %87, %371 : vector<2x169xf32>
    %373 = arith.addf %370, %372 : vector<2x169xf32>
    %374 = vector.broadcast %16 : f32 to vector<2x169xf32>
    %375 = arith.mulf %89, %374 : vector<2x169xf32>
    %376 = arith.addf %373, %375 : vector<2x169xf32>
    %377 = vector.broadcast %17 : f32 to vector<2x169xf32>
    %378 = arith.mulf %91, %377 : vector<2x169xf32>
    %379 = arith.addf %376, %378 : vector<2x169xf32>
    %380 = vector.broadcast %55 : f32 to vector<2x169xf32>
    %381 = arith.addf %379, %380 : vector<2x169xf32>
    %382 = arith.mulf %381, %381 : vector<2x169xf32>
    %cst_73 = arith.constant 1.170710e-01 : f32
    %383 = vector.broadcast %cst_73 : f32 to vector<2x169xf32>
    %384 = arith.mulf %383, %382 : vector<2x169xf32>
    %cst_74 = arith.constant 5.000000e-01 : f32
    %385 = vector.broadcast %cst_74 : f32 to vector<2x169xf32>
    %386 = arith.mulf %385, %381 : vector<2x169xf32>
    %387 = arith.addf %384, %386 : vector<2x169xf32>
    %cst_75 = arith.constant 3.753730e-01 : f32
    %388 = vector.broadcast %cst_75 : f32 to vector<2x169xf32>
    %389 = arith.addf %387, %388 : vector<2x169xf32>
    %390 = arith.addf %353, %389 : vector<2x169xf32>
    %c1_76 = arith.constant 1 : index
    %c0_77 = arith.constant 0 : index
    %c0_78 = arith.constant 0 : index
    %391 = vector.load %arg2[%c1_76, %c0_77, %c0_78] : memref<6x169x120xf32, #tpu.memory_space<vmem>>, vector<1x169x120xf32>
    %392 = vector.shape_cast %391 : vector<1x169x120xf32> to vector<169x120xf32>
    %cst_79 = arith.constant dense<0.000000e+00> : vector<2x120xf32>
    %393 = tpu.matmul %390, %392, %cst_79 {dimension_numbers = #tpu.dot_dimension_numbers<[1], [0], [0], [1], [0, 0, 1, 1], [], []>} : vector<2x169xf32>, vector<169x120xf32>, vector<2x120xf32> -> vector<2x120xf32>
    %394 = arith.addf %243, %393 : vector<2x120xf32>
    %395 = vector.broadcast %18 : f32 to vector<2x169xf32>
    %396 = arith.mulf %61, %395 : vector<2x169xf32>
    %397 = vector.broadcast %19 : f32 to vector<2x169xf32>
    %398 = arith.mulf %63, %397 : vector<2x169xf32>
    %399 = arith.addf %396, %398 : vector<2x169xf32>
    %400 = vector.broadcast %20 : f32 to vector<2x169xf32>
    %401 = arith.mulf %65, %400 : vector<2x169xf32>
    %402 = arith.addf %399, %401 : vector<2x169xf32>
    %403 = vector.broadcast %21 : f32 to vector<2x169xf32>
    %404 = arith.mulf %69, %403 : vector<2x169xf32>
    %405 = arith.addf %402, %404 : vector<2x169xf32>
    %406 = vector.broadcast %22 : f32 to vector<2x169xf32>
    %407 = arith.mulf %71, %406 : vector<2x169xf32>
    %408 = arith.addf %405, %407 : vector<2x169xf32>
    %409 = vector.broadcast %23 : f32 to vector<2x169xf32>
    %410 = arith.mulf %73, %409 : vector<2x169xf32>
    %411 = arith.addf %408, %410 : vector<2x169xf32>
    %412 = vector.broadcast %24 : f32 to vector<2x169xf32>
    %413 = arith.mulf %77, %412 : vector<2x169xf32>
    %414 = arith.addf %411, %413 : vector<2x169xf32>
    %415 = vector.broadcast %25 : f32 to vector<2x169xf32>
    %416 = arith.mulf %79, %415 : vector<2x169xf32>
    %417 = arith.addf %414, %416 : vector<2x169xf32>
    %418 = vector.broadcast %26 : f32 to vector<2x169xf32>
    %419 = arith.mulf %81, %418 : vector<2x169xf32>
    %420 = arith.addf %417, %419 : vector<2x169xf32>
    %421 = vector.broadcast %56 : f32 to vector<2x169xf32>
    %422 = arith.addf %420, %421 : vector<2x169xf32>
    %423 = arith.mulf %422, %422 : vector<2x169xf32>
    %cst_80 = arith.constant 1.170710e-01 : f32
    %424 = vector.broadcast %cst_80 : f32 to vector<2x169xf32>
    %425 = arith.mulf %424, %423 : vector<2x169xf32>
    %cst_81 = arith.constant 5.000000e-01 : f32
    %426 = vector.broadcast %cst_81 : f32 to vector<2x169xf32>
    %427 = arith.mulf %426, %422 : vector<2x169xf32>
    %428 = arith.addf %425, %427 : vector<2x169xf32>
    %cst_82 = arith.constant 3.753730e-01 : f32
    %429 = vector.broadcast %cst_82 : f32 to vector<2x169xf32>
    %430 = arith.addf %428, %429 : vector<2x169xf32>
    %431 = vector.broadcast %18 : f32 to vector<2x169xf32>
    %432 = arith.mulf %63, %431 : vector<2x169xf32>
    %433 = vector.broadcast %19 : f32 to vector<2x169xf32>
    %434 = arith.mulf %65, %433 : vector<2x169xf32>
    %435 = arith.addf %432, %434 : vector<2x169xf32>
    %436 = vector.broadcast %20 : f32 to vector<2x169xf32>
    %437 = arith.mulf %67, %436 : vector<2x169xf32>
    %438 = arith.addf %435, %437 : vector<2x169xf32>
    %439 = vector.broadcast %21 : f32 to vector<2x169xf32>
    %440 = arith.mulf %71, %439 : vector<2x169xf32>
    %441 = arith.addf %438, %440 : vector<2x169xf32>
    %442 = vector.broadcast %22 : f32 to vector<2x169xf32>
    %443 = arith.mulf %73, %442 : vector<2x169xf32>
    %444 = arith.addf %441, %443 : vector<2x169xf32>
    %445 = vector.broadcast %23 : f32 to vector<2x169xf32>
    %446 = arith.mulf %75, %445 : vector<2x169xf32>
    %447 = arith.addf %444, %446 : vector<2x169xf32>
    %448 = vector.broadcast %24 : f32 to vector<2x169xf32>
    %449 = arith.mulf %79, %448 : vector<2x169xf32>
    %450 = arith.addf %447, %449 : vector<2x169xf32>
    %451 = vector.broadcast %25 : f32 to vector<2x169xf32>
    %452 = arith.mulf %81, %451 : vector<2x169xf32>
    %453 = arith.addf %450, %452 : vector<2x169xf32>
    %454 = vector.broadcast %26 : f32 to vector<2x169xf32>
    %455 = arith.mulf %83, %454 : vector<2x169xf32>
    %456 = arith.addf %453, %455 : vector<2x169xf32>
    %457 = vector.broadcast %56 : f32 to vector<2x169xf32>
    %458 = arith.addf %456, %457 : vector<2x169xf32>
    %459 = arith.mulf %458, %458 : vector<2x169xf32>
    %cst_83 = arith.constant 1.170710e-01 : f32
    %460 = vector.broadcast %cst_83 : f32 to vector<2x169xf32>
    %461 = arith.mulf %460, %459 : vector<2x169xf32>
    %cst_84 = arith.constant 5.000000e-01 : f32
    %462 = vector.broadcast %cst_84 : f32 to vector<2x169xf32>
    %463 = arith.mulf %462, %458 : vector<2x169xf32>
    %464 = arith.addf %461, %463 : vector<2x169xf32>
    %cst_85 = arith.constant 3.753730e-01 : f32
    %465 = vector.broadcast %cst_85 : f32 to vector<2x169xf32>
    %466 = arith.addf %464, %465 : vector<2x169xf32>
    %467 = arith.addf %430, %466 : vector<2x169xf32>
    %468 = vector.broadcast %18 : f32 to vector<2x169xf32>
    %469 = arith.mulf %69, %468 : vector<2x169xf32>
    %470 = vector.broadcast %19 : f32 to vector<2x169xf32>
    %471 = arith.mulf %71, %470 : vector<2x169xf32>
    %472 = arith.addf %469, %471 : vector<2x169xf32>
    %473 = vector.broadcast %20 : f32 to vector<2x169xf32>
    %474 = arith.mulf %73, %473 : vector<2x169xf32>
    %475 = arith.addf %472, %474 : vector<2x169xf32>
    %476 = vector.broadcast %21 : f32 to vector<2x169xf32>
    %477 = arith.mulf %77, %476 : vector<2x169xf32>
    %478 = arith.addf %475, %477 : vector<2x169xf32>
    %479 = vector.broadcast %22 : f32 to vector<2x169xf32>
    %480 = arith.mulf %79, %479 : vector<2x169xf32>
    %481 = arith.addf %478, %480 : vector<2x169xf32>
    %482 = vector.broadcast %23 : f32 to vector<2x169xf32>
    %483 = arith.mulf %81, %482 : vector<2x169xf32>
    %484 = arith.addf %481, %483 : vector<2x169xf32>
    %485 = vector.broadcast %24 : f32 to vector<2x169xf32>
    %486 = arith.mulf %85, %485 : vector<2x169xf32>
    %487 = arith.addf %484, %486 : vector<2x169xf32>
    %488 = vector.broadcast %25 : f32 to vector<2x169xf32>
    %489 = arith.mulf %87, %488 : vector<2x169xf32>
    %490 = arith.addf %487, %489 : vector<2x169xf32>
    %491 = vector.broadcast %26 : f32 to vector<2x169xf32>
    %492 = arith.mulf %89, %491 : vector<2x169xf32>
    %493 = arith.addf %490, %492 : vector<2x169xf32>
    %494 = vector.broadcast %56 : f32 to vector<2x169xf32>
    %495 = arith.addf %493, %494 : vector<2x169xf32>
    %496 = arith.mulf %495, %495 : vector<2x169xf32>
    %cst_86 = arith.constant 1.170710e-01 : f32
    %497 = vector.broadcast %cst_86 : f32 to vector<2x169xf32>
    %498 = arith.mulf %497, %496 : vector<2x169xf32>
    %cst_87 = arith.constant 5.000000e-01 : f32
    %499 = vector.broadcast %cst_87 : f32 to vector<2x169xf32>
    %500 = arith.mulf %499, %495 : vector<2x169xf32>
    %501 = arith.addf %498, %500 : vector<2x169xf32>
    %cst_88 = arith.constant 3.753730e-01 : f32
    %502 = vector.broadcast %cst_88 : f32 to vector<2x169xf32>
    %503 = arith.addf %501, %502 : vector<2x169xf32>
    %504 = arith.addf %467, %503 : vector<2x169xf32>
    %505 = vector.broadcast %18 : f32 to vector<2x169xf32>
    %506 = arith.mulf %71, %505 : vector<2x169xf32>
    %507 = vector.broadcast %19 : f32 to vector<2x169xf32>
    %508 = arith.mulf %73, %507 : vector<2x169xf32>
    %509 = arith.addf %506, %508 : vector<2x169xf32>
    %510 = vector.broadcast %20 : f32 to vector<2x169xf32>
    %511 = arith.mulf %75, %510 : vector<2x169xf32>
    %512 = arith.addf %509, %511 : vector<2x169xf32>
    %513 = vector.broadcast %21 : f32 to vector<2x169xf32>
    %514 = arith.mulf %79, %513 : vector<2x169xf32>
    %515 = arith.addf %512, %514 : vector<2x169xf32>
    %516 = vector.broadcast %22 : f32 to vector<2x169xf32>
    %517 = arith.mulf %81, %516 : vector<2x169xf32>
    %518 = arith.addf %515, %517 : vector<2x169xf32>
    %519 = vector.broadcast %23 : f32 to vector<2x169xf32>
    %520 = arith.mulf %83, %519 : vector<2x169xf32>
    %521 = arith.addf %518, %520 : vector<2x169xf32>
    %522 = vector.broadcast %24 : f32 to vector<2x169xf32>
    %523 = arith.mulf %87, %522 : vector<2x169xf32>
    %524 = arith.addf %521, %523 : vector<2x169xf32>
    %525 = vector.broadcast %25 : f32 to vector<2x169xf32>
    %526 = arith.mulf %89, %525 : vector<2x169xf32>
    %527 = arith.addf %524, %526 : vector<2x169xf32>
    %528 = vector.broadcast %26 : f32 to vector<2x169xf32>
    %529 = arith.mulf %91, %528 : vector<2x169xf32>
    %530 = arith.addf %527, %529 : vector<2x169xf32>
    %531 = vector.broadcast %56 : f32 to vector<2x169xf32>
    %532 = arith.addf %530, %531 : vector<2x169xf32>
    %533 = arith.mulf %532, %532 : vector<2x169xf32>
    %cst_89 = arith.constant 1.170710e-01 : f32
    %534 = vector.broadcast %cst_89 : f32 to vector<2x169xf32>
    %535 = arith.mulf %534, %533 : vector<2x169xf32>
    %cst_90 = arith.constant 5.000000e-01 : f32
    %536 = vector.broadcast %cst_90 : f32 to vector<2x169xf32>
    %537 = arith.mulf %536, %532 : vector<2x169xf32>
    %538 = arith.addf %535, %537 : vector<2x169xf32>
    %cst_91 = arith.constant 3.753730e-01 : f32
    %539 = vector.broadcast %cst_91 : f32 to vector<2x169xf32>
    %540 = arith.addf %538, %539 : vector<2x169xf32>
    %541 = arith.addf %504, %540 : vector<2x169xf32>
    %c2_92 = arith.constant 2 : index
    %c0_93 = arith.constant 0 : index
    %c0_94 = arith.constant 0 : index
    %542 = vector.load %arg2[%c2_92, %c0_93, %c0_94] : memref<6x169x120xf32, #tpu.memory_space<vmem>>, vector<1x169x120xf32>
    %543 = vector.shape_cast %542 : vector<1x169x120xf32> to vector<169x120xf32>
    %cst_95 = arith.constant dense<0.000000e+00> : vector<2x120xf32>
    %544 = tpu.matmul %541, %543, %cst_95 {dimension_numbers = #tpu.dot_dimension_numbers<[1], [0], [0], [1], [0, 0, 1, 1], [], []>} : vector<2x169xf32>, vector<169x120xf32>, vector<2x120xf32> -> vector<2x120xf32>
    %545 = arith.addf %394, %544 : vector<2x120xf32>
    %546 = vector.broadcast %27 : f32 to vector<2x169xf32>
    %547 = arith.mulf %61, %546 : vector<2x169xf32>
    %548 = vector.broadcast %28 : f32 to vector<2x169xf32>
    %549 = arith.mulf %63, %548 : vector<2x169xf32>
    %550 = arith.addf %547, %549 : vector<2x169xf32>
    %551 = vector.broadcast %29 : f32 to vector<2x169xf32>
    %552 = arith.mulf %65, %551 : vector<2x169xf32>
    %553 = arith.addf %550, %552 : vector<2x169xf32>
    %554 = vector.broadcast %30 : f32 to vector<2x169xf32>
    %555 = arith.mulf %69, %554 : vector<2x169xf32>
    %556 = arith.addf %553, %555 : vector<2x169xf32>
    %557 = vector.broadcast %31 : f32 to vector<2x169xf32>
    %558 = arith.mulf %71, %557 : vector<2x169xf32>
    %559 = arith.addf %556, %558 : vector<2x169xf32>
    %560 = vector.broadcast %32 : f32 to vector<2x169xf32>
    %561 = arith.mulf %73, %560 : vector<2x169xf32>
    %562 = arith.addf %559, %561 : vector<2x169xf32>
    %563 = vector.broadcast %33 : f32 to vector<2x169xf32>
    %564 = arith.mulf %77, %563 : vector<2x169xf32>
    %565 = arith.addf %562, %564 : vector<2x169xf32>
    %566 = vector.broadcast %34 : f32 to vector<2x169xf32>
    %567 = arith.mulf %79, %566 : vector<2x169xf32>
    %568 = arith.addf %565, %567 : vector<2x169xf32>
    %569 = vector.broadcast %35 : f32 to vector<2x169xf32>
    %570 = arith.mulf %81, %569 : vector<2x169xf32>
    %571 = arith.addf %568, %570 : vector<2x169xf32>
    %572 = vector.broadcast %57 : f32 to vector<2x169xf32>
    %573 = arith.addf %571, %572 : vector<2x169xf32>
    %574 = arith.mulf %573, %573 : vector<2x169xf32>
    %cst_96 = arith.constant 1.170710e-01 : f32
    %575 = vector.broadcast %cst_96 : f32 to vector<2x169xf32>
    %576 = arith.mulf %575, %574 : vector<2x169xf32>
    %cst_97 = arith.constant 5.000000e-01 : f32
    %577 = vector.broadcast %cst_97 : f32 to vector<2x169xf32>
    %578 = arith.mulf %577, %573 : vector<2x169xf32>
    %579 = arith.addf %576, %578 : vector<2x169xf32>
    %cst_98 = arith.constant 3.753730e-01 : f32
    %580 = vector.broadcast %cst_98 : f32 to vector<2x169xf32>
    %581 = arith.addf %579, %580 : vector<2x169xf32>
    %582 = vector.broadcast %27 : f32 to vector<2x169xf32>
    %583 = arith.mulf %63, %582 : vector<2x169xf32>
    %584 = vector.broadcast %28 : f32 to vector<2x169xf32>
    %585 = arith.mulf %65, %584 : vector<2x169xf32>
    %586 = arith.addf %583, %585 : vector<2x169xf32>
    %587 = vector.broadcast %29 : f32 to vector<2x169xf32>
    %588 = arith.mulf %67, %587 : vector<2x169xf32>
    %589 = arith.addf %586, %588 : vector<2x169xf32>
    %590 = vector.broadcast %30 : f32 to vector<2x169xf32>
    %591 = arith.mulf %71, %590 : vector<2x169xf32>
    %592 = arith.addf %589, %591 : vector<2x169xf32>
    %593 = vector.broadcast %31 : f32 to vector<2x169xf32>
    %594 = arith.mulf %73, %593 : vector<2x169xf32>
    %595 = arith.addf %592, %594 : vector<2x169xf32>
    %596 = vector.broadcast %32 : f32 to vector<2x169xf32>
    %597 = arith.mulf %75, %596 : vector<2x169xf32>
    %598 = arith.addf %595, %597 : vector<2x169xf32>
    %599 = vector.broadcast %33 : f32 to vector<2x169xf32>
    %600 = arith.mulf %79, %599 : vector<2x169xf32>
    %601 = arith.addf %598, %600 : vector<2x169xf32>
    %602 = vector.broadcast %34 : f32 to vector<2x169xf32>
    %603 = arith.mulf %81, %602 : vector<2x169xf32>
    %604 = arith.addf %601, %603 : vector<2x169xf32>
    %605 = vector.broadcast %35 : f32 to vector<2x169xf32>
    %606 = arith.mulf %83, %605 : vector<2x169xf32>
    %607 = arith.addf %604, %606 : vector<2x169xf32>
    %608 = vector.broadcast %57 : f32 to vector<2x169xf32>
    %609 = arith.addf %607, %608 : vector<2x169xf32>
    %610 = arith.mulf %609, %609 : vector<2x169xf32>
    %cst_99 = arith.constant 1.170710e-01 : f32
    %611 = vector.broadcast %cst_99 : f32 to vector<2x169xf32>
    %612 = arith.mulf %611, %610 : vector<2x169xf32>
    %cst_100 = arith.constant 5.000000e-01 : f32
    %613 = vector.broadcast %cst_100 : f32 to vector<2x169xf32>
    %614 = arith.mulf %613, %609 : vector<2x169xf32>
    %615 = arith.addf %612, %614 : vector<2x169xf32>
    %cst_101 = arith.constant 3.753730e-01 : f32
    %616 = vector.broadcast %cst_101 : f32 to vector<2x169xf32>
    %617 = arith.addf %615, %616 : vector<2x169xf32>
    %618 = arith.addf %581, %617 : vector<2x169xf32>
    %619 = vector.broadcast %27 : f32 to vector<2x169xf32>
    %620 = arith.mulf %69, %619 : vector<2x169xf32>
    %621 = vector.broadcast %28 : f32 to vector<2x169xf32>
    %622 = arith.mulf %71, %621 : vector<2x169xf32>
    %623 = arith.addf %620, %622 : vector<2x169xf32>
    %624 = vector.broadcast %29 : f32 to vector<2x169xf32>
    %625 = arith.mulf %73, %624 : vector<2x169xf32>
    %626 = arith.addf %623, %625 : vector<2x169xf32>
    %627 = vector.broadcast %30 : f32 to vector<2x169xf32>
    %628 = arith.mulf %77, %627 : vector<2x169xf32>
    %629 = arith.addf %626, %628 : vector<2x169xf32>
    %630 = vector.broadcast %31 : f32 to vector<2x169xf32>
    %631 = arith.mulf %79, %630 : vector<2x169xf32>
    %632 = arith.addf %629, %631 : vector<2x169xf32>
    %633 = vector.broadcast %32 : f32 to vector<2x169xf32>
    %634 = arith.mulf %81, %633 : vector<2x169xf32>
    %635 = arith.addf %632, %634 : vector<2x169xf32>
    %636 = vector.broadcast %33 : f32 to vector<2x169xf32>
    %637 = arith.mulf %85, %636 : vector<2x169xf32>
    %638 = arith.addf %635, %637 : vector<2x169xf32>
    %639 = vector.broadcast %34 : f32 to vector<2x169xf32>
    %640 = arith.mulf %87, %639 : vector<2x169xf32>
    %641 = arith.addf %638, %640 : vector<2x169xf32>
    %642 = vector.broadcast %35 : f32 to vector<2x169xf32>
    %643 = arith.mulf %89, %642 : vector<2x169xf32>
    %644 = arith.addf %641, %643 : vector<2x169xf32>
    %645 = vector.broadcast %57 : f32 to vector<2x169xf32>
    %646 = arith.addf %644, %645 : vector<2x169xf32>
    %647 = arith.mulf %646, %646 : vector<2x169xf32>
    %cst_102 = arith.constant 1.170710e-01 : f32
    %648 = vector.broadcast %cst_102 : f32 to vector<2x169xf32>
    %649 = arith.mulf %648, %647 : vector<2x169xf32>
    %cst_103 = arith.constant 5.000000e-01 : f32
    %650 = vector.broadcast %cst_103 : f32 to vector<2x169xf32>
    %651 = arith.mulf %650, %646 : vector<2x169xf32>
    %652 = arith.addf %649, %651 : vector<2x169xf32>
    %cst_104 = arith.constant 3.753730e-01 : f32
    %653 = vector.broadcast %cst_104 : f32 to vector<2x169xf32>
    %654 = arith.addf %652, %653 : vector<2x169xf32>
    %655 = arith.addf %618, %654 : vector<2x169xf32>
    %656 = vector.broadcast %27 : f32 to vector<2x169xf32>
    %657 = arith.mulf %71, %656 : vector<2x169xf32>
    %658 = vector.broadcast %28 : f32 to vector<2x169xf32>
    %659 = arith.mulf %73, %658 : vector<2x169xf32>
    %660 = arith.addf %657, %659 : vector<2x169xf32>
    %661 = vector.broadcast %29 : f32 to vector<2x169xf32>
    %662 = arith.mulf %75, %661 : vector<2x169xf32>
    %663 = arith.addf %660, %662 : vector<2x169xf32>
    %664 = vector.broadcast %30 : f32 to vector<2x169xf32>
    %665 = arith.mulf %79, %664 : vector<2x169xf32>
    %666 = arith.addf %663, %665 : vector<2x169xf32>
    %667 = vector.broadcast %31 : f32 to vector<2x169xf32>
    %668 = arith.mulf %81, %667 : vector<2x169xf32>
    %669 = arith.addf %666, %668 : vector<2x169xf32>
    %670 = vector.broadcast %32 : f32 to vector<2x169xf32>
    %671 = arith.mulf %83, %670 : vector<2x169xf32>
    %672 = arith.addf %669, %671 : vector<2x169xf32>
    %673 = vector.broadcast %33 : f32 to vector<2x169xf32>
    %674 = arith.mulf %87, %673 : vector<2x169xf32>
    %675 = arith.addf %672, %674 : vector<2x169xf32>
    %676 = vector.broadcast %34 : f32 to vector<2x169xf32>
    %677 = arith.mulf %89, %676 : vector<2x169xf32>
    %678 = arith.addf %675, %677 : vector<2x169xf32>
    %679 = vector.broadcast %35 : f32 to vector<2x169xf32>
    %680 = arith.mulf %91, %679 : vector<2x169xf32>
    %681 = arith.addf %678, %680 : vector<2x169xf32>
    %682 = vector.broadcast %57 : f32 to vector<2x169xf32>
    %683 = arith.addf %681, %682 : vector<2x169xf32>
    %684 = arith.mulf %683, %683 : vector<2x169xf32>
    %cst_105 = arith.constant 1.170710e-01 : f32
    %685 = vector.broadcast %cst_105 : f32 to vector<2x169xf32>
    %686 = arith.mulf %685, %684 : vector<2x169xf32>
    %cst_106 = arith.constant 5.000000e-01 : f32
    %687 = vector.broadcast %cst_106 : f32 to vector<2x169xf32>
    %688 = arith.mulf %687, %683 : vector<2x169xf32>
    %689 = arith.addf %686, %688 : vector<2x169xf32>
    %cst_107 = arith.constant 3.753730e-01 : f32
    %690 = vector.broadcast %cst_107 : f32 to vector<2x169xf32>
    %691 = arith.addf %689, %690 : vector<2x169xf32>
    %692 = arith.addf %655, %691 : vector<2x169xf32>
    %c3_108 = arith.constant 3 : index
    %c0_109 = arith.constant 0 : index
    %c0_110 = arith.constant 0 : index
    %693 = vector.load %arg2[%c3_108, %c0_109, %c0_110] : memref<6x169x120xf32, #tpu.memory_space<vmem>>, vector<1x169x120xf32>
    %694 = vector.shape_cast %693 : vector<1x169x120xf32> to vector<169x120xf32>
    %cst_111 = arith.constant dense<0.000000e+00> : vector<2x120xf32>
    %695 = tpu.matmul %692, %694, %cst_111 {dimension_numbers = #tpu.dot_dimension_numbers<[1], [0], [0], [1], [0, 0, 1, 1], [], []>} : vector<2x169xf32>, vector<169x120xf32>, vector<2x120xf32> -> vector<2x120xf32>
    %696 = arith.addf %545, %695 : vector<2x120xf32>
    %697 = vector.broadcast %36 : f32 to vector<2x169xf32>
    %698 = arith.mulf %61, %697 : vector<2x169xf32>
    %699 = vector.broadcast %37 : f32 to vector<2x169xf32>
    %700 = arith.mulf %63, %699 : vector<2x169xf32>
    %701 = arith.addf %698, %700 : vector<2x169xf32>
    %702 = vector.broadcast %38 : f32 to vector<2x169xf32>
    %703 = arith.mulf %65, %702 : vector<2x169xf32>
    %704 = arith.addf %701, %703 : vector<2x169xf32>
    %705 = vector.broadcast %39 : f32 to vector<2x169xf32>
    %706 = arith.mulf %69, %705 : vector<2x169xf32>
    %707 = arith.addf %704, %706 : vector<2x169xf32>
    %708 = vector.broadcast %40 : f32 to vector<2x169xf32>
    %709 = arith.mulf %71, %708 : vector<2x169xf32>
    %710 = arith.addf %707, %709 : vector<2x169xf32>
    %711 = vector.broadcast %41 : f32 to vector<2x169xf32>
    %712 = arith.mulf %73, %711 : vector<2x169xf32>
    %713 = arith.addf %710, %712 : vector<2x169xf32>
    %714 = vector.broadcast %42 : f32 to vector<2x169xf32>
    %715 = arith.mulf %77, %714 : vector<2x169xf32>
    %716 = arith.addf %713, %715 : vector<2x169xf32>
    %717 = vector.broadcast %43 : f32 to vector<2x169xf32>
    %718 = arith.mulf %79, %717 : vector<2x169xf32>
    %719 = arith.addf %716, %718 : vector<2x169xf32>
    %720 = vector.broadcast %44 : f32 to vector<2x169xf32>
    %721 = arith.mulf %81, %720 : vector<2x169xf32>
    %722 = arith.addf %719, %721 : vector<2x169xf32>
    %723 = vector.broadcast %58 : f32 to vector<2x169xf32>
    %724 = arith.addf %722, %723 : vector<2x169xf32>
    %725 = arith.mulf %724, %724 : vector<2x169xf32>
    %cst_112 = arith.constant 1.170710e-01 : f32
    %726 = vector.broadcast %cst_112 : f32 to vector<2x169xf32>
    %727 = arith.mulf %726, %725 : vector<2x169xf32>
    %cst_113 = arith.constant 5.000000e-01 : f32
    %728 = vector.broadcast %cst_113 : f32 to vector<2x169xf32>
    %729 = arith.mulf %728, %724 : vector<2x169xf32>
    %730 = arith.addf %727, %729 : vector<2x169xf32>
    %cst_114 = arith.constant 3.753730e-01 : f32
    %731 = vector.broadcast %cst_114 : f32 to vector<2x169xf32>
    %732 = arith.addf %730, %731 : vector<2x169xf32>
    %733 = vector.broadcast %36 : f32 to vector<2x169xf32>
    %734 = arith.mulf %63, %733 : vector<2x169xf32>
    %735 = vector.broadcast %37 : f32 to vector<2x169xf32>
    %736 = arith.mulf %65, %735 : vector<2x169xf32>
    %737 = arith.addf %734, %736 : vector<2x169xf32>
    %738 = vector.broadcast %38 : f32 to vector<2x169xf32>
    %739 = arith.mulf %67, %738 : vector<2x169xf32>
    %740 = arith.addf %737, %739 : vector<2x169xf32>
    %741 = vector.broadcast %39 : f32 to vector<2x169xf32>
    %742 = arith.mulf %71, %741 : vector<2x169xf32>
    %743 = arith.addf %740, %742 : vector<2x169xf32>
    %744 = vector.broadcast %40 : f32 to vector<2x169xf32>
    %745 = arith.mulf %73, %744 : vector<2x169xf32>
    %746 = arith.addf %743, %745 : vector<2x169xf32>
    %747 = vector.broadcast %41 : f32 to vector<2x169xf32>
    %748 = arith.mulf %75, %747 : vector<2x169xf32>
    %749 = arith.addf %746, %748 : vector<2x169xf32>
    %750 = vector.broadcast %42 : f32 to vector<2x169xf32>
    %751 = arith.mulf %79, %750 : vector<2x169xf32>
    %752 = arith.addf %749, %751 : vector<2x169xf32>
    %753 = vector.broadcast %43 : f32 to vector<2x169xf32>
    %754 = arith.mulf %81, %753 : vector<2x169xf32>
    %755 = arith.addf %752, %754 : vector<2x169xf32>
    %756 = vector.broadcast %44 : f32 to vector<2x169xf32>
    %757 = arith.mulf %83, %756 : vector<2x169xf32>
    %758 = arith.addf %755, %757 : vector<2x169xf32>
    %759 = vector.broadcast %58 : f32 to vector<2x169xf32>
    %760 = arith.addf %758, %759 : vector<2x169xf32>
    %761 = arith.mulf %760, %760 : vector<2x169xf32>
    %cst_115 = arith.constant 1.170710e-01 : f32
    %762 = vector.broadcast %cst_115 : f32 to vector<2x169xf32>
    %763 = arith.mulf %762, %761 : vector<2x169xf32>
    %cst_116 = arith.constant 5.000000e-01 : f32
    %764 = vector.broadcast %cst_116 : f32 to vector<2x169xf32>
    %765 = arith.mulf %764, %760 : vector<2x169xf32>
    %766 = arith.addf %763, %765 : vector<2x169xf32>
    %cst_117 = arith.constant 3.753730e-01 : f32
    %767 = vector.broadcast %cst_117 : f32 to vector<2x169xf32>
    %768 = arith.addf %766, %767 : vector<2x169xf32>
    %769 = arith.addf %732, %768 : vector<2x169xf32>
    %770 = vector.broadcast %36 : f32 to vector<2x169xf32>
    %771 = arith.mulf %69, %770 : vector<2x169xf32>
    %772 = vector.broadcast %37 : f32 to vector<2x169xf32>
    %773 = arith.mulf %71, %772 : vector<2x169xf32>
    %774 = arith.addf %771, %773 : vector<2x169xf32>
    %775 = vector.broadcast %38 : f32 to vector<2x169xf32>
    %776 = arith.mulf %73, %775 : vector<2x169xf32>
    %777 = arith.addf %774, %776 : vector<2x169xf32>
    %778 = vector.broadcast %39 : f32 to vector<2x169xf32>
    %779 = arith.mulf %77, %778 : vector<2x169xf32>
    %780 = arith.addf %777, %779 : vector<2x169xf32>
    %781 = vector.broadcast %40 : f32 to vector<2x169xf32>
    %782 = arith.mulf %79, %781 : vector<2x169xf32>
    %783 = arith.addf %780, %782 : vector<2x169xf32>
    %784 = vector.broadcast %41 : f32 to vector<2x169xf32>
    %785 = arith.mulf %81, %784 : vector<2x169xf32>
    %786 = arith.addf %783, %785 : vector<2x169xf32>
    %787 = vector.broadcast %42 : f32 to vector<2x169xf32>
    %788 = arith.mulf %85, %787 : vector<2x169xf32>
    %789 = arith.addf %786, %788 : vector<2x169xf32>
    %790 = vector.broadcast %43 : f32 to vector<2x169xf32>
    %791 = arith.mulf %87, %790 : vector<2x169xf32>
    %792 = arith.addf %789, %791 : vector<2x169xf32>
    %793 = vector.broadcast %44 : f32 to vector<2x169xf32>
    %794 = arith.mulf %89, %793 : vector<2x169xf32>
    %795 = arith.addf %792, %794 : vector<2x169xf32>
    %796 = vector.broadcast %58 : f32 to vector<2x169xf32>
    %797 = arith.addf %795, %796 : vector<2x169xf32>
    %798 = arith.mulf %797, %797 : vector<2x169xf32>
    %cst_118 = arith.constant 1.170710e-01 : f32
    %799 = vector.broadcast %cst_118 : f32 to vector<2x169xf32>
    %800 = arith.mulf %799, %798 : vector<2x169xf32>
    %cst_119 = arith.constant 5.000000e-01 : f32
    %801 = vector.broadcast %cst_119 : f32 to vector<2x169xf32>
    %802 = arith.mulf %801, %797 : vector<2x169xf32>
    %803 = arith.addf %800, %802 : vector<2x169xf32>
    %cst_120 = arith.constant 3.753730e-01 : f32
    %804 = vector.broadcast %cst_120 : f32 to vector<2x169xf32>
    %805 = arith.addf %803, %804 : vector<2x169xf32>
    %806 = arith.addf %769, %805 : vector<2x169xf32>
    %807 = vector.broadcast %36 : f32 to vector<2x169xf32>
    %808 = arith.mulf %71, %807 : vector<2x169xf32>
    %809 = vector.broadcast %37 : f32 to vector<2x169xf32>
    %810 = arith.mulf %73, %809 : vector<2x169xf32>
    %811 = arith.addf %808, %810 : vector<2x169xf32>
    %812 = vector.broadcast %38 : f32 to vector<2x169xf32>
    %813 = arith.mulf %75, %812 : vector<2x169xf32>
    %814 = arith.addf %811, %813 : vector<2x169xf32>
    %815 = vector.broadcast %39 : f32 to vector<2x169xf32>
    %816 = arith.mulf %79, %815 : vector<2x169xf32>
    %817 = arith.addf %814, %816 : vector<2x169xf32>
    %818 = vector.broadcast %40 : f32 to vector<2x169xf32>
    %819 = arith.mulf %81, %818 : vector<2x169xf32>
    %820 = arith.addf %817, %819 : vector<2x169xf32>
    %821 = vector.broadcast %41 : f32 to vector<2x169xf32>
    %822 = arith.mulf %83, %821 : vector<2x169xf32>
    %823 = arith.addf %820, %822 : vector<2x169xf32>
    %824 = vector.broadcast %42 : f32 to vector<2x169xf32>
    %825 = arith.mulf %87, %824 : vector<2x169xf32>
    %826 = arith.addf %823, %825 : vector<2x169xf32>
    %827 = vector.broadcast %43 : f32 to vector<2x169xf32>
    %828 = arith.mulf %89, %827 : vector<2x169xf32>
    %829 = arith.addf %826, %828 : vector<2x169xf32>
    %830 = vector.broadcast %44 : f32 to vector<2x169xf32>
    %831 = arith.mulf %91, %830 : vector<2x169xf32>
    %832 = arith.addf %829, %831 : vector<2x169xf32>
    %833 = vector.broadcast %58 : f32 to vector<2x169xf32>
    %834 = arith.addf %832, %833 : vector<2x169xf32>
    %835 = arith.mulf %834, %834 : vector<2x169xf32>
    %cst_121 = arith.constant 1.170710e-01 : f32
    %836 = vector.broadcast %cst_121 : f32 to vector<2x169xf32>
    %837 = arith.mulf %836, %835 : vector<2x169xf32>
    %cst_122 = arith.constant 5.000000e-01 : f32
    %838 = vector.broadcast %cst_122 : f32 to vector<2x169xf32>
    %839 = arith.mulf %838, %834 : vector<2x169xf32>
    %840 = arith.addf %837, %839 : vector<2x169xf32>
    %cst_123 = arith.constant 3.753730e-01 : f32
    %841 = vector.broadcast %cst_123 : f32 to vector<2x169xf32>
    %842 = arith.addf %840, %841 : vector<2x169xf32>
    %843 = arith.addf %806, %842 : vector<2x169xf32>
    %c4_124 = arith.constant 4 : index
    %c0_125 = arith.constant 0 : index
    %c0_126 = arith.constant 0 : index
    %844 = vector.load %arg2[%c4_124, %c0_125, %c0_126] : memref<6x169x120xf32, #tpu.memory_space<vmem>>, vector<1x169x120xf32>
    %845 = vector.shape_cast %844 : vector<1x169x120xf32> to vector<169x120xf32>
    %cst_127 = arith.constant dense<0.000000e+00> : vector<2x120xf32>
    %846 = tpu.matmul %843, %845, %cst_127 {dimension_numbers = #tpu.dot_dimension_numbers<[1], [0], [0], [1], [0, 0, 1, 1], [], []>} : vector<2x169xf32>, vector<169x120xf32>, vector<2x120xf32> -> vector<2x120xf32>
    %847 = arith.addf %696, %846 : vector<2x120xf32>
    %848 = vector.broadcast %45 : f32 to vector<2x169xf32>
    %849 = arith.mulf %61, %848 : vector<2x169xf32>
    %850 = vector.broadcast %46 : f32 to vector<2x169xf32>
    %851 = arith.mulf %63, %850 : vector<2x169xf32>
    %852 = arith.addf %849, %851 : vector<2x169xf32>
    %853 = vector.broadcast %47 : f32 to vector<2x169xf32>
    %854 = arith.mulf %65, %853 : vector<2x169xf32>
    %855 = arith.addf %852, %854 : vector<2x169xf32>
    %856 = vector.broadcast %48 : f32 to vector<2x169xf32>
    %857 = arith.mulf %69, %856 : vector<2x169xf32>
    %858 = arith.addf %855, %857 : vector<2x169xf32>
    %859 = vector.broadcast %49 : f32 to vector<2x169xf32>
    %860 = arith.mulf %71, %859 : vector<2x169xf32>
    %861 = arith.addf %858, %860 : vector<2x169xf32>
    %862 = vector.broadcast %50 : f32 to vector<2x169xf32>
    %863 = arith.mulf %73, %862 : vector<2x169xf32>
    %864 = arith.addf %861, %863 : vector<2x169xf32>
    %865 = vector.broadcast %51 : f32 to vector<2x169xf32>
    %866 = arith.mulf %77, %865 : vector<2x169xf32>
    %867 = arith.addf %864, %866 : vector<2x169xf32>
    %868 = vector.broadcast %52 : f32 to vector<2x169xf32>
    %869 = arith.mulf %79, %868 : vector<2x169xf32>
    %870 = arith.addf %867, %869 : vector<2x169xf32>
    %871 = vector.broadcast %53 : f32 to vector<2x169xf32>
    %872 = arith.mulf %81, %871 : vector<2x169xf32>
    %873 = arith.addf %870, %872 : vector<2x169xf32>
    %874 = vector.broadcast %59 : f32 to vector<2x169xf32>
    %875 = arith.addf %873, %874 : vector<2x169xf32>
    %876 = arith.mulf %875, %875 : vector<2x169xf32>
    %cst_128 = arith.constant 1.170710e-01 : f32
    %877 = vector.broadcast %cst_128 : f32 to vector<2x169xf32>
    %878 = arith.mulf %877, %876 : vector<2x169xf32>
    %cst_129 = arith.constant 5.000000e-01 : f32
    %879 = vector.broadcast %cst_129 : f32 to vector<2x169xf32>
    %880 = arith.mulf %879, %875 : vector<2x169xf32>
    %881 = arith.addf %878, %880 : vector<2x169xf32>
    %cst_130 = arith.constant 3.753730e-01 : f32
    %882 = vector.broadcast %cst_130 : f32 to vector<2x169xf32>
    %883 = arith.addf %881, %882 : vector<2x169xf32>
    %884 = vector.broadcast %45 : f32 to vector<2x169xf32>
    %885 = arith.mulf %63, %884 : vector<2x169xf32>
    %886 = vector.broadcast %46 : f32 to vector<2x169xf32>
    %887 = arith.mulf %65, %886 : vector<2x169xf32>
    %888 = arith.addf %885, %887 : vector<2x169xf32>
    %889 = vector.broadcast %47 : f32 to vector<2x169xf32>
    %890 = arith.mulf %67, %889 : vector<2x169xf32>
    %891 = arith.addf %888, %890 : vector<2x169xf32>
    %892 = vector.broadcast %48 : f32 to vector<2x169xf32>
    %893 = arith.mulf %71, %892 : vector<2x169xf32>
    %894 = arith.addf %891, %893 : vector<2x169xf32>
    %895 = vector.broadcast %49 : f32 to vector<2x169xf32>
    %896 = arith.mulf %73, %895 : vector<2x169xf32>
    %897 = arith.addf %894, %896 : vector<2x169xf32>
    %898 = vector.broadcast %50 : f32 to vector<2x169xf32>
    %899 = arith.mulf %75, %898 : vector<2x169xf32>
    %900 = arith.addf %897, %899 : vector<2x169xf32>
    %901 = vector.broadcast %51 : f32 to vector<2x169xf32>
    %902 = arith.mulf %79, %901 : vector<2x169xf32>
    %903 = arith.addf %900, %902 : vector<2x169xf32>
    %904 = vector.broadcast %52 : f32 to vector<2x169xf32>
    %905 = arith.mulf %81, %904 : vector<2x169xf32>
    %906 = arith.addf %903, %905 : vector<2x169xf32>
    %907 = vector.broadcast %53 : f32 to vector<2x169xf32>
    %908 = arith.mulf %83, %907 : vector<2x169xf32>
    %909 = arith.addf %906, %908 : vector<2x169xf32>
    %910 = vector.broadcast %59 : f32 to vector<2x169xf32>
    %911 = arith.addf %909, %910 : vector<2x169xf32>
    %912 = arith.mulf %911, %911 : vector<2x169xf32>
    %cst_131 = arith.constant 1.170710e-01 : f32
    %913 = vector.broadcast %cst_131 : f32 to vector<2x169xf32>
    %914 = arith.mulf %913, %912 : vector<2x169xf32>
    %cst_132 = arith.constant 5.000000e-01 : f32
    %915 = vector.broadcast %cst_132 : f32 to vector<2x169xf32>
    %916 = arith.mulf %915, %911 : vector<2x169xf32>
    %917 = arith.addf %914, %916 : vector<2x169xf32>
    %cst_133 = arith.constant 3.753730e-01 : f32
    %918 = vector.broadcast %cst_133 : f32 to vector<2x169xf32>
    %919 = arith.addf %917, %918 : vector<2x169xf32>
    %920 = arith.addf %883, %919 : vector<2x169xf32>
    %921 = vector.broadcast %45 : f32 to vector<2x169xf32>
    %922 = arith.mulf %69, %921 : vector<2x169xf32>
    %923 = vector.broadcast %46 : f32 to vector<2x169xf32>
    %924 = arith.mulf %71, %923 : vector<2x169xf32>
    %925 = arith.addf %922, %924 : vector<2x169xf32>
    %926 = vector.broadcast %47 : f32 to vector<2x169xf32>
    %927 = arith.mulf %73, %926 : vector<2x169xf32>
    %928 = arith.addf %925, %927 : vector<2x169xf32>
    %929 = vector.broadcast %48 : f32 to vector<2x169xf32>
    %930 = arith.mulf %77, %929 : vector<2x169xf32>
    %931 = arith.addf %928, %930 : vector<2x169xf32>
    %932 = vector.broadcast %49 : f32 to vector<2x169xf32>
    %933 = arith.mulf %79, %932 : vector<2x169xf32>
    %934 = arith.addf %931, %933 : vector<2x169xf32>
    %935 = vector.broadcast %50 : f32 to vector<2x169xf32>
    %936 = arith.mulf %81, %935 : vector<2x169xf32>
    %937 = arith.addf %934, %936 : vector<2x169xf32>
    %938 = vector.broadcast %51 : f32 to vector<2x169xf32>
    %939 = arith.mulf %85, %938 : vector<2x169xf32>
    %940 = arith.addf %937, %939 : vector<2x169xf32>
    %941 = vector.broadcast %52 : f32 to vector<2x169xf32>
    %942 = arith.mulf %87, %941 : vector<2x169xf32>
    %943 = arith.addf %940, %942 : vector<2x169xf32>
    %944 = vector.broadcast %53 : f32 to vector<2x169xf32>
    %945 = arith.mulf %89, %944 : vector<2x169xf32>
    %946 = arith.addf %943, %945 : vector<2x169xf32>
    %947 = vector.broadcast %59 : f32 to vector<2x169xf32>
    %948 = arith.addf %946, %947 : vector<2x169xf32>
    %949 = arith.mulf %948, %948 : vector<2x169xf32>
    %cst_134 = arith.constant 1.170710e-01 : f32
    %950 = vector.broadcast %cst_134 : f32 to vector<2x169xf32>
    %951 = arith.mulf %950, %949 : vector<2x169xf32>
    %cst_135 = arith.constant 5.000000e-01 : f32
    %952 = vector.broadcast %cst_135 : f32 to vector<2x169xf32>
    %953 = arith.mulf %952, %948 : vector<2x169xf32>
    %954 = arith.addf %951, %953 : vector<2x169xf32>
    %cst_136 = arith.constant 3.753730e-01 : f32
    %955 = vector.broadcast %cst_136 : f32 to vector<2x169xf32>
    %956 = arith.addf %954, %955 : vector<2x169xf32>
    %957 = arith.addf %920, %956 : vector<2x169xf32>
    %958 = vector.broadcast %45 : f32 to vector<2x169xf32>
    %959 = arith.mulf %71, %958 : vector<2x169xf32>
    %960 = vector.broadcast %46 : f32 to vector<2x169xf32>
    %961 = arith.mulf %73, %960 : vector<2x169xf32>
    %962 = arith.addf %959, %961 : vector<2x169xf32>
    %963 = vector.broadcast %47 : f32 to vector<2x169xf32>
    %964 = arith.mulf %75, %963 : vector<2x169xf32>
    %965 = arith.addf %962, %964 : vector<2x169xf32>
    %966 = vector.broadcast %48 : f32 to vector<2x169xf32>
    %967 = arith.mulf %79, %966 : vector<2x169xf32>
    %968 = arith.addf %965, %967 : vector<2x169xf32>
    %969 = vector.broadcast %49 : f32 to vector<2x169xf32>
    %970 = arith.mulf %81, %969 : vector<2x169xf32>
    %971 = arith.addf %968, %970 : vector<2x169xf32>
    %972 = vector.broadcast %50 : f32 to vector<2x169xf32>
    %973 = arith.mulf %83, %972 : vector<2x169xf32>
    %974 = arith.addf %971, %973 : vector<2x169xf32>
    %975 = vector.broadcast %51 : f32 to vector<2x169xf32>
    %976 = arith.mulf %87, %975 : vector<2x169xf32>
    %977 = arith.addf %974, %976 : vector<2x169xf32>
    %978 = vector.broadcast %52 : f32 to vector<2x169xf32>
    %979 = arith.mulf %89, %978 : vector<2x169xf32>
    %980 = arith.addf %977, %979 : vector<2x169xf32>
    %981 = vector.broadcast %53 : f32 to vector<2x169xf32>
    %982 = arith.mulf %91, %981 : vector<2x169xf32>
    %983 = arith.addf %980, %982 : vector<2x169xf32>
    %984 = vector.broadcast %59 : f32 to vector<2x169xf32>
    %985 = arith.addf %983, %984 : vector<2x169xf32>
    %986 = arith.mulf %985, %985 : vector<2x169xf32>
    %cst_137 = arith.constant 1.170710e-01 : f32
    %987 = vector.broadcast %cst_137 : f32 to vector<2x169xf32>
    %988 = arith.mulf %987, %986 : vector<2x169xf32>
    %cst_138 = arith.constant 5.000000e-01 : f32
    %989 = vector.broadcast %cst_138 : f32 to vector<2x169xf32>
    %990 = arith.mulf %989, %985 : vector<2x169xf32>
    %991 = arith.addf %988, %990 : vector<2x169xf32>
    %cst_139 = arith.constant 3.753730e-01 : f32
    %992 = vector.broadcast %cst_139 : f32 to vector<2x169xf32>
    %993 = arith.addf %991, %992 : vector<2x169xf32>
    %994 = arith.addf %957, %993 : vector<2x169xf32>
    %c5_140 = arith.constant 5 : index
    %c0_141 = arith.constant 0 : index
    %c0_142 = arith.constant 0 : index
    %995 = vector.load %arg2[%c5_140, %c0_141, %c0_142] : memref<6x169x120xf32, #tpu.memory_space<vmem>>, vector<1x169x120xf32>
    %996 = vector.shape_cast %995 : vector<1x169x120xf32> to vector<169x120xf32>
    %cst_143 = arith.constant dense<0.000000e+00> : vector<2x120xf32>
    %997 = tpu.matmul %994, %996, %cst_143 {dimension_numbers = #tpu.dot_dimension_numbers<[1], [0], [0], [1], [0, 0, 1, 1], [], []>} : vector<2x169xf32>, vector<169x120xf32>, vector<2x120xf32> -> vector<2x120xf32>
    %998 = arith.addf %847, %997 : vector<2x120xf32>
    %c0_144 = arith.constant 0 : index
    %c0_145 = arith.constant 0 : index
    %999 = vector.load %arg4[%c0_144, %c0_145] : memref<2x128xf32, #tpu.memory_space<vmem>>, vector<1x120xf32>
    %1000 = vector.broadcast %999 : vector<1x120xf32> to vector<2x120xf32>
    %1001 = arith.addf %998, %1000 : vector<2x120xf32>
    %1002 = arith.mulf %1001, %1001 : vector<2x120xf32>
    %cst_146 = arith.constant 1.170710e-01 : f32
    %1003 = vector.broadcast %cst_146 : f32 to vector<2x120xf32>
    %1004 = arith.mulf %1003, %1002 : vector<2x120xf32>
    %cst_147 = arith.constant 5.000000e-01 : f32
    %1005 = vector.broadcast %cst_147 : f32 to vector<2x120xf32>
    %1006 = arith.mulf %1005, %1001 : vector<2x120xf32>
    %1007 = arith.addf %1004, %1006 : vector<2x120xf32>
    %cst_148 = arith.constant 3.753730e-01 : f32
    %1008 = vector.broadcast %cst_148 : f32 to vector<2x120xf32>
    %1009 = arith.addf %1007, %1008 : vector<2x120xf32>
    %c0_149 = arith.constant 0 : index
    %c0_150 = arith.constant 0 : index
    %1010 = vector.load %arg3[%c0_149, %c0_150] : memref<120x10xf32, #tpu.memory_space<vmem>>, vector<120x10xf32>
    %cst_151 = arith.constant dense<0.000000e+00> : vector<2x10xf32>
    %1011 = tpu.matmul %1009, %1010, %cst_151 {dimension_numbers = #tpu.dot_dimension_numbers<[1], [0], [0], [1], [0, 0, 1, 1], [], []>} : vector<2x120xf32>, vector<120x10xf32>, vector<2x10xf32> -> vector<2x10xf32>
    %c1_152 = arith.constant 1 : index
    %c0_153 = arith.constant 0 : index
    %1012 = vector.load %arg4[%c1_152, %c0_153] : memref<2x128xf32, #tpu.memory_space<vmem>>, vector<1x10xf32>
    %1013 = vector.broadcast %1012 : vector<1x10xf32> to vector<2x10xf32>
    %1014 = arith.addf %1011, %1013 : vector<2x10xf32>
    %c0_154 = arith.constant 0 : index
    %c0_155 = arith.constant 0 : index
    %1015 = vector.load %arg5[%c0_154, %c0_155] : memref<2x10xf32, #tpu.memory_space<vmem>>, vector<2x10xf32>
    tpu.vector_store %arg5[%c0_154, %c0_155], %1014 {strides = array<i32>} : memref<2x10xf32, #tpu.memory_space<vmem>>, vector<2x10xf32>,
    return
  }
}

</mosaic_0001>

<bundles_post_ra>
// kernel: m3_forward.1
= control target key start
LH: loop header
LB: loop body
LE: loop exit
PB: predicated region body
PF: predicated region fallthrough
CT: control target
= control target key end

     0   :  { %10 = vsyncpa [#allocation4], 0  ;;  %s4037_s0 = inlined_call_operand.vmem [shape: f32[60], index: 0, kind: input, shape index: {}]   ;;  %s4038_s1 = inlined_call_operand.vmem [shape: f32[16,2,169], index: 1, kind: input, shape index: {}]   ;;  %s4039_s2 = inlined_call_operand.vmem [shape: f32[6,169,120], index: 2, kind: input, shape index: {}]   ;;  %s4040_s3 = inlined_call_operand.vmem [shape: f32[120,10], index: 3, kind: input, shape index: {}]   ;;  %s4041_s4 = inlined_call_operand.vmem [shape: f32[2,128], index: 4, kind: input, shape index: {}]   ;;  %s4042_s5 = inlined_call_operand.hbm [shape: f32[2,10], index: 5, kind: output, shape index: {}]  }
   0x1   :  { %11 = vsyncpa [#allocation3], 0  ;;  %s18_s20 = sshll.u32 %s4037_s0, 4  ;;  %s19_s20 = int_to_ptr.vmem [resolvable:$true] %s18_s20 }
   0x2   :  { %s2026_s21 = scalar_lea.vmem %s19_s20, 16  ;;  %p2031_p1 = scmp.lt.s32.totalorder %s19_s20, %s19_s20 }
   0x3   :  { %p2027_p0 = scmp.ne.s32.totalorder %s19_s20, %s2026_s21  ;;  %p2032_p2 = scmp.lt.s32.totalorder %s2026_s21, %s2026_s21 }
   0x5   :  { %p2033_p3 = por %p2032_p2, %p2031_p1 }
   0x7   :  { %p2034_p4 = pnand %p2033_p3, %p2027_p0 }
   0x9   :  { %2037 = shalt.err (!%p2034_p4)
}
   0xa   :  { %s2064_s22 = smov [#allocation2]  }
   0xb   :  { %21 = dma.vmem_to_smem %s19_s20, 16, %s2064_s22, [#allocation4]  }
   0xc   :  { %2060 = dma.done.wait [#allocation4], 16  }
   0xd   :  { %2061 = vsyncadd [#allocation4], 4294967280 }
   0xe   :  { %33 = sfence }
   0xf   :  { %v1604_v0 = vld [vmem:[%s4039_s2 + $0xb0] sm:$0xff]  ;;  %v1605_v1 = vld [vmem:[%s4039_s2 + $0xb8] sm:$0xff]  ;;  %v230_v2 = vld [vmem:[%s4039_s2] sm:$0xff]  ;;  %v4043_v3 = vmov 0.0|0.0   ;;  %s2124_s9 = sld [smem:[#allocation2 + $0x9]]  ;;  %s2132_s14 = sld [smem:[#allocation2 + $0xa]] }
  0x10   :  { %1778 = vmatprep.subr.bf16.mxu0 %v4043_v3  ;;  %v1779_v4 = vpack.c.bf16 %v1605_v1, %v1604_v0  ;;  %1812 = vmatprep.subr.bf16.mxu1 %v4043_v3  ;;  %v231_v5 = vld [vmem:[%s4039_s2 + $0x8] sm:$0xff]  ;;  %v1606_v6 = vld [vmem:[%s4039_s2 + $0xc0] sm:$0xff]  ;;  %v232_v9 = vld [vmem:[%s4039_s2 + $0x10] sm:$0xff]  ;;  %s2137_s17 = sld [smem:[#allocation2 + $0xb]]  ;;  %s2149_s24 = sld [smem:[#allocation2 + $0xc]]  ;;  %vm393_vm0 = vcmask 1040384  }
  0x11   :  { %v1607_v7 = vld [vmem:[%s4039_s2 + $0xc8] sm:$0xff]  ;;  %v1813_v8 = vpack.c.bf16 %v231_v5, %v230_v2  ;;  %v233_v10 = vld [vmem:[%s4039_s2 + $0x18] sm:$0xff]  ;;  %v1608_v12 = vld [vmem:[%s4039_s2 + $0xd0] sm:$0xff]  ;;  %s2182_s12 = sld [smem:[#allocation2 + $0xd]]  ;;  %s2199_s21 = sld [smem:[#allocation2 + $0xe]]  ;;  %vm2066_vm1 = vmmov 1  }
  0x12   :  { %1780 = vmatpush1.bf16.msra.mxu0 %v1779_v4  ;;  %v1782_v11 = vpack.c.bf16 %v1607_v7, %v1606_v6  ;;  %v1816_v13 = vpack.c.bf16 %v233_v10, %v232_v9  ;;  %v1609_v14 = vld [vmem:[%s4039_s2 + $0xd8] sm:$0xff]  ;;  %v234_v15 = vld [vmem:[%s4039_s2 + $0x20] sm:$0xff]  ;;  %v235_v16 = vld [vmem:[%s4039_s2 + $0x28] sm:$0xff]  ;;  %s2216_s28 = sld [smem:[#allocation2 + $0xf]]  ;;  %s2234_s11 = sld [smem:[#allocation2 + $0x10]]  ;;  %vm390_vm3 = vcmask 334848  }
  0x13   :  { %1814 = vmatpush1.bf16.msra.mxu1 %v1813_v8  ;;  %1781 = vmatprep.subr.bf16.mxu0 %v4043_v3  ;;  %v2155_v17 = vld [vmem:[%s4039_s2 + $0xe0] sm:$0xff]  ;;  %v2160_v18 = vld [vmem:[%s4039_s2 + $0xe8] sm:$0xff]  ;;  %v2165_v19 = vld [vmem:[%s4039_s2 + $0x30] sm:$0xff]  ;;  %v1785_v26 = vpack.c.bf16 %v1609_v14, %v1608_v12  ;;  %v1819_v30 = vpack.c.bf16 %v235_v16, %v234_v15  ;;  %s2252_s22 = sld [smem:[#allocation2 + $0x11]]  ;;  %s2327_s19 = sld [smem:[#allocation2 + $0x37]]  ;;  %vm2069_vm4 = vmmov 0  }
  0x14   :  { %1815 = vmatprep.subr.bf16.mxu1 %v4043_v3  ;;  %v2170_v20 = vld [vmem:[%s4039_s2 + $0x38] sm:$0xff]  ;;  %v2175_v21 = vld [vmem:[%s4039_s2 + $0xf0] sm:$0xff]  ;;  %v2187_v23 = vld [vmem:[%s4039_s2 + $0x40] sm:$0xff]  ;;  %v1788_v39 = vpack.c.bf16 %v2160_v18, %v2155_v17  ;;  %s2497_s7 = sld [smem:[#allocation2 + $0x2]]  ;;  %s2544_s13 = sld [smem:[#allocation2 + $0x3]]  ;;  %vm1439_vm5 = vcmask 982016  }
  0x15   :  { %v2180_v22 = vld [vmem:[%s4039_s2 + $0xf8] sm:$0xff]  ;;  %v2192_v24 = vld [vmem:[%s4039_s2 + $0x48] sm:$0xff]  ;;  %v2197_v25 = vld [vmem:[%s4039_s2 + $0x100] sm:$0xff]  ;;  %v2255_v37 = vstv %s2124_s9  ;;  %v1822_v40 = vpack.c.bf16 %v2170_v20, %v2165_v19  ;;  %s2579_s16 = sld [smem:[#allocation2 + $0x5]]  ;;  %s2581_s18 = sld [smem:[#allocation2 + $0x6]]  ;;  %vm1513_vm6 = vcmask 74752  }
  0x16   :  { %1783 = vmatpush1.bf16.msra.mxu0 %v1782_v11  ;;  %v2204_v27 = vld [vmem:[%s4039_s2 + $0x108] sm:$0xff]  ;;  %v2209_v28 = vld [vmem:[%s4039_s2 + $0x50] sm:$0xff]  ;;  %v2214_v29 = vld [vmem:[%s4039_s2 + $0x58] sm:$0xff]  ;;  %v1791_v41 = vpack.c.bf16 %v2180_v22, %v2175_v21  ;;  %v2279_v45 = vstv %s2132_s14  ;;  %v1825_v46 = vpack.c.bf16 %v2192_v24, %v2187_v23  ;;  %s2607_s20 = sld [smem:[#allocation2 + $0x8]]  ;;  %s2649_s23 = sld [smem:[#allocation2 + $0x36]] }
  0x17   :  { %1817 = vmatpush1.bf16.msra.mxu1 %v1816_v13  ;;  %1784 = vmatprep.subr.bf16.mxu0 %v4043_v3  ;;  %v2222_v31 = vld [vmem:[%s4039_s2 + $0x110] sm:$0xff]  ;;  %v2227_v32 = vld [vmem:[%s4039_s2 + $0x118] sm:$0xff]  ;;  %v2232_v33 = vld [vmem:[%s4039_s2 + $0x60] sm:$0xff]  ;;  %v2303_v52 = vstv %s2137_s17  ;;  %s2556_s17 = sld [smem:[#allocation2 + $0x4]]  ;;  %s2779_s10 = sld [smem:[#allocation2 + $0x12]] }
  0x18   :  { %1818 = vmatprep.subr.bf16.mxu1 %v4043_v3  ;;  %v2240_v34 = vld [vmem:[%s4039_s2 + $0x68] sm:$0xff]  ;;  %v2245_v35 = vld [vmem:[%s4039_s2 + $0x120] sm:$0xff]  ;;  %v2266_v42 = vld [vmem:[%s4039_s2 + $0x70] sm:$0xff]  ;;  %v2330_v59 = vstv %s2149_s24  ;;  %s2852_s14 = sld [smem:[#allocation2 + $0x14]]  ;;  %s2895_s0 = sld [smem:[#allocation2 + $0x16]] }
  0x19   :  { %v2250_v36 = vld [vmem:[%s4039_s2 + $0x128] sm:$0xff]  ;;  %v2271_v43 = vld [vmem:[%s4039_s2 + $0x78] sm:$0xff]  ;;  %v2276_v44 = vld [vmem:[%s4039_s2 + $0x130] sm:$0xff]  ;;  %v2353_v1 = vstv %s2182_s12  ;;  %s2375_s12 = sld [smem:[#allocation2]]  ;;  %s2950_s15 = sld [smem:[#allocation2 + $0x1a]] }
  0x1a   :  { %1786 = vmatpush1.bf16.msra.mxu0 %v1785_v26  ;;  %v2290_v49 = vld [vmem:[%s4039_s2 + $0x138] sm:$0xff]  ;;  %v2295_v50 = vld [vmem:[%s4039_s2 + $0x80] sm:$0xff]  ;;  %v2300_v51 = vld [vmem:[%s4039_s2 + $0x88] sm:$0xff]  ;;  %v2370_v7 = vstv %s2199_s21  ;;  %s2918_s21 = sld [smem:[#allocation2 + $0x17]]  ;;  %s2964_s25 = sld [smem:[#allocation2 + $0x38]] }
  0x1b   :  { %1820 = vmatpush1.bf16.msra.mxu1 %v1819_v30  ;;  %1787 = vmatprep.subr.bf16.mxu0 %v4043_v3  ;;  %v2315_v56 = vld [vmem:[%s4039_s2 + $0x140] sm:$0xff]  ;;  %v2320_v57 = vld [vmem:[%s4039_s2 + $0x148] sm:$0xff]  ;;  %v2325_v58 = vld [vmem:[%s4039_s2 + $0x90] sm:$0xff]  ;;  %v2373_v8 = vstv %s2216_s28  ;;  %s3094_s27 = sld [smem:[#allocation2 + $0x1f]]  ;;  %s3099_s29 = sld [smem:[#allocation2 + $0x20]] }
  0x1c   :  { %4076 = vst [vmem:[#allocation8_spill] sm:$0xff] %v2325_v58  ;;  %1821 = vmatprep.subr.bf16.mxu1 %v4043_v3  ;;  %v2340_v62 = vld [vmem:[%s4039_s2 + $0x98] sm:$0xff]  ;;  %v2345_v63 = vld [vmem:[%s4039_s2 + $0x150] sm:$0xff]  ;;  %v2362_v5 = vld [vmem:[%s4039_s2 + $0xa0] sm:$0xff]  ;;  %v2399_v15 = vstv %s2234_s11  ;;  %v4085_v58 = vpack.c.bf16 %v2214_v29, %v2209_v28  ;;  %s2605_s11 = sld [smem:[#allocation2 + $0x7]]  ;;  %s3109_s30 = sld [smem:[#allocation2 + $0x21]] }
  0x1d   :  { %4077 = vst [vmem:[#allocation9_spill] sm:$0xff] %v2340_v62  ;;  %4078 = vst [vmem:[#allocation10_spill] sm:$0xff] %v2345_v63  ;;  %v2350_v0 = vld [vmem:[%s4039_s2 + $0x158] sm:$0x1]  ;;  %v2367_v6 = vld [vmem:[%s4039_s2 + $0xa8] sm:$0x1]  ;;  %v2424_v30 = vstv %s2252_s22 }
  0x1e   :  { %4079 = vst [vmem:[#allocation11_spill] sm:$0xff] %v2350_v0  ;;  %4080 = vst [vmem:[#allocation12_spill] sm:$0xff] %v2362_v5  ;;  %1789 = vmatpush1.bf16.msra.mxu0 %v1788_v39  ;;  %v2386_v12 = vld [vmem:[%s4038_s1] sm:$0xf]  ;;  %v2391_v13 = vld [vmem:[%s4038_s1 + $0x4] sm:$0xf] }
  0x1f   :  { %4081 = vst [vmem:[#allocation13_spill] sm:$0xff] %v2367_v6  ;;  %v2396_v14 = vld [vmem:[%s4038_s1 + $0x8] sm:$0xf]  ;;  %1823 = vmatpush1.bf16.msra.mxu1 %v1822_v40  ;;  %1790 = vmatprep.subr.bf16.mxu0 %v4043_v3  ;;  %v2405_v16 = vld [vmem:[%s4038_s1 + $0xc] sm:$0xf]  ;;  %v253_v19 = vmul.f32 %v2255_v37, %v2386_v12  ;;  %v255_v20 = vmul.f32 %v2391_v13, %v2279_v45  ;;  %s2445_s22 = sld [smem:[#allocation2 + $0x1]]  ;;  %vm2669_vm2 = vmpackc.low %vm393_vm0, %vm2066_vm1 }
  0x20   :  { %4082 = vst [vmem:[#allocation14_spill] sm:$0xff] %v2405_v16  ;;  %v2410_v17 = vld [vmem:[%s4038_s1 + $0x10] sm:$0xf]  ;;  %v2415_v18 = vld [vmem:[%s4038_s1 + $0x14] sm:$0xf]  ;;  %v258_v26 = vmul.f32 %v2396_v14, %v2303_v52  ;;  %1824 = vmatprep.subr.bf16.mxu1 %v4043_v3  ;;  %v285_v10 = vmul.f32 %v2391_v13, %v2255_v37  ;;  %v286_v9 = vmul.f32 %v2396_v14, %v2279_v45  ;;  %v4086_v62 = vmov 0.0|0.0  }
  0x21   :  { %v2430_v39 = vld [vmem:[%s4038_s1 + $0x18] sm:$0xf]  ;;  %v2435_v40 = vld [vmem:[%s4038_s1 + $0x20] sm:$0xf]  ;;  %v261_v38 = vmul.f32 %v2410_v17, %v2330_v59  ;;  %v264_v11 = vmul.f32 %v2415_v18, %v2353_v1  ;;  %v2450_v4 = vld [vmem:[%s4038_s1 + $0x24] sm:$0xf]  ;;  %v256_v61 = vadd.f32 %v255_v20, %v253_v19  ;;  %v288_v54 = vmul.f32 %v2405_v16, %v2303_v52 }
  0x22   :  { %v2455_v2 = vld [vmem:[%s4038_s1 + $0x28] sm:$0xf]  ;;  %v267_v60 = vmul.f32 %v2430_v39, %v2370_v7  ;;  %v270_v55 = vmul.f32 %v2435_v40, %v2373_v8  ;;  %1792 = vmatpush1.bf16.msra.mxu0 %v1791_v41  ;;  %v2469_v53 = vld [vmem:[%s4038_s1 + $0x1c] sm:$0xf]  ;;  %v2473_v19 = vmul.f32 %v2450_v4, %v2399_v15  ;;  %v287_v48 = vadd.f32 %v286_v9, %v285_v10  ;;  %v2488_v21 = vld [vmem:[%s4038_s1 + $0x2c] sm:$0xf] }
  0x23   :  { %v2477_v20 = vmul.f32 %v2455_v2, %v2424_v30  ;;  %v290_v47 = vmul.f32 %v2415_v18, %v2330_v59  ;;  %1826 = vmatpush1.bf16.msra.mxu1 %v1825_v46  ;;  %1793 = vmatprep.subr.bf16.mxu0 %v4043_v3  ;;  %v259_v22 = vadd.f32 %v258_v26, %v256_v61  ;;  %v2491_v41 = vstv %s2327_s19  ;;  %v2503_v23 = vld [vmem:[%s4038_s1 + $0x30] sm:$0xf]  ;;  %s3120_s6 = sld [smem:[#allocation2 + $0x22]]  ;;  %s3546_s19 = sld [smem:[#allocation2 + $0x2b]] }
  0x24   :  { %v292_v9 = vmul.f32 %v2430_v39, %v2353_v1  ;;  %v294_v10 = vmul.f32 %v2469_v53, %v2370_v7  ;;  %1827 = vmatprep.subr.bf16.mxu1 %v4043_v3  ;;  %4083 = vst [vmem:[#allocation15_spill] sm:$0xff] %v2503_v23  ;;  %v289_v24 = vadd.f32 %v288_v54, %v287_v48  ;;  %v2516_v3 = vld [vmem:[%s4038_s1 + $0x34] sm:$0xf]  ;;  %s3544_s28 = sld [smem:[#allocation2 + $0x2a]]  ;;  %s3747_s8 = sld [smem:[#allocation2 + $0x31]] }
  0x25   :  { %v296_v46 = vmul.f32 %v2450_v4, %v2373_v8  ;;  %v298_v61 = vmul.f32 %v2455_v2, %v2399_v15  ;;  %v2511_v26 = vmul.f32 %v2488_v21, %v2424_v30  ;;  %v262_v16 = vadd.f32 %v261_v38, %v259_v22  ;;  %s3595_s26 = sld [smem:[#allocation2 + $0x3a]] }
  0x26   :  { %v309_v48 = vmul.f32 %v2410_v17, %v2255_v37  ;;  %v310_v54 = vmul.f32 %v2415_v18, %v2279_v45  ;;  %v312_v5 = vmul.f32 %v2430_v39, %v2303_v52  ;;  %v4084_v6 = vpack.c.bf16 %v2204_v27, %v2197_v25  ;;  %v2540_v25 = vld [vmem:[%s4038_s1 + $0x38] sm:$0xf] }
  0x27   :  { %v291_v63 = vadd.f32 %v290_v47, %v289_v24  ;;  %v314_v0 = vmul.f32 %v2435_v40, %v2330_v59  ;;  %v316_v38 = vmul.f32 %v2450_v4, %v2353_v1  ;;  %v318_v22 = vmul.f32 %v2455_v2, %v2370_v7  ;;  %1829 = vmatpush1.bf16.msra.mxu1 %v4085_v58 }
  0x28   :  { %1795 = vmatpush1.bf16.msra.mxu0 %v4084_v6  ;;  %v265_v27 = vadd.f32 %v264_v11, %v262_v16  ;;  %v311_v47 = vadd.f32 %v310_v54, %v309_v48  ;;  %v320_v6 = vmul.f32 %v2503_v23, %v2373_v8  ;;  %v2547_v24 = vstv %s2375_s12  ;;  %1830 = vmatprep.subr.bf16.mxu1 %v4086_v62  ;;  %s2948_s12 = sld [smem:[#allocation2 + $0x19]] }
  0x29   :  { %1796 = vmatprep.subr.bf16.mxu0 %v4086_v62  ;;  %v293_v28 = vadd.f32 %v292_v9, %v291_v63  ;;  %v2552_v29 = vmul.f32 %v2516_v3, %v2399_v15  ;;  %v333_v58 = vmul.f32 %v2415_v18, %v2255_v37  ;;  %v2559_v11 = vstv %s2445_s22  ;;  %v2571_v37 = vld [vmem:[%s4038_s1 + $0x3c] sm:$0xf]  ;;  %s2808_s22 = sld [smem:[#allocation2 + $0x13]] }
  0x2a   :  { %v268_v16 = vadd.f32 %v267_v60, %v265_v27  ;;  %v313_v48 = vadd.f32 %v312_v5, %v311_v47  ;;  %v334_v54 = vmul.f32 %v2430_v39, %v2279_v45  ;;  %v336_v63 = vmul.f32 %v2469_v53, %v2303_v52 }
  0x2b   :  { %v4087_v9 = vpack.c.bf16 %v2227_v32, %v2222_v31  ;;  %v295_v23 = vadd.f32 %v294_v10, %v293_v28  ;;  %v324_v60 = vmul.f32 %v2540_v25, %v2424_v30  ;;  %v338_v5 = vmul.f32 %v2450_v4, %v2330_v59 }
  0x2c   :  { %v340_v45 = vmul.f32 %v2455_v2, %v2353_v1  ;;  %v4088_v31 = vpack.c.bf16 %v2240_v34, %v2232_v33  ;;  %v271_v32 = vadd.f32 %v270_v55, %v268_v16  ;;  %v315_v52 = vadd.f32 %v314_v0, %v313_v48 }
  0x2d   :  { %1798 = vmatpush1.bf16.msra.mxu0 %v4087_v9  ;;  %v335_v10 = vadd.f32 %v334_v54, %v333_v58  ;;  %v2588_v27 = vstv %s2497_s7  ;;  %v297_v59 = vadd.f32 %v296_v46, %v295_v23  ;;  %v342_v1 = vmul.f32 %v2488_v21, %v2370_v7  ;;  %s3132_s7 = sld [smem:[#allocation2 + $0x23]] }
  0x2e   :  { %1832 = vmatpush1.bf16.msra.mxu1 %v4088_v31  ;;  %1799 = vmatprep.subr.bf16.mxu0 %v4086_v62  ;;  %v344_v47 = vmul.f32 %v2516_v3, %v2373_v8  ;;  %v346_v33 = vmul.f32 %v2540_v25, %v2399_v15  ;;  %v274_v34 = vadd.f32 %v2473_v19, %v271_v32  ;;  %v2638_v9 = vstv %s2579_s16  ;;  %s3339_s16 = sld [smem:[#allocation2 + $0x25]] }
  0x2f   :  { %1833 = vmatprep.subr.bf16.mxu1 %v4086_v62  ;;  %v317_v55 = vadd.f32 %v316_v38, %v315_v52  ;;  %v337_v0 = vadd.f32 %v336_v63, %v335_v10  ;;  %v2600_v28 = vmul.f32 %v2571_v37, %v2424_v30  ;;  %v4089_v23 = vpack.c.bf16 %v2250_v36, %v2245_v35 }
  0x30   :  { %v299_v7 = vadd.f32 %v298_v61, %v297_v59  ;;  %v126_v8 = vmul.f32 %v2547_v24, %v2386_v12  ;;  %v128_v15 = vmul.f32 %v2391_v13, %v2559_v11  ;;  %v131_v30 = vmul.f32 %v2396_v14, %v2588_v27 }
  0x31   :  { %1801 = vmatpush1.bf16.msra.mxu0 %v4089_v23  ;;  %v4090_v19 = vpack.c.bf16 %v2271_v43, %v2266_v42  ;;  %v277_v35 = vadd.f32 %v2477_v20, %v274_v34  ;;  %v319_v36 = vadd.f32 %v318_v22, %v317_v55  ;;  %v339_v46 = vadd.f32 %v338_v5, %v337_v0 }
  0x32   :  { %1802 = vmatprep.subr.bf16.mxu0 %v4086_v62  ;;  %v2621_v61 = vstv %s2544_s13  ;;  %v301_v38 = vadd.f32 %v2511_v26, %v299_v7  ;;  %v129_v58 = vadd.f32 %v128_v15, %v126_v8  ;;  %v2628_v42 = vstv %s2556_s17  ;;  %v4094_v8 = vld [vmem:[#allocation9_spill] sm:$0xff]  ;;  %v4095_v15 = vld [vmem:[#allocation8_spill] sm:$0xff]  ;;  %s2934_s17 = sld [smem:[#allocation2 + $0x18]]  ;;  %s3397_s13 = sld [smem:[#allocation2 + $0x26]] }
  0x33   :  { %1835 = vmatpush1.bf16.msra.mxu1 %v4090_v19  ;;  %v134_v16 = vmul.f32 %v2410_v17, %v2621_v61  ;;  %v279_v43 = vadd.f32 %v2491_v41, %v277_v35  ;;  %v321_v48 = vadd.f32 %v320_v6, %v319_v36  ;;  %v341_v20 = vadd.f32 %v340_v45, %v339_v46 }
  0x34   :  { %1836 = vmatprep.subr.bf16.mxu1 %v4086_v62  ;;  %v137_v22 = vmul.f32 %v2415_v18, %v2628_v42  ;;  %v4091_v54 = vpack.c.bf16 %v2290_v49, %v2276_v44  ;;  %v302_v63 = vadd.f32 %v301_v38, %v2491_v41  ;;  %v132_v26 = vadd.f32 %v131_v30, %v129_v58 }
  0x35   :  { %v2641_v5 = vstv %s2581_s18  ;;  %v4092_v31 = vpack.c.bf16 %v2300_v51, %v2295_v50  ;;  %v280_v6 = vmul.f32 %v279_v43, %v279_v43  ;;  %v282_v45 = vmul.f32 0.5, %v279_v43  ;;  %s2875_s18 = sld [smem:[#allocation2 + $0x15]] }
  0x36   :  { %1804 = vmatpush1.bf16.msra.mxu0 %v4091_v54  ;;  %v323_v32 = vadd.f32 %v2552_v29, %v321_v48  ;;  %v343_v44 = vadd.f32 %v342_v1, %v341_v20  ;;  %v303_v49 = vmul.f32 %v302_v63, %v302_v63  ;;  %v305_v52 = vmul.f32 0.5, %v302_v63 }
  0x37   :  { %1838 = vmatpush1.bf16.msra.mxu1 %v4092_v31  ;;  %1805 = vmatprep.subr.bf16.mxu0 %v4086_v62  ;;  %v135_v10 = vadd.f32 %v134_v16, %v132_v26  ;;  %v140_v50 = vmul.f32 %v2430_v39, %v2638_v9  ;;  %v281_v51 = vmul.f32 0.117071, %v280_v6  ;;  %v143_v55 = vmul.f32 %v2435_v40, %v2641_v5 }
  0x38   :  { %1839 = vmatprep.subr.bf16.mxu1 %v4086_v62  ;;  %v325_v59 = vadd.f32 %v324_v60, %v323_v32  ;;  %v345_v34 = vadd.f32 %v344_v47, %v343_v44  ;;  %v4093_v29 = vpack.c.bf16 %v2320_v57, %v2315_v56  ;;  %v304_v1 = vmul.f32 0.117071, %v303_v49  ;;  %v4104_v32 = vld [vmem:[#allocation12_spill] sm:$0xff] }
  0x39   :  { %v138_v0 = vadd.f32 %v137_v22, %v135_v10  ;;  %v2659_v23 = vstv %s2605_s11  ;;  %v2662_v7 = vstv %s2607_s20  ;;  %v4096_v30 = vpack.c.bf16 %v4094_v8, %v4095_v15  ;;  %v4100_v22 = vld [vmem:[#allocation11_spill] sm:$0xff]  ;;  %s3785_s11 = sld [smem:[#allocation2 + $0x35]]  ;;  %s3843_s20 = sld [smem:[#allocation2 + $0x3b]] }
  0x3a   :  { %1807 = vmatpush1.bf16.msra.mxu0 %v4093_v29  ;;  %v4097_v60 = vmov 0  ;;  %v283_v56 = vadd.f32 %v282_v45, %v281_v51  ;;  %v326_v57 = vadd.f32 %v325_v59, %v2491_v41  ;;  %v347_v47 = vadd.f32 %v346_v33, %v345_v34  ;;  %v4101_v33 = vld [vmem:[#allocation10_spill] sm:$0xff]  ;;  %v4103_v45 = vld [vmem:[#allocation13_spill] sm:$0xff] }
  0x3b   :  { %1841 = vmatpush1.bf16.msra.mxu1 %v4096_v30  ;;  %1808 = vmatprep.subr.bf16.mxu0 %v4086_v62  ;;  %v4098_v60 = vsel %vm2669_vm2, 4294967295, %v4097_v60  ;;  %v2067_v19 = vmov 1983009808   ;;  %v306_v36 = vadd.f32 %v305_v52, %v304_v1  ;;  %v141_v46 = vadd.f32 %v140_v50, %v138_v0  ;;  %v4107_v50 = vld [vmem:[#allocation14_spill] sm:$0xff] }
  0x3c   :  { %4099 = vst [vmem:[#allocation9_spill] sm:$0xff] %v4098_v60  ;;  %v382_v35 = vunpack.c.l.s4 %v2067_v19  ;;  %1842 = vmatprep.subr.bf16.mxu1 %v4086_v62  ;;  %v146_v38 = vmul.f32 %v2450_v4, %v2659_v23  ;;  %v149_v58 = vmul.f32 %v2455_v2, %v2662_v7  ;;  %v284_v16 = vadd.f32 0.375373, %v283_v56 }
  0x3d   :  { %v327_v43 = vmul.f32 %v326_v57, %v326_v57  ;;  %v329_v48 = vmul.f32 0.5, %v326_v57  ;;  %v349_v20 = vadd.f32 %v2600_v28, %v347_v47  ;;  %v4102_v54 = vpack.c.bf16 %v4100_v22, %v4101_v33 }
  0x3e   :  { %v307_v63 = vadd.f32 0.375373, %v306_v36  ;;  %v144_v26 = vadd.f32 %v143_v55, %v141_v46  ;;  %v158_v31 = vmul.f32 %v2391_v13, %v2547_v24  ;;  %v159_v6 = vmul.f32 %v2396_v14, %v2559_v11 }
  0x3f   :  { %1811 = vmatpush1.bf16.msk.msra.mxu0 %vm2669_vm2, %v4102_v54  ;;  %v4105_v44 = vpack.c.bf16 %v4103_v45, %v4104_v32  ;;  %v328_v28 = vmul.f32 0.117071, %v327_v43  ;;  %v350_v49 = vadd.f32 %v349_v20, %v2491_v41  ;;  %v4106_v52 = vlaneseq }
  0x40   :  { %v161_v51 = vmul.f32 %v4107_v50, %v2588_v27  ;;  %1846 = vmatprep.subr.bf16.mxu0 %v4086_v62  ;;  %v147_v59 = vadd.f32 %v146_v38, %v144_v26  ;;  %v2700_v34 = vstv %s2649_s23  ;;  %v160_v55 = vadd.f32 %v159_v6, %v158_v31 }
  0x41   :  { %1845 = vmatpush1.bf16.msk.msra.mxu1 %vm2669_vm2, %v4105_v44  ;;  %v385_v10 = vshrl.u32 %v4106_v52, 7  ;;  %v163_v29 = vmul.f32 %v2415_v18, %v2621_v61  ;;  %v308_v1 = vadd.f32 %v307_v63, %v284_v16  ;;  %v330_v0 = vadd.f32 %v329_v48, %v328_v28 }
  0x42   :  { %1880 = vmatprep.subr.bf16.mxu1 %v4086_v62  ;;  %v351_v8 = vmul.f32 %v350_v49, %v350_v49  ;;  %v353_v41 = vmul.f32 0.5, %v350_v49  ;;  %v383_v15 = vunpack.c.0.s8 %v382_v35  ;;  %v150_v30 = vadd.f32 %v149_v58, %v147_v59 }
  0x43   :  { %v162_v56 = vadd.f32 %v161_v51, %v160_v55  ;;  %v165_v57 = vmul.f32 %v2430_v39, %v2628_v42  ;;  %v331_v47 = vadd.f32 0.375373, %v330_v0  ;;  %v167_v36 = vmul.f32 %v2469_v53, %v2638_v9 }
  0x44   :  { %v352_v19 = vmul.f32 0.117071, %v351_v8  ;;  %v182_v46 = vmul.f32 %v2410_v17, %v2547_v24  ;;  %v152_v38 = vadd.f32 %v2700_v34, %v150_v30  ;;  %v183_v43 = vmul.f32 %v2415_v18, %v2559_v11 }
  0x45   :  { %v164_v16 = vadd.f32 %v163_v29, %v162_v56  ;;  %v185_v35 = vmul.f32 %v2430_v39, %v2588_v27  ;;  %v332_v58 = vadd.f32 %v331_v47, %v308_v1  ;;  %v169_v20 = vmul.f32 %v2450_v4, %v2641_v5 }
  0x46   :  { %v354_v48 = vadd.f32 %v353_v41, %v352_v19  ;;  %v153_v22 = vmul.f32 %v152_v38, %v152_v38  ;;  %v184_v54 = vadd.f32 %v183_v43, %v182_v46  ;;  %v187_v63 = vmul.f32 %v2435_v40, %v2621_v61  ;;  %v2750_v19 = vld [vmem:[%s4039_s2 + $0x210] sm:$0xff]  ;;  %v2767_v43 = vld [vmem:[%s4039_s2 + $0x178] sm:$0xff] }
  0x47   :  { %v166_v33 = vadd.f32 %v165_v57, %v164_v16  ;;  %v2720_v31 = vsub.s32 %v383_v15, %v385_v10  ;;  %v155_v6 = vmul.f32 0.5, %v152_v38  ;;  %v171_v45 = vmul.f32 %v2455_v2, %v2659_v23  ;;  %v4108_v57 = vld [vmem:[#allocation15_spill] sm:$0xff] }
  0x48   :  { %v355_v26 = vadd.f32 0.375373, %v354_v48  ;;  %v154_v32 = vmul.f32 0.117071, %v153_v22  ;;  %v186_v28 = vadd.f32 %v185_v35, %v184_v54  ;;  %v189_v49 = vmul.f32 %v2450_v4, %v2628_v42  ;;  %v2772_v35 = vld [vmem:[%s4039_s2 + $0x220] sm:$0xff]  ;;  %v2791_v54 = vld [vmem:[%s4039_s2 + $0x188] sm:$0xff] }
  0x49   :  { %v168_v44 = vadd.f32 %v167_v36, %v166_v33  ;;  %v206_v51 = vmul.f32 %v2415_v18, %v2547_v24  ;;  %v207_v59 = vmul.f32 %v2430_v39, %v2559_v11  ;;  %v209_v10 = vmul.f32 %v2469_v53, %v2588_v27  ;;  %v1630_v11 = vld [vmem:[%s4039_s2 + $0x160] sm:$0xff]  ;;  %v1631_v27 = vld [vmem:[%s4039_s2 + $0x168] sm:$0xff]  ;;  %v2760_v36 = vld [vmem:[%s4039_s2 + $0x170] sm:$0xff] }
  0x4a   :  { %v356_v52 = vadd.f32 %v355_v26, %v332_v58  ;;  %v173_v29 = vmul.f32 %v2488_v21, %v2662_v7  ;;  %v188_v1 = vadd.f32 %v187_v63, %v186_v28  ;;  %v191_v0 = vmul.f32 %v2455_v2, %v2638_v9  ;;  %v2777_v58 = vld [vmem:[%s4039_s2 + $0x228] sm:$0xff]  ;;  %v2786_v33 = vld [vmem:[%s4039_s2 + $0x180] sm:$0xff]  ;;  %v2796_v63 = vld [vmem:[%s4039_s2 + $0x230] sm:$0xff] }
  0x4b   :  { %v170_v55 = vadd.f32 %v169_v20, %v168_v44  ;;  %v156_v41 = vadd.f32 %v155_v6, %v154_v32  ;;  %v208_v15 = vadd.f32 %v207_v59, %v206_v51  ;;  %v211_v24 = vmul.f32 %v2450_v4, %v2621_v61  ;;  %v2755_v61 = vld [vmem:[%s4039_s2 + $0x218] sm:$0xff]  ;;  %v2806_v6 = vld [vmem:[%s4039_s2 + $0x190] sm:$0xff]  ;;  %v2830_v51 = vld [vmem:[%s4039_s2 + $0x248] sm:$0xff] }
  0x4c   :  { %v387_v8 = vrot.slane %v356_v52, %v2720_v31  ;;  %v190_v56 = vadd.f32 %v189_v49, %v188_v1  ;;  %v193_v47 = vmul.f32 %v4108_v57, %v2641_v5  ;;  %v213_v16 = vmul.f32 %v2455_v2, %v2628_v42  ;;  %v2801_v26 = vld [vmem:[%s4039_s2 + $0x238] sm:$0xff]  ;;  %v2825_v52 = vld [vmem:[%s4039_s2 + $0x240] sm:$0xff]  ;;  %4110 = vst [vmem:[#allocation11_spill] sm:$0xff] %v2830_v51  ;;  %v2845_v1 = vld [vmem:[%s4039_s2 + $0x1a8] sm:$0xff] }
  0x4d   :  { %v172_v30 = vadd.f32 %v171_v45, %v170_v55  ;;  %v210_v38 = vadd.f32 %v209_v10, %v208_v15  ;;  %v195_v42 = vmul.f32 %v2516_v3, %v2659_v23  ;;  %v1847_v22 = vpack.c.bf16 %v1631_v27, %v1630_v11  ;;  %v2820_v49 = vld [vmem:[%s4039_s2 + $0x198] sm:$0xff]  ;;  %4109 = vst [vmem:[#allocation8_spill] sm:$0xff] %v2825_v52 }
  0x4e   :  { %v388_v46 = vcombine.high %v387_v8, %v387_v8  ;;  %v192_v20 = vadd.f32 %v191_v0, %v190_v56  ;;  %v2811_v45 = vadd.f32 0.375373, %v156_v41  ;;  %v197_v32 = vmul.f32 %v2540_v25, %v2662_v7  ;;  %v2850_v0 = vld [vmem:[%s4039_s2 + $0x250] sm:$0xff]  ;;  %v2863_v15 = vld [vmem:[%s4039_s2 + $0x258] sm:$0xff]  ;;  %v2977_v56 = vld [vmem:[%s4039_s2 + $0x200] sm:$0xff] }
  0x4f   :  { %v174_v48 = vadd.f32 %v173_v29, %v172_v30  ;;  %v212_v44 = vadd.f32 %v211_v24, %v210_v38  ;;  %v215_v28 = vmul.f32 %v2488_v21, %v2638_v9  ;;  %v217_v9 = vmul.f32 %v2516_v3, %v2641_v5  ;;  %v2840_v29 = vld [vmem:[%s4039_s2 + $0x1a0] sm:$0xff]  ;;  %4111 = vst [vmem:[#allocation10_spill] sm:$0xff] %v2850_v0  ;;  %v2868_v24 = vld [vmem:[%s4039_s2 + $0x1b0] sm:$0xff] }
  0x50   :  { %1627 = vmatprep.mubr.msk.f32.mxu0 %vm390_vm3, %v388_v46  ;;  %v194_v10 = vadd.f32 %v193_v47, %v192_v20  ;;  %v219_v55 = vmul.f32 %v2540_v25, %v2659_v23  ;;  %v221_v23 = vmul.f32 %v2571_v37, %v2662_v7  ;;  %v1850_v41 = vpack.c.bf16 %v2767_v43, %v2760_v36  ;;  %v2873_v7 = vld [vmem:[%s4039_s2 + $0x1b8] sm:$0xff]  ;;  %v2883_v47 = vld [vmem:[%s4039_s2 + $0x260] sm:$0xff]  ;;  %v2888_v36 = vld [vmem:[%s4039_s2 + $0x268] sm:$0xff] }
  0x51   :  { %462 = vmatmul.mubr.f32.vlgmr.msra.gmra.mrb[0].mxu0 %v387_v8  ;;  %v175_v59 = vadd.f32 %v174_v48, %v2700_v34  ;;  %v214_v5 = vadd.f32 %v213_v16, %v212_v44  ;;  %4112 = vst [vmem:[#allocation13_spill] sm:$0xff] %v2863_v15  ;;  %4113 = vst [vmem:[#allocation12_spill] sm:$0xff] %v2883_v47  ;;  %v2893_v46 = vld [vmem:[%s4039_s2 + $0x1c0] sm:$0xff]  ;;  %v1853_v16 = vpack.c.bf16 %v2791_v54, %v2786_v33  ;;  %v2906_v20 = vld [vmem:[%s4039_s2 + $0x1c8] sm:$0xff] }
  0x52   :  { %1848 = vmatpush1.bf16.msra.mxu0 %v1847_v22  ;;  %v196_v30 = vadd.f32 %v195_v42, %v194_v10  ;;  %4114 = vst [vmem:[#allocation14_spill] sm:$0xff] %v2888_v36  ;;  %v1856_v48 = vpack.c.bf16 %v2820_v49, %v2806_v6  ;;  %v2911_v42 = vld [vmem:[%s4039_s2 + $0x1d0] sm:$0xff]  ;;  %v2916_v22 = vld [vmem:[%s4039_s2 + $0x1d8] sm:$0xff]  ;;  %v2932_v49 = vld [vmem:[%s4039_s2 + $0x1e8] sm:$0xff]  ;;  %v2990_v8 = vstv %s2875_s18  ;;  %s3074_s18 = sld [smem:[#allocation2 + $0x1d]] }
  0x53   :  { %v176_v11 = vmul.f32 %v175_v59, %v175_v59  ;;  %v178_v27 = vmul.f32 0.5, %v175_v59  ;;  %1849 = vmatprep.subr.bf16.mxu0 %v4086_v62  ;;  %v216_v38 = vadd.f32 %v215_v28, %v214_v5  ;;  %v2927_v28 = vld [vmem:[%s4039_s2 + $0x1e0] sm:$0xff]  ;;  %4117 = vst [vmem:[#allocation17_spill] sm:$0xff] %v2977_v56  ;;  %v3001_v47 = vstv %s2895_s0  ;;  %s3081_s0 = sld [smem:[#allocation2 + $0x1e]] }
  0x54   :  { %v198_v54 = vadd.f32 %v197_v32, %v196_v30  ;;  %v3004_v36 = vstv %s2918_s21  ;;  %v3010_v15 = vstv %s2934_s17  ;;  %s3173_s21 = sld [smem:[#allocation2 + $0x39]]  ;;  %s3752_s17 = sld [smem:[#allocation2 + $0x32]] }
  0x55   :  { %v177_v33 = vmul.f32 0.117071, %v176_v11  ;;  %v218_v59 = vadd.f32 %v217_v9, %v216_v38  ;;  %v561_v9 = vmul.f32 %v2410_v17, %v2990_v8 }
  0x56   :  { %1851 = vmatpush1.bf16.msra.mxu0 %v1850_v41  ;;  %v199_v30 = vadd.f32 %v198_v54, %v2700_v34  ;;  %v2967_v54 = vstv %s2779_s10  ;;  %v2982_v41 = vld [vmem:[%s4039_s2 + $0x208] sm:$0x1] }
  0x57   :  { %v179_v11 = vadd.f32 %v178_v27, %v177_v33  ;;  %1852 = vmatprep.subr.bf16.mxu0 %v4086_v62  ;;  %v220_v38 = vadd.f32 %v219_v55, %v218_v59  ;;  %v2957_v27 = vld [vmem:[%s4039_s2 + $0x1f0] sm:$0xff]  ;;  %v2962_v33 = vld [vmem:[%s4039_s2 + $0x1f8] sm:$0xff]  ;;  %v2970_v55 = vstv %s2808_s22  ;;  %v553_v43 = vmul.f32 %v2967_v54, %v2386_v12  ;;  %4118 = vst [vmem:[#allocation18_spill] sm:$0xff] %v2982_v41  ;;  %s3058_s22 = sld [smem:[#allocation2 + $0x1b]] }
  0x58   :  { %4115 = vst [vmem:[#allocation15_spill] sm:$0xff] %v2957_v27  ;;  %4116 = vst [vmem:[#allocation16_spill] sm:$0xff] %v2962_v33  ;;  %v200_v32 = vmul.f32 %v199_v30, %v199_v30  ;;  %v202_v6 = vmul.f32 0.5, %v199_v30  ;;  %v2987_v30 = vstv %s2852_s14  ;;  %v590_v27 = vmul.f32 %v2415_v18, %v2990_v8  ;;  %s3067_s14 = sld [smem:[#allocation2 + $0x1c]] }
  0x59   :  { %v180_v59 = vadd.f32 0.375373, %v179_v11  ;;  %v222_v5 = vadd.f32 %v221_v23, %v220_v38  ;;  %v555_v11 = vmul.f32 %v2391_v13, %v2970_v55  ;;  %v558_v38 = vmul.f32 %v2396_v14, %v2987_v30 }
  0x5a   :  { %1854 = vmatpush1.bf16.msra.mxu0 %v1853_v16  ;;  %v201_v23 = vmul.f32 0.117071, %v200_v32  ;;  %v588_v16 = vmul.f32 %v4107_v50, %v2987_v30  ;;  %v592_v33 = vmul.f32 %v2430_v39, %v3001_v47 }
  0x5b   :  { %1855 = vmatprep.subr.bf16.mxu0 %v4086_v62  ;;  %v223_v10 = vadd.f32 %v222_v5, %v2700_v34  ;;  %v556_v44 = vadd.f32 %v555_v11, %v553_v43  ;;  %v181_v32 = vadd.f32 %v180_v59, %v2811_v45  ;;  %v564_v43 = vmul.f32 %v2415_v18, %v3001_v47 }
  0x5c   :  { %v203_v0 = vadd.f32 %v202_v6, %v201_v23  ;;  %v567_v45 = vmul.f32 %v2430_v39, %v3004_v36  ;;  %v3018_v6 = vstv %s2948_s12  ;;  %v3021_v59 = vstv %s2950_s15  ;;  %s3571_s15 = sld [smem:[#allocation2 + $0x2c]]  ;;  %s3762_s12 = sld [smem:[#allocation2 + $0x33]] }
  0x5d   :  { %v224_v60 = vmul.f32 %v223_v10, %v223_v10  ;;  %v226_v52 = vmul.f32 0.5, %v223_v10  ;;  %v559_v34 = vadd.f32 %v558_v38, %v556_v44  ;;  %v570_v10 = vmul.f32 %v2435_v40, %v3010_v15 }
  0x5e   :  { %1857 = vmatpush1.bf16.msra.mxu0 %v1856_v48  ;;  %v204_v5 = vadd.f32 0.375373, %v203_v0  ;;  %v3026_v48 = vstv %s2964_s25  ;;  %v573_v44 = vmul.f32 %v2450_v4, %v3018_v6  ;;  %v585_v0 = vmul.f32 %v2391_v13, %v2967_v54  ;;  %s3493_s25 = sld [smem:[#allocation2 + $0x27]] }
  0x5f   :  { %1858 = vmatprep.subr.bf16.mxu0 %v4086_v62  ;;  %v225_v11 = vmul.f32 0.117071, %v224_v60  ;;  %v562_v23 = vadd.f32 %v561_v9, %v559_v34  ;;  %v586_v38 = vmul.f32 %v2396_v14, %v2970_v55  ;;  %v4119_v9 = vpack.c.bf16 %v2845_v1, %v2840_v29 }
  0x60   :  { %v205_v56 = vadd.f32 %v204_v5, %v181_v32  ;;  %v576_v41 = vmul.f32 %v2455_v2, %v3021_v59  ;;  %v596_v29 = vmul.f32 %v2450_v4, %v3010_v15  ;;  %v609_v1 = vmul.f32 %v2410_v17, %v2967_v54 }
  0x61   :  { %v227_v60 = vadd.f32 %v226_v52, %v225_v11  ;;  %v565_v34 = vadd.f32 %v564_v43, %v562_v23  ;;  %v587_v51 = vadd.f32 %v586_v38, %v585_v0  ;;  %v594_v52 = vmul.f32 %v2469_v53, %v3004_v36 }
  0x62   :  { %1860 = vmatpush1.bf16.msra.mxu0 %v4119_v9  ;;  %v598_v11 = vmul.f32 %v2455_v2, %v3018_v6  ;;  %v610_v23 = vmul.f32 %v2415_v18, %v2970_v55  ;;  %v612_v0 = vmul.f32 %v2430_v39, %v2987_v30 }
  0x63   :  { %1861 = vmatprep.subr.bf16.mxu0 %v4086_v62  ;;  %v228_v32 = vadd.f32 0.375373, %v227_v60  ;;  %v568_v5 = vadd.f32 %v567_v45, %v565_v34  ;;  %v589_v43 = vadd.f32 %v588_v16, %v587_v51  ;;  %v4120_v45 = vpack.c.bf16 %v2873_v7, %v2868_v24 }
  0x64   :  { %v600_v51 = vmul.f32 %v2488_v21, %v3021_v59  ;;  %v614_v16 = vmul.f32 %v2435_v40, %v2990_v8  ;;  %v611_v34 = vadd.f32 %v610_v23, %v609_v1  ;;  %v618_v24 = vmul.f32 %v2455_v2, %v3004_v36 }
  0x65   :  { %v229_v38 = vadd.f32 %v228_v32, %v205_v56  ;;  %v571_v60 = vadd.f32 %v570_v10, %v568_v5  ;;  %v591_v9 = vadd.f32 %v590_v27, %v589_v43  ;;  %v616_v56 = vmul.f32 %v2450_v4, %v3001_v47 }
  0x66   :  { %1863 = vmatpush1.bf16.msra.mxu0 %v4120_v45  ;;  %v620_v32 = vmul.f32 %v4108_v57, %v3010_v15  ;;  %v633_v5 = vmul.f32 %v2415_v18, %v2967_v54  ;;  %v613_v1 = vadd.f32 %v612_v0, %v611_v34  ;;  %v634_v43 = vmul.f32 %v2430_v39, %v2970_v55 }
  0x67   :  { %1864 = vmatprep.subr.bf16.mxu0 %v4086_v62  ;;  %v474_v7 = vrot.slane %v229_v38, %v2720_v31  ;;  %v574_v10 = vadd.f32 %v573_v44, %v571_v60  ;;  %v593_v27 = vadd.f32 %v592_v33, %v591_v9  ;;  %v636_v23 = vmul.f32 %v2469_v53, %v2987_v30 }
  0x68   :  { %v4121_v44 = vpack.c.bf16 %v2906_v20, %v2893_v46  ;;  %v622_v57 = vmul.f32 %v2516_v3, %v3018_v6  ;;  %v624_v54 = vmul.f32 %v2540_v25, %v3021_v59  ;;  %v615_v55 = vadd.f32 %v614_v16, %v613_v1 }
  0x69   :  { %v475_v45 = vcombine.high %v474_v7, %v474_v7  ;;  %v577_v38 = vadd.f32 %v576_v41, %v574_v10  ;;  %v595_v33 = vadd.f32 %v594_v52, %v593_v27  ;;  %v635_v30 = vadd.f32 %v634_v43, %v633_v5 }
  0x6a   :  { %1866 = vmatpush1.bf16.msra.mxu0 %v4121_v44  ;;  %v638_v0 = vmul.f32 %v2450_v4, %v2990_v8  ;;  %v640_v20 = vmul.f32 %v2455_v2, %v3001_v47  ;;  %v642_v41 = vmul.f32 %v2488_v21, %v3004_v36  ;;  %v644_v52 = vmul.f32 %v2516_v3, %v3010_v15 }
  0x6b   :  { %1867 = vmatprep.subr.bf16.mxu0 %v4086_v62  ;;  %1629 = vmatprep.mubr.msk.f32.mxu1 %vm390_vm3, %v475_v45  ;;  %v579_v46 = vadd.f32 %v3026_v48, %v577_v38  ;;  %v597_v8 = vadd.f32 %v596_v29, %v595_v33  ;;  %v617_v60 = vadd.f32 %v616_v56, %v615_v55  ;;  %v3112_v9 = vstv %s3058_s22  ;;  %s3287_s22 = sld [smem:[#allocation2 + $0x24]] }
  0x6c   :  { %547 = vmatmul.mubr.f32.vlgmr.msra.gmra.mrb[0].mxu1 %v474_v7  ;;  %v637_v16 = vadd.f32 %v636_v23, %v635_v30  ;;  %v4122_v34 = vpack.c.bf16 %v2755_v61, %v2750_v19  ;;  %v4123_v47 = vpack.c.bf16 %v2916_v22, %v2911_v42  ;;  %v767_v15 = vmul.f32 %v3112_v9, %v2386_v12 }
  0x6d   :  { %v580_v36 = vmul.f32 %v579_v46, %v579_v46  ;;  %v582_v3 = vmul.f32 0.5, %v579_v46  ;;  %v3125_v29 = vstv %s3067_s14  ;;  %v599_v19 = vadd.f32 %v598_v11, %v597_v8  ;;  %v4127_v46 = vld [vmem:[#allocation16_spill] sm:$0xff] }
  0x6e   :  { %1882 = vmatpush1.bf16.msra.mxu1 %v4122_v34  ;;  %1869 = vmatpush1.bf16.msra.mxu0 %v4123_v47  ;;  %v619_v61 = vadd.f32 %v618_v24, %v617_v60  ;;  %v639_v56 = vadd.f32 %v638_v0, %v637_v16  ;;  %v3130_v42 = vstv %s3074_s18  ;;  %v769_v7 = vmul.f32 %v2391_v13, %v3125_v29  ;;  %v3188_v16 = vld [vmem:[%s4039_s2 + $0x270] sm:$0xff]  ;;  %v3193_v34 = vld [vmem:[%s4039_s2 + $0x278] sm:$0xff] }
  0x6f   :  { %1883 = vmatprep.subr.bf16.mxu1 %v4086_v62  ;;  %1870 = vmatprep.subr.bf16.mxu0 %v4086_v62  ;;  %v581_v22 = vmul.f32 0.117071, %v580_v36  ;;  %v772_v12 = vmul.f32 %v2396_v14, %v3130_v42  ;;  %v3139_v10 = vstv %s3081_s0  ;;  %v601_v5 = vadd.f32 %v600_v51, %v599_v19  ;;  %s3513_s0 = sld [smem:[#allocation2 + $0x28]] }
  0x70   :  { %v621_v27 = vadd.f32 %v620_v32, %v619_v61  ;;  %v641_v11 = vadd.f32 %v640_v20, %v639_v56  ;;  %v646_v24 = vmul.f32 %v2540_v25, %v3018_v6  ;;  %v4124_v1 = vpack.c.bf16 %v2777_v58, %v2772_v35  ;;  %v4128_v20 = vld [vmem:[#allocation15_spill] sm:$0xff] }
  0x71   :  { %v4125_v43 = vpack.c.bf16 %v2932_v49, %v2927_v28  ;;  %v583_v23 = vadd.f32 %v582_v3, %v581_v22  ;;  %v770_v45 = vadd.f32 %v769_v7, %v767_v15  ;;  %v775_v44 = vmul.f32 %v2410_v17, %v3139_v10  ;;  %v4130_v22 = vld [vmem:[#allocation11_spill] sm:$0xff]  ;;  %v4131_v7 = vld [vmem:[#allocation8_spill] sm:$0xff] }
  0x72   :  { %1885 = vmatpush1.bf16.msra.mxu1 %v4124_v1  ;;  %v3152_v51 = vstv %s3094_s27  ;;  %v602_v25 = vadd.f32 %v601_v5, %v3026_v48  ;;  %v623_v35 = vadd.f32 %v622_v57, %v621_v27  ;;  %v643_v58 = vadd.f32 %v642_v41, %v641_v11  ;;  %v4133_v5 = vld [vmem:[#allocation18_spill] sm:$0xff]  ;;  %v4134_v27 = vld [vmem:[#allocation17_spill] sm:$0xff] }
  0x73   :  { %1872 = vmatpush1.bf16.msra.mxu0 %v4125_v43  ;;  %1886 = vmatprep.subr.bf16.mxu1 %v4086_v62  ;;  %v3158_v6 = vstv %s3099_s29  ;;  %v648_v28 = vmul.f32 %v2571_v37, %v3021_v59  ;;  %v773_v49 = vadd.f32 %v772_v12, %v770_v45  ;;  %v778_v32 = vmul.f32 %v2415_v18, %v3152_v51 }
  0x74   :  { %1873 = vmatprep.subr.bf16.mxu0 %v4086_v62  ;;  %v3165_v38 = vstv %s3109_s30  ;;  %v603_v33 = vmul.f32 %v602_v25, %v602_v25  ;;  %v605_v55 = vmul.f32 0.5, %v602_v25  ;;  %v625_v30 = vadd.f32 %v624_v54, %v623_v35 }
  0x75   :  { %v645_v0 = vadd.f32 %v644_v52, %v643_v58  ;;  %v4126_v57 = vpack.c.bf16 %v2801_v26, %v2796_v63  ;;  %v4129_v41 = vpack.c.bf16 %v4127_v46, %v4128_v20  ;;  %v584_v37 = vadd.f32 0.375373, %v583_v23 }
  0x76   :  { %v776_v59 = vadd.f32 %v775_v44, %v773_v49  ;;  %v781_v8 = vmul.f32 %v2430_v39, %v3158_v6  ;;  %v3178_v60 = vstv %s3120_s6  ;;  %v604_v63 = vmul.f32 0.117071, %v603_v33 }
  0x77   :  { %1888 = vmatpush1.bf16.msra.mxu1 %v4126_v57  ;;  %1875 = vmatpush1.bf16.msra.mxu0 %v4129_v41  ;;  %v626_v26 = vadd.f32 %v625_v30, %v3026_v48  ;;  %v647_v54 = vadd.f32 %v646_v24, %v645_v0  ;;  %v784_v52 = vmul.f32 %v2435_v40, %v3165_v38  ;;  %v3198_v3 = vstv %s3132_s7  ;;  %v4138_v30 = vld [vmem:[#allocation10_spill] sm:$0xff] }
  0x78   :  { %1889 = vmatprep.subr.bf16.mxu1 %v4086_v62  ;;  %1876 = vmatprep.subr.bf16.mxu0 %v4086_v62  ;;  %v779_v47 = vadd.f32 %v778_v32, %v776_v59  ;;  %v787_v36 = vmul.f32 %v2450_v4, %v3178_v60  ;;  %v799_v15 = vmul.f32 %v2391_v13, %v3112_v9 }
  0x79   :  { %v606_v40 = vadd.f32 %v605_v55, %v604_v63  ;;  %v627_v19 = vmul.f32 %v626_v26, %v626_v26  ;;  %v629_v61 = vmul.f32 0.5, %v626_v26  ;;  %v649_v56 = vadd.f32 %v648_v28, %v647_v54  ;;  %v4137_v55 = vld [vmem:[#allocation13_spill] sm:$0xff]  ;;  %v3249_v54 = vld [vmem:[%s4038_s1 + $0x14] sm:$0xf] }
  0x7a   :  { %v4132_v12 = vpack.c.bf16 %v4130_v22, %v4131_v7  ;;  %v4135_v11 = vpack.c.bf16 %v4133_v5, %v4134_v27  ;;  %v782_v1 = vadd.f32 %v781_v8, %v779_v47  ;;  %v800_v43 = vmul.f32 %v2396_v14, %v3125_v29  ;;  %v3283_v27 = vld [vmem:[%s4038_s1 + $0x24] sm:$0xf] }
  0x7b   :  { %v802_v13 = vmul.f32 %v4107_v50, %v3130_v42  ;;  %v1899_v23 = vpack.c.bf16 %v3193_v34, %v3188_v16  ;;  %v607_v45 = vadd.f32 0.375373, %v606_v40  ;;  %v628_v44 = vmul.f32 0.117071, %v627_v19 }
  0x7c   :  { %1891 = vmatpush1.bf16.msra.mxu1 %v4132_v12  ;;  %1879 = vmatpush1.bf16.msk.msra.mxu0 %vm2669_vm2, %v4135_v11  ;;  %v650_v25 = vadd.f32 %v649_v56, %v3026_v48  ;;  %v785_v35 = vadd.f32 %v784_v52, %v782_v1  ;;  %v790_v58 = vmul.f32 %v2455_v2, %v3198_v3  ;;  %v3229_v48 = vld [vmem:[%s4039_s2 + $0x280] sm:$0xff]  ;;  %v3234_v2 = vld [vmem:[%s4039_s2 + $0x288] sm:$0xff]  ;;  %v3292_v1 = vld [vmem:[%s4039_s2 + $0x290] sm:$0xff] }
  0x7d   :  { %1892 = vmatprep.subr.bf16.mxu1 %v4086_v62  ;;  %1914 = vmatprep.subr.bf16.mxu0 %v4086_v62  ;;  %v801_v14 = vadd.f32 %v800_v43, %v799_v15  ;;  %v804_v50 = vmul.f32 %v2415_v18, %v3139_v10  ;;  %v608_v28 = vadd.f32 %v607_v45, %v584_v37  ;;  %v3237_v18 = vstv %s3173_s21  ;;  %v4141_v15 = vld [vmem:[#allocation12_spill] sm:$0xff]  ;;  %s3535_s21 = sld [smem:[#allocation2 + $0x29]] }
  0x7e   :  { %v630_v49 = vadd.f32 %v629_v61, %v628_v44  ;;  %v651_v32 = vmul.f32 %v650_v25, %v650_v25  ;;  %v653_v33 = vmul.f32 0.5, %v650_v25  ;;  %v4139_v0 = vpack.c.bf16 %v4137_v55, %v4138_v30  ;;  %v3297_v43 = vld [vmem:[%s4039_s2 + $0x298] sm:$0xff]  ;;  %v3304_v25 = vld [vmem:[%s4039_s2 + $0x2a0] sm:$0xff] }
  0x7f   :  { %v788_v57 = vadd.f32 %v787_v36, %v785_v35  ;;  %v803_v46 = vadd.f32 %v802_v13, %v801_v14  ;;  %v806_v20 = vmul.f32 %v2430_v39, %v3152_v51  ;;  %v808_v59 = vmul.f32 %v2469_v53, %v3158_v6  ;;  %v4140_v36 = vld [vmem:[#allocation14_spill] sm:$0xff] }
  0x80   :  { %1894 = vmatpush1.bf16.msra.mxu1 %v4139_v0  ;;  %v631_v41 = vadd.f32 0.375373, %v630_v49  ;;  %v652_v37 = vmul.f32 0.117071, %v651_v32  ;;  %v823_v8 = vmul.f32 %v2410_v17, %v3112_v9  ;;  %v824_v52 = vmul.f32 %v3249_v54, %v3125_v29  ;;  %v3309_v35 = vld [vmem:[%s4039_s2 + $0x2a8] sm:$0xff] }
  0x81   :  { %1895 = vmatprep.subr.bf16.mxu1 %v4086_v62  ;;  %v791_v63 = vadd.f32 %v790_v58, %v788_v57  ;;  %v805_v26 = vadd.f32 %v804_v50, %v803_v46  ;;  %v826_v16 = vmul.f32 %v2430_v39, %v3130_v42  ;;  %v1902_v34 = vpack.c.bf16 %v3234_v2, %v3229_v48  ;;  %v3266_v39 = vld [vmem:[%s4038_s1 + $0x20] sm:$0xf]  ;;  %v3316_v50 = vld [vmem:[%s4038_s1 + $0x18] sm:$0xf]  ;;  %v3323_v49 = vld [vmem:[%s4038_s1 + $0x1c] sm:$0xf] }
  0x82   :  { %v632_v53 = vadd.f32 %v631_v41, %v608_v28  ;;  %v654_v47 = vadd.f32 %v653_v33, %v652_v37  ;;  %v810_v17 = vmul.f32 %v2450_v4, %v3165_v38  ;;  %v4142_v40 = vpack.c.bf16 %v4140_v36, %v4141_v15  ;;  %v3274_v4 = vld [vmem:[%s4038_s1 + $0x28] sm:$0xf]  ;;  %v3346_v46 = vld [vmem:[%s4039_s2 + $0x2b0] sm:$0xff] }
  0x83   :  { %v793_v19 = vadd.f32 %v3237_v18, %v791_v63  ;;  %v807_v61 = vadd.f32 %v806_v20, %v805_v26  ;;  %v825_v56 = vadd.f32 %v824_v52, %v823_v8  ;;  %v828_v22 = vmul.f32 %v3266_v39, %v3139_v10  ;;  %v3356_v37 = vld [vmem:[%s4038_s1 + $0x30] sm:$0xf]  ;;  %v3363_v63 = vld [vmem:[%s4038_s1 + $0x34] sm:$0xf] }
  0x84   :  { %1897 = vmatpush1.bf16.msra.mxu1 %v4142_v40  ;;  %v655_v7 = vadd.f32 0.375373, %v654_v47  ;;  %v812_v12 = vmul.f32 %v3274_v4, %v3178_v60  ;;  %v814_v5 = vmul.f32 %v2488_v21, %v3198_v3  ;;  %v830_v11 = vmul.f32 %v3283_v27, %v3152_v51  ;;  %v3377_v40 = vld [vmem:[%s4039_s2 + $0x370] sm:$0xff] }
  0x85   :  { %1898 = vmatprep.subr.bf16.mxu1 %v4086_v62  ;;  %v794_v21 = vmul.f32 %v793_v19, %v793_v19  ;;  %v809_v13 = vadd.f32 %v808_v59, %v807_v61  ;;  %v827_v45 = vadd.f32 %v826_v16, %v825_v56  ;;  %v832_v44 = vmul.f32 %v3274_v4, %v3158_v6  ;;  %v3395_v61 = vld [vmem:[%s4039_s2 + $0x388] sm:$0xff] }
  0x86   :  { %v656_v58 = vadd.f32 %v655_v7, %v632_v53  ;;  %v847_v14 = vmul.f32 %v3249_v54, %v3112_v9  ;;  %v848_v28 = vmul.f32 %v3316_v50, %v3125_v29  ;;  %v850_v32 = vmul.f32 %v3323_v49, %v3130_v42  ;;  %v1678_v42 = vld [vmem:[%s4039_s2 + $0x2c0] sm:$0xff]  ;;  %v3372_v53 = vld [vmem:[%s4039_s2 + $0x2d0] sm:$0xff]  ;;  %v3406_v7 = vld [vmem:[%s4038_s1 + $0x2c] sm:$0xf] }
  0x87   :  { %v795_v33 = vmul.f32 0.117071, %v794_v21  ;;  %v796_v55 = vmul.f32 0.5, %v793_v19  ;;  %v811_v9 = vadd.f32 %v810_v17, %v809_v13  ;;  %v829_v30 = vadd.f32 %v828_v22, %v827_v45  ;;  %v1681_v19 = vld [vmem:[%s4039_s2 + $0x2d8] sm:$0xff] }
  0x88   :  { %1900 = vmatpush1.bf16.msra.mxu1 %v1899_v23  ;;  %v1905_v0 = vpack.c.bf16 %v3297_v43, %v3292_v1  ;;  %v687_v29 = vrot.slane %v656_v58, %v2720_v31  ;;  %v849_v48 = vadd.f32 %v848_v28, %v847_v14  ;;  %v852_v2 = vmul.f32 %v3283_v27, %v3139_v10  ;;  %v1679_v23 = vld [vmem:[%s4039_s2 + $0x2c8] sm:$0xff]  ;;  %v3351_v10 = vld [vmem:[%s4039_s2 + $0x2b8] sm:$0x1]  ;;  %v3423_v1 = vld [vmem:[%s4039_s2 + $0x390] sm:$0xff] }
  0x89   :  { %1901 = vmatprep.subr.bf16.mxu1 %v4086_v62  ;;  %v1908_v57 = vpack.c.bf16 %v3309_v35, %v3304_v25  ;;  %v813_v20 = vadd.f32 %v812_v12, %v811_v9  ;;  %v831_v41 = vadd.f32 %v830_v11, %v829_v30  ;;  %v834_v59 = vmul.f32 %v3356_v37, %v3165_v38  ;;  %v3418_v11 = vld [vmem:[%s4039_s2 + $0x2e8] sm:$0xff]  ;;  %v3428_v43 = vld [vmem:[%s4039_s2 + $0x398] sm:$0xff]  ;;  %v3446_v14 = vld [vmem:[%s4039_s2 + $0x2f0] sm:$0xff] }
  0x8a   :  { %v688_v8 = vcombine.high %v687_v29, %v687_v29  ;;  %v836_v26 = vmul.f32 %v3363_v63, %v3178_v60  ;;  %v851_v52 = vadd.f32 %v850_v32, %v849_v48  ;;  %v854_v16 = vmul.f32 %v3274_v4, %v3152_v51  ;;  %v3382_v51 = vld [vmem:[%s4039_s2 + $0x378] sm:$0xff]  ;;  %v3456_v32 = vld [vmem:[%s4039_s2 + $0x3a0] sm:$0xff] }
  0x8b   :  { %v797_v47 = vadd.f32 %v796_v55, %v795_v33  ;;  %v815_v17 = vadd.f32 %v814_v5, %v813_v20  ;;  %v833_v36 = vadd.f32 %v832_v44, %v831_v41  ;;  %v1915_v15 = vpack.c.bf16 %v1679_v23, %v1678_v42  ;;  %v3413_v5 = vld [vmem:[%s4039_s2 + $0x2e0] sm:$0xff]  ;;  %v3437_v45 = vld [vmem:[%s4038_s1 + $0x38] sm:$0xf]  ;;  %4143 = vst [vmem:[#allocation16_spill] sm:$0xff] %v3456_v32  ;;  %v3461_v33 = vld [vmem:[%s4039_s2 + $0x3a8] sm:$0xff] }
  0x8c   :  { %1903 = vmatpush1.bf16.msra.mxu1 %v1902_v34  ;;  %v3390_v34 = vld [vmem:[%s4039_s2 + $0x380] sm:$0xff]  ;;  %v1911_v56 = vpack.c.bf16 %v3351_v10, %v3346_v46  ;;  %1653 = vmatprep.mubr.msk.f32.mxu0 %vm390_vm3, %v688_v8  ;;  %v853_v22 = vadd.f32 %v852_v2, %v851_v52  ;;  %v856_v12 = vmul.f32 %v3406_v7, %v3158_v6  ;;  %v3431_v6 = vstv %s3287_s22  ;;  %v3451_v28 = vld [vmem:[%s4039_s2 + $0x2f8] sm:$0xff]  ;;  %v3481_v2 = vld [vmem:[%s4039_s2 + $0x308] sm:$0xff] }
  0x8d   :  { %1904 = vmatprep.subr.bf16.mxu1 %v4086_v62  ;;  %760 = vmatmul.mubr.f32.vlgmr.msra.gmra.mrb[2].mxu0 %v687_v29  ;;  %v816_v21 = vadd.f32 %v815_v17, %v3237_v18  ;;  %v835_v13 = vadd.f32 %v834_v59, %v833_v36  ;;  %v838_v44 = vmul.f32 %v3437_v45, %v3198_v3  ;;  %v3473_v30 = vld [vmem:[%s4038_s1 + $0x3c] sm:$0xf]  ;;  %v3501_v59 = vld [vmem:[%s4039_s2 + $0x310] sm:$0xff]  ;;  %v3538_v36 = vstv %s3339_s16  ;;  %v3638_v10 = vld [vmem:[%s4039_s2 + $0x360] sm:$0xff]  ;;  %s3734_s16 = sld [smem:[#allocation2 + $0x30]] }
  0x8e   :  { %v858_v58 = vmul.f32 %v3363_v63, %v3165_v38  ;;  %4144 = vst [vmem:[#allocation15_spill] sm:$0xff] %v3461_v33  ;;  %v3466_v38 = vld [vmem:[%s4039_s2 + $0x300] sm:$0xff]  ;;  %v855_v55 = vadd.f32 %v854_v16, %v853_v22  ;;  %v860_v9 = vmul.f32 %v3437_v45, %v3178_v60  ;;  %v862_v29 = vmul.f32 %v3473_v30, %v3198_v3  ;;  %v3486_v60 = vld [vmem:[%s4039_s2 + $0x3b0] sm:$0xff]  ;;  %v3491_v42 = vld [vmem:[%s4039_s2 + $0x3b8] sm:$0xff] }
  0x8f   :  { %1916 = vmatpush1.bf16.msra.mxu0 %v1915_v15  ;;  %v1918_v48 = vpack.c.bf16 %v1681_v19, %v3372_v53  ;;  %4145 = vst [vmem:[#allocation11_spill] sm:$0xff] %v3486_v60  ;;  %4146 = vst [vmem:[#allocation8_spill] sm:$0xff] %v3491_v42  ;;  %v3495_v3 = vadd.f32 0.375373, %v797_v47  ;;  %v817_v23 = vmul.f32 %v816_v21, %v816_v21  ;;  %v819_v20 = vmul.f32 0.5, %v816_v21  ;;  %v3506_v8 = vld [vmem:[%s4039_s2 + $0x318] sm:$0xff] }
  0x90   :  { %1906 = vmatpush1.bf16.msra.mxu1 %v1905_v0  ;;  %v837_v41 = vadd.f32 %v836_v26, %v835_v13  ;;  %1917 = vmatprep.subr.bf16.mxu0 %v4086_v62  ;;  %v3511_v0 = vld [vmem:[%s4039_s2 + $0x320] sm:$0xff]  ;;  %v857_v26 = vadd.f32 %v856_v12, %v855_v55  ;;  %v3523_v53 = vld [vmem:[%s4039_s2 + $0x328] sm:$0xff]  ;;  %v3528_v47 = vld [vmem:[%s4039_s2 + $0x330] sm:$0xff]  ;;  %v1921_v22 = vpack.c.bf16 %v3418_v11, %v3413_v5  ;;  %v3630_v16 = vstv %s3513_s0 }
  0x91   :  { %1907 = vmatprep.subr.bf16.mxu1 %v4086_v62  ;;  %v3533_v17 = vld [vmem:[%s4039_s2 + $0x338] sm:$0xff]  ;;  %v818_v15 = vmul.f32 0.117071, %v817_v23  ;;  %v1924_v13 = vpack.c.bf16 %v3451_v28, %v3446_v14  ;;  %v3557_v5 = vld [vmem:[%s4039_s2 + $0x340] sm:$0xff]  ;;  %v3562_v11 = vld [vmem:[%s4039_s2 + $0x348] sm:$0xff]  ;;  %4149 = vst [vmem:[#allocation13_spill] sm:$0xff] %v3638_v10  ;;  %v3656_v12 = vstv %s3544_s28  ;;  %v4151_v10 = vpack.c.bf16 %v3481_v2, %v3466_v38 }
  0x92   :  { %v839_v19 = vadd.f32 %v838_v44, %v837_v41  ;;  %v859_v21 = vadd.f32 %v858_v58, %v857_v26  ;;  %v3600_v28 = vld [vmem:[%s4038_s1] sm:$0xf]  ;;  %v3659_v52 = vstv %s3546_s19  ;;  %v3692_v32 = vstv %s3595_s26  ;;  %s3720_s28 = sld [smem:[#allocation2 + $0x2e]]  ;;  %s3727_s19 = sld [smem:[#allocation2 + $0x2f]] }
  0x93   :  { %1919 = vmatpush1.bf16.msra.mxu0 %v1918_v48  ;;  %v820_v58 = vadd.f32 %v819_v20, %v818_v15  ;;  %v3574_v48 = vstv %s3397_s13  ;;  %v3591_v20 = vld [vmem:[%s4039_s2 + $0x358] sm:$0xff]  ;;  %v981_v55 = vmul.f32 %v3600_v28, %v3431_v6  ;;  %v1024_v38 = vmul.f32 %v3283_v27, %v3656_v12  ;;  %s2070_s13 = smov [#allocation5]  }
  0x94   :  { %1909 = vmatpush1.bf16.msra.mxu1 %v1908_v57  ;;  %v840_v14 = vadd.f32 %v839_v19, %v3237_v18  ;;  %1920 = vmatprep.subr.bf16.mxu0 %v4086_v62  ;;  %v861_v23 = vadd.f32 %v860_v9, %v859_v21  ;;  %v3586_v57 = vld [vmem:[%s4039_s2 + $0x350] sm:$0xff]  ;;  %4148 = vst [vmem:[#allocation17_spill] sm:$0xff] %v3591_v20  ;;  %v3627_v19 = vstv %s3493_s25  ;;  %s1521_s26 = sshll.u32 %s2070_s13, 4  ;;  %s1522_s26 = int_to_ptr.vmem [resolvable:$true] %s1521_s26 }
  0x95   :  { %1910 = vmatprep.subr.bf16.mxu1 %v4086_v62  ;;  %4147 = vst [vmem:[#allocation18_spill] sm:$0xff] %v3586_v57  ;;  %v821_v9 = vadd.f32 0.375373, %v820_v58  ;;  %v3607_v58 = vld [vmem:[%s4038_s1 + $0x4] sm:$0xf]  ;;  %v1018_v57 = vmul.f32 %v3249_v54, %v3627_v19  ;;  %v1020_v20 = vmul.f32 %v3316_v50, %v3630_v16  ;;  %s2038_s24 = scalar_lea.vmem %s1522_s26, 32  ;;  %p2043_p6 = scmp.lt.s32.totalorder %s1522_s26, %s1522_s26 }
  0x96   :  { %v841_v26 = vmul.f32 %v840_v14, %v840_v14  ;;  %v843_v15 = vmul.f32 0.5, %v840_v14  ;;  %v863_v21 = vadd.f32 %v862_v29, %v861_v23  ;;  %v983_v14 = vmul.f32 %v3607_v58, %v3538_v36  ;;  %v3614_v29 = vld [vmem:[%s4038_s1 + $0x8] sm:$0xf]  ;;  %p2039_p5 = scmp.ne.s32.totalorder %s1522_s26, %s2038_s24  ;;  %p2044_p7 = scmp.lt.s32.totalorder %s2038_s24, %s2038_s24 }
  0x97   :  { %1922 = vmatpush1.bf16.msra.mxu0 %v1921_v22  ;;  %v986_v22 = vmul.f32 %v3614_v29, %v3574_v48  ;;  %v822_v35 = vadd.f32 %v821_v9, %v3495_v3  ;;  %v3648_v3 = vld [vmem:[%s4038_s1 + $0x10] sm:$0xf] }
  0x98   :  { %1913 = vmatpush1.bf16.msk.msra.mxu1 %vm2669_vm2, %v1911_v56  ;;  %v842_v23 = vmul.f32 0.117071, %v841_v26  ;;  %1923 = vmatprep.subr.bf16.mxu0 %v4086_v62  ;;  %v864_v46 = vadd.f32 %v863_v21, %v3237_v18  ;;  %v3643_v56 = vld [vmem:[%s4039_s2 + $0x368] sm:$0x1]  ;;  %v984_v26 = vadd.f32 %v983_v14, %v981_v55  ;;  %v989_v18 = vmul.f32 %v3648_v3, %v3627_v19  ;;  %p2045_p8 = por %p2044_p7, %p2043_p6 }
  0x99   :  { %1948 = vmatprep.subr.bf16.mxu1 %v4086_v62  ;;  %4150 = vst [vmem:[#allocation10_spill] sm:$0xff] %v3643_v56  ;;  %v3653_v21 = vstv %s3535_s21  ;;  %v992_v14 = vmul.f32 %v3249_v54, %v3630_v16 }
  0x9a   :  { %v844_v9 = vadd.f32 %v843_v15, %v842_v23  ;;  %v865_v25 = vmul.f32 %v864_v46, %v864_v46  ;;  %v867_v41 = vmul.f32 0.5, %v864_v46  ;;  %v987_v55 = vadd.f32 %v986_v22, %v984_v26  ;;  %p2046_p9 = pnand %p2045_p8, %p2039_p5 }
  0x9b   :  { %1925 = vmatpush1.bf16.msra.mxu0 %v1924_v13  ;;  %v995_v15 = vmul.f32 %v3316_v50, %v3653_v21  ;;  %v3669_v23 = vstv %s3571_s15  ;;  %v998_v13 = vmul.f32 %v3266_v39, %v3656_v12  ;;  %v1001_v22 = vmul.f32 %v3283_v27, %v3659_v52  ;;  %s3773_s15 = sld [smem:[#allocation2 + $0x34]] }
  0x9c   :  { %v845_v44 = vadd.f32 0.375373, %v844_v9  ;;  %1926 = vmatprep.subr.bf16.mxu0 %v4086_v62  ;;  %v866_v42 = vmul.f32 0.117071, %v865_v25  ;;  %v990_v24 = vadd.f32 %v989_v18, %v987_v55  ;;  %v1004_v46 = vmul.f32 %v3274_v4, %v3669_v23  ;;  %v3684_v25 = vld [vmem:[%s4038_s1 + $0xc] sm:$0xf] }
  0x9d   :  { %v1013_v26 = vmul.f32 %v3607_v58, %v3431_v6  ;;  %v1014_v9 = vmul.f32 %v3614_v29, %v3538_v36  ;;  %v1016_v18 = vmul.f32 %v3684_v25, %v3574_v48  ;;  %s3711_s1 = sld [smem:[#allocation2 + $0x2d]] }
  0x9e   :  { %v846_v55 = vadd.f32 %v845_v44, %v822_v35  ;;  %v868_v60 = vadd.f32 %v867_v41, %v866_v42  ;;  %v993_v56 = vadd.f32 %v992_v14, %v990_v24  ;;  %v1022_v44 = vmul.f32 %v3323_v49, %v3653_v21 }
  0x9f   :  { %1928 = vmatpush1.bf16.msra.mxu0 %v4151_v10  ;;  %v1015_v33 = vadd.f32 %v1014_v9, %v1013_v26  ;;  %v1037_v24 = vmul.f32 %v3648_v3, %v3431_v6  ;;  %v1026_v35 = vmul.f32 %v3274_v4, %v3659_v52  ;;  %v1038_v10 = vmul.f32 %v3249_v54, %v3538_v36 }
  0xa0   :  { %1929 = vmatprep.subr.bf16.mxu0 %v4086_v62  ;;  %v869_v42 = vadd.f32 0.375373, %v868_v60  ;;  %v996_v41 = vadd.f32 %v995_v15, %v993_v56  ;;  %v1040_v14 = vmul.f32 %v3316_v50, %v3574_v48  ;;  %v4152_v56 = vpack.c.bf16 %v3506_v8, %v3501_v59 }
  0xa1   :  { %v1017_v2 = vadd.f32 %v1016_v18, %v1015_v33  ;;  %v1028_v33 = vmul.f32 %v3406_v7, %v3669_v23  ;;  %v1042_v26 = vmul.f32 %v3266_v39, %v3627_v19  ;;  %v1039_v18 = vadd.f32 %v1038_v10, %v1037_v24 }
  0xa2   :  { %v870_v60 = vadd.f32 %v869_v42, %v846_v55  ;;  %v999_v15 = vadd.f32 %v998_v13, %v996_v41  ;;  %v1044_v55 = vmul.f32 %v3283_v27, %v3630_v16  ;;  %v1046_v59 = vmul.f32 %v3274_v4, %v3653_v21 }
  0xa3   :  { %1931 = vmatpush1.bf16.msra.mxu0 %v4152_v56  ;;  %v1019_v9 = vadd.f32 %v1018_v57, %v1017_v2  ;;  %v1048_v42 = vmul.f32 %v3356_v37, %v3656_v12  ;;  %v1061_v41 = vmul.f32 %v3249_v54, %v3431_v6  ;;  %v1041_v24 = vadd.f32 %v1040_v14, %v1039_v18 }
  0xa4   :  { %1932 = vmatprep.subr.bf16.mxu0 %v4086_v62  ;;  %v901_v8 = vrot.slane %v870_v60, %v2720_v31  ;;  %v1002_v13 = vadd.f32 %v1001_v22, %v999_v15  ;;  %v1062_v2 = vmul.f32 %v3316_v50, %v3538_v36  ;;  %v1064_v10 = vmul.f32 %v3323_v49, %v3574_v48 }
  0xa5   :  { %v1021_v57 = vadd.f32 %v1020_v20, %v1019_v9  ;;  %v4153_v22 = vpack.c.bf16 %v3523_v53, %v3511_v0  ;;  %v1050_v15 = vmul.f32 %v3363_v63, %v3659_v52  ;;  %v1052_v6 = vmul.f32 %v3437_v45, %v3669_v23 }
  0xa6   :  { %v902_v56 = vcombine.high %v901_v8, %v901_v8  ;;  %v1005_v60 = vadd.f32 %v1004_v46, %v1002_v13  ;;  %v1043_v20 = vadd.f32 %v1042_v26, %v1041_v24  ;;  %v1063_v48 = vadd.f32 %v1062_v2, %v1061_v41 }
  0xa7   :  { %1934 = vmatpush1.bf16.msra.mxu0 %v4153_v22  ;;  %v1023_v36 = vadd.f32 %v1022_v44, %v1021_v57  ;;  %v1066_v14 = vmul.f32 %v3283_v27, %v3627_v19  ;;  %v1068_v53 = vmul.f32 %v3274_v4, %v3630_v16  ;;  %v1070_v46 = vmul.f32 %v3406_v7, %v3653_v21 }
  0xa8   :  { %1935 = vmatprep.subr.bf16.mxu0 %v4086_v62  ;;  %1677 = vmatprep.mubr.msk.f32.mxu1 %vm390_vm3, %v902_v56  ;;  %v1007_v0 = vadd.f32 %v3692_v32, %v1005_v60  ;;  %v1072_v44 = vmul.f32 %v3363_v63, %v3656_v12  ;;  %v1045_v26 = vadd.f32 %v1044_v55, %v1043_v20  ;;  %v3765_v18 = vstv %s3711_s1 }
  0xa9   :  { %974 = vmatmul.mubr.f32.vlgmr.msra.gmra.mrb[2].mxu1 %v901_v8  ;;  %v1025_v19 = vadd.f32 %v1024_v38, %v1023_v36  ;;  %v1065_v9 = vadd.f32 %v1064_v10, %v1063_v48  ;;  %v4154_v13 = vpack.c.bf16 %v3382_v51, %v3377_v40  ;;  %v4155_v16 = vpack.c.bf16 %v3533_v17, %v3528_v47 }
  0xaa   :  { %v1008_v21 = vmul.f32 %v1007_v0, %v1007_v0  ;;  %v1010_v12 = vmul.f32 0.5, %v1007_v0  ;;  %v1195_v38 = vmul.f32 %v3600_v28, %v3765_v18  ;;  %v3778_v55 = vstv %s3720_s28 }
  0xab   :  { %1950 = vmatpush1.bf16.msra.mxu1 %v4154_v13  ;;  %1937 = vmatpush1.bf16.msra.mxu0 %v4155_v16  ;;  %v1027_v40 = vadd.f32 %v1026_v35, %v1025_v19  ;;  %v1047_v51 = vadd.f32 %v1046_v59, %v1045_v26  ;;  %v1067_v8 = vadd.f32 %v1066_v14, %v1065_v9  ;;  %v3783_v47 = vstv %s3727_s19  ;;  %v4160_v26 = vld [vmem:[#allocation18_spill] sm:$0xff] }
  0xac   :  { %1951 = vmatprep.subr.bf16.mxu1 %v4086_v62  ;;  %1938 = vmatprep.subr.bf16.mxu0 %v4086_v62  ;;  %v1009_v17 = vmul.f32 0.117071, %v1008_v21  ;;  %v1197_v41 = vmul.f32 %v3607_v58, %v3778_v55  ;;  %v1200_v28 = vmul.f32 %v3614_v29, %v3783_v47  ;;  %v3792_v57 = vstv %s3734_s16 }
  0xad   :  { %v1029_v24 = vadd.f32 %v1028_v33, %v1027_v40  ;;  %v1049_v2 = vadd.f32 %v1048_v42, %v1047_v51  ;;  %v1069_v35 = vadd.f32 %v1068_v53, %v1067_v8  ;;  %v1074_v59 = vmul.f32 %v3437_v45, %v3659_v52 }
  0xae   :  { %v4156_v10 = vpack.c.bf16 %v3395_v61, %v3390_v34  ;;  %v4157_v56 = vpack.c.bf16 %v3562_v11, %v3557_v5  ;;  %v1011_v22 = vadd.f32 %v1010_v12, %v1009_v17  ;;  %v1198_v60 = vadd.f32 %v1197_v41, %v1195_v38 }
  0xaf   :  { %v1203_v36 = vmul.f32 %v3648_v3, %v3792_v57  ;;  %v3805_v33 = vstv %s3747_s8  ;;  %v1030_v52 = vadd.f32 %v1029_v24, %v3692_v32  ;;  %v1051_v34 = vadd.f32 %v1050_v15, %v1049_v2  ;;  %v4162_v24 = vld [vmem:[#allocation15_spill] sm:$0xff]  ;;  %v4163_v2 = vld [vmem:[#allocation16_spill] sm:$0xff] }
  0xb0   :  { %1953 = vmatpush1.bf16.msra.mxu1 %v4156_v10  ;;  %1940 = vmatpush1.bf16.msra.mxu0 %v4157_v56  ;;  %v1071_v61 = vadd.f32 %v1070_v46, %v1069_v35  ;;  %v3811_v42 = vstv %s3752_s17  ;;  %v1076_v5 = vmul.f32 %v3473_v30, %v3669_v23  ;;  %v1201_v11 = vadd.f32 %v1200_v28, %v1198_v60  ;;  %v4159_v46 = vld [vmem:[#allocation17_spill] sm:$0xff] }
  0xb1   :  { %1954 = vmatprep.subr.bf16.mxu1 %v4086_v62  ;;  %1941 = vmatprep.subr.bf16.mxu0 %v4086_v62  ;;  %v1206_v20 = vmul.f32 %v3249_v54, %v3805_v33  ;;  %v3818_v48 = vstv %s3762_s12  ;;  %v1031_v14 = vmul.f32 %v1030_v52, %v1030_v52  ;;  %v1033_v0 = vmul.f32 0.5, %v1030_v52  ;;  %v4166_v10 = vld [vmem:[#allocation13_spill] sm:$0xff] }
  0xb2   :  { %v1053_v53 = vadd.f32 %v1052_v6, %v1051_v34  ;;  %v1073_v19 = vadd.f32 %v1072_v44, %v1071_v61  ;;  %v4158_v15 = vpack.c.bf16 %v3428_v43, %v3423_v1  ;;  %v4161_v9 = vpack.c.bf16 %v4159_v46, %v4160_v26  ;;  %v1712_v52 = vld [vmem:[%s4039_s2 + $0x3c0] sm:$0xff]  ;;  %v1713_v34 = vld [vmem:[%s4039_s2 + $0x3c8] sm:$0xff]  ;;  %v4170_v26 = vld [vmem:[#allocation11_spill] sm:$0xff] }
  0xb3   :  { %v1012_v23 = vadd.f32 0.375373, %v1011_v22  ;;  %v1204_v13 = vadd.f32 %v1203_v36, %v1201_v11  ;;  %v1209_v16 = vmul.f32 %v3316_v50, %v3811_v42  ;;  %v3829_v21 = vstv %s3773_s15  ;;  %v4169_v46 = vld [vmem:[#allocation8_spill] sm:$0xff] }
  0xb4   :  { %1956 = vmatpush1.bf16.msra.mxu1 %v4158_v15  ;;  %1943 = vmatpush1.bf16.msra.mxu0 %v4161_v9  ;;  %v1032_v6 = vmul.f32 0.117071, %v1031_v14  ;;  %v1054_v44 = vadd.f32 %v1053_v53, %v3692_v32  ;;  %v1075_v1 = vadd.f32 %v1074_v59, %v1073_v19  ;;  %v1212_v43 = vmul.f32 %v3266_v39, %v3818_v48  ;;  %v4165_v59 = vld [vmem:[#allocation10_spill] sm:$0xff]  ;;  %v1419_v22 = vld [vmem:[%s4040_s3] sm:$0xff] }
  0xb5   :  { %1957 = vmatprep.subr.bf16.mxu1 %v4086_v62  ;;  %1944 = vmatprep.subr.bf16.mxu0 %v4086_v62  ;;  %v1207_v12 = vadd.f32 %v1206_v20, %v1204_v13  ;;  %v1215_v38 = vmul.f32 %v3283_v27, %v3829_v21  ;;  %v3839_v40 = vstv %s3785_s11  ;;  %v1227_v51 = vmul.f32 %v3607_v58, %v3765_v18 }
  0xb6   :  { %v1034_v8 = vadd.f32 %v1033_v0, %v1032_v6  ;;  %v1055_v17 = vmul.f32 %v1054_v44, %v1054_v44  ;;  %v1057_v41 = vmul.f32 0.5, %v1054_v44  ;;  %v1077_v28 = vadd.f32 %v1076_v5, %v1075_v1 }
  0xb7   :  { %v4164_v35 = vpack.c.bf16 %v4162_v24, %v4163_v2  ;;  %v4167_v56 = vpack.c.bf16 %v4165_v59, %v4166_v10  ;;  %v1210_v60 = vadd.f32 %v1209_v16, %v1207_v12  ;;  %v1228_v58 = vmul.f32 %v3614_v29, %v3778_v55  ;;  %v1715_v16 = vld [vmem:[%s4039_s2 + $0x3d8] sm:$0xff] }
  0xb8   :  { %v1230_v36 = vmul.f32 %v3684_v25, %v3783_v47  ;;  %v1035_v61 = vadd.f32 0.375373, %v1034_v8  ;;  %v1056_v5 = vmul.f32 0.117071, %v1055_v17  ;;  %v1078_v11 = vadd.f32 %v1077_v28, %v3692_v32  ;;  %v1714_v32 = vld [vmem:[%s4039_s2 + $0x3d0] sm:$0xff]  ;;  %v1716_v8 = vld [vmem:[%s4039_s2 + $0x3e0] sm:$0xff] }
  0xb9   :  { %1959 = vmatpush1.bf16.msra.mxu1 %v4164_v35  ;;  %1947 = vmatpush1.bf16.msk.msra.mxu0 %vm2669_vm2, %v4167_v56  ;;  %v1213_v29 = vadd.f32 %v1212_v43, %v1210_v60  ;;  %v1218_v25 = vmul.f32 %v3274_v4, %v3839_v40  ;;  %v1229_v20 = vadd.f32 %v1228_v58, %v1227_v51 }
  0xba   :  { %1960 = vmatprep.subr.bf16.mxu1 %v4086_v62  ;;  %1982 = vmatprep.subr.bf16.mxu0 %v4086_v62  ;;  %v1232_v14 = vmul.f32 %v3249_v54, %v3792_v57  ;;  %v1036_v0 = vadd.f32 %v1035_v61, %v1012_v23  ;;  %v1058_v53 = vadd.f32 %v1057_v41, %v1056_v5  ;;  %v1081_v15 = vmul.f32 0.5, %v1078_v11 }
  0xbb   :  { %v1079_v19 = vmul.f32 %v1078_v11, %v1078_v11  ;;  %v4171_v9 = vpack.c.bf16 %v4169_v46, %v4170_v26  ;;  %v1964_v13 = vpack.c.bf16 %v1713_v34, %v1712_v52  ;;  %v1216_v6 = vadd.f32 %v1215_v38, %v1213_v29  ;;  %v1717_v38 = vld [vmem:[%s4039_s2 + $0x3e8] sm:$0xff] }
  0xbc   :  { %v1231_v44 = vadd.f32 %v1230_v36, %v1229_v20  ;;  %v1234_v23 = vmul.f32 %v3316_v50, %v3805_v33  ;;  %v1059_v1 = vadd.f32 0.375373, %v1058_v53  ;;  %v1236_v12 = vmul.f32 %v3323_v49, %v3811_v42 }
  0xbd   :  { %1962 = vmatpush1.bf16.msra.mxu1 %v4171_v9  ;;  %v1080_v43 = vmul.f32 0.117071, %v1079_v19  ;;  %v1251_v51 = vmul.f32 %v3648_v3, %v3765_v18  ;;  %v1219_v17 = vadd.f32 %v1218_v25, %v1216_v6  ;;  %v1252_v28 = vmul.f32 %v3249_v54, %v3778_v55 }
  0xbe   :  { %1963 = vmatprep.subr.bf16.mxu1 %v4086_v62  ;;  %v1233_v41 = vadd.f32 %v1232_v14, %v1231_v44  ;;  %v1254_v24 = vmul.f32 %v3316_v50, %v3783_v47  ;;  %v1967_v2 = vpack.c.bf16 %v1715_v16, %v1714_v32  ;;  %v1060_v35 = vadd.f32 %v1059_v1, %v1036_v0 }
  0xbf   :  { %v1082_v59 = vadd.f32 %v1081_v15, %v1080_v43  ;;  %v3897_v3 = vstv %s3843_s20  ;;  %v1238_v56 = vmul.f32 %v3283_v27, %v3818_v48  ;;  %v1253_v60 = vadd.f32 %v1252_v28, %v1251_v51 }
  0xc0   :  { %v1235_v10 = vadd.f32 %v1234_v23, %v1233_v41  ;;  %v1256_v58 = vmul.f32 %v3266_v39, %v3792_v57  ;;  %v1970_v36 = vpack.c.bf16 %v1717_v38, %v1716_v8  ;;  %v1240_v34 = vmul.f32 %v3274_v4, %v3829_v21 }
  0xc1   :  { %1965 = vmatpush1.bf16.msra.mxu1 %v1964_v13  ;;  %v1083_v52 = vadd.f32 0.375373, %v1082_v59  ;;  %v1221_v61 = vadd.f32 %v3897_v3, %v1219_v17  ;;  %v1255_v11 = vadd.f32 %v1254_v24, %v1253_v60  ;;  %v1258_v29 = vmul.f32 %v3283_v27, %v3805_v33 }
  0xc2   :  { %1966 = vmatprep.subr.bf16.mxu1 %v4086_v62  ;;  %v1237_v5 = vadd.f32 %v1236_v12, %v1235_v10  ;;  %v1275_v20 = vmul.f32 %v3249_v54, %v3765_v18  ;;  %v1276_v39 = vmul.f32 %v3316_v50, %v3778_v55  ;;  %v1278_v14 = vmul.f32 %v3323_v49, %v3783_v47  ;;  %v1718_v54 = vld [vmem:[%s4039_s2 + $0x3f0] sm:$0xff]  ;;  %v1719_v50 = vld [vmem:[%s4039_s2 + $0x3f8] sm:$0xff] }
  0xc3   :  { %v1084_v25 = vadd.f32 %v1083_v52, %v1060_v35  ;;  %v1242_v53 = vmul.f32 %v3406_v7, %v3839_v40  ;;  %v1257_v19 = vadd.f32 %v1256_v58, %v1255_v11  ;;  %v1260_v15 = vmul.f32 %v3274_v4, %v3811_v42 }
  0xc4   :  { %v1239_v0 = vadd.f32 %v1238_v56, %v1237_v5  ;;  %v1277_v18 = vadd.f32 %v1276_v39, %v1275_v20  ;;  %v1280_v55 = vmul.f32 %v3283_v27, %v3792_v57  ;;  %v1262_v26 = vmul.f32 %v3356_v37, %v3818_v48  ;;  %v1720_v27 = vld [vmem:[%s4039_s2 + $0x400] sm:$0xff]  ;;  %v1721_v37 = vld [vmem:[%s4039_s2 + $0x408] sm:$0xff] }
  0xc5   :  { %1968 = vmatpush1.bf16.msra.mxu1 %v1967_v2  ;;  %v1115_v49 = vrot.slane %v1084_v25, %v2720_v31  ;;  %v1259_v46 = vadd.f32 %v1258_v29, %v1257_v19  ;;  %v1222_v13 = vmul.f32 %v1221_v61, %v1221_v61  ;;  %v1282_v16 = vmul.f32 %v3274_v4, %v3805_v33 }
  0xc6   :  { %1969 = vmatprep.subr.bf16.mxu1 %v4086_v62  ;;  %v1241_v47 = vadd.f32 %v1240_v34, %v1239_v0  ;;  %v1279_v32 = vadd.f32 %v1278_v14, %v1277_v18  ;;  %v1973_v6 = vpack.c.bf16 %v1719_v50, %v1718_v54  ;;  %v1264_v1 = vmul.f32 %v3363_v63, %v3829_v21  ;;  %v1421_v18 = vld [vmem:[%s4040_s3 + $0x10] sm:$0xff] }
  0xc7   :  { %v1116_v9 = vcombine.high %v1115_v49, %v1115_v49  ;;  %v1261_v23 = vadd.f32 %v1260_v15, %v1259_v46  ;;  %v1284_v57 = vmul.f32 %v3406_v7, %v3811_v42  ;;  %v1266_v12 = vmul.f32 %v3437_v45, %v3839_v40  ;;  %v1722_v7 = vld [vmem:[%s4039_s2 + $0x410] sm:$0xff]  ;;  %v1723_v42 = vld [vmem:[%s4039_s2 + $0x418] sm:$0x1]  ;;  %v1423_v46 = vld [vmem:[%s4040_s3 + $0x20] sm:$0xff] }
  0xc8   :  { %v1243_v44 = vadd.f32 %v1242_v53, %v1241_v47  ;;  %v1281_v4 = vadd.f32 %v1280_v55, %v1279_v32  ;;  %v1223_v51 = vmul.f32 0.117071, %v1222_v13  ;;  %v1224_v8 = vmul.f32 0.5, %v1221_v61  ;;  %v1425_v13 = vld [vmem:[%s4040_s3 + $0x30] sm:$0xff]  ;;  %v1426_v32 = vld [vmem:[%s4040_s3 + $0x38] sm:$0xff] }
  0xc9   :  { %1971 = vmatpush1.bf16.msra.mxu1 %v1970_v36  ;;  %1701 = vmatprep.mubr.msk.f32.mxu0 %vm390_vm3, %v1116_v9  ;;  %v1263_v43 = vadd.f32 %v1262_v26, %v1261_v23  ;;  %v1286_v17 = vmul.f32 %v3363_v63, %v3818_v48  ;;  %v1976_v41 = vpack.c.bf16 %v1721_v37, %v1720_v27  ;;  %v1424_v26 = vld [vmem:[%s4040_s3 + $0x28] sm:$0xff]  ;;  %v1427_v23 = vld [vmem:[%s4040_s3 + $0x40] sm:$0xff]  ;;  %v1429_v37 = vld [vmem:[%s4040_s3 + $0x50] sm:$0xff] }
  0xca   :  { %1972 = vmatprep.subr.bf16.mxu1 %v4086_v62  ;;  %1188 = vmatmul.mubr.f32.vlgmr.msra.gmra.mrb[4].mxu0 %v1115_v49  ;;  %v1244_v33 = vadd.f32 %v1243_v44, %v3897_v3  ;;  %v1283_v38 = vadd.f32 %v1282_v16, %v1281_v4  ;;  %v1288_v59 = vmul.f32 %v3437_v45, %v3829_v21  ;;  %v1430_v4 = vld [vmem:[%s4040_s3 + $0x58] sm:$0xff] }
  0xcb   :  { %v1265_v2 = vadd.f32 %v1264_v1, %v1263_v43  ;;  %v1225_v10 = vadd.f32 %v1224_v8, %v1223_v51  ;;  %v1290_v60 = vmul.f32 %v3473_v30, %v3839_v40  ;;  %v1979_v58 = vpack.c.bf16 %v1723_v42, %v1722_v7  ;;  %v1428_v1 = vld [vmem:[%s4040_s3 + $0x48] sm:$0xff] }
  0xcc   :  { %v1245_v28 = vmul.f32 %v1244_v33, %v1244_v33  ;;  %v1247_v24 = vmul.f32 0.5, %v1244_v33  ;;  %v1285_v35 = vadd.f32 %v1284_v57, %v1283_v38  ;;  %v1989_v9 = vpack.c.bf16 %v1424_v26, %v1423_v46  ;;  %v1431_v33 = vld [vmem:[%s4040_s3 + $0x60] sm:$0xff]  ;;  %v1432_v43 = vld [vmem:[%s4040_s3 + $0x68] sm:$0xff] }
  0xcd   :  { %1974 = vmatpush1.bf16.msra.mxu1 %v1973_v6  ;;  %v1267_v48 = vadd.f32 %v1266_v12, %v1265_v2  ;;  %v1226_v11 = vadd.f32 0.375373, %v1225_v10  ;;  %v1992_v16 = vpack.c.bf16 %v1426_v32, %v1425_v13  ;;  %v1995_v27 = vpack.c.bf16 %v1428_v1, %v1427_v23  ;;  %v1726_v10 = vld [vmem:[%s4041_s4] ss:$0 sm:$0xff] }
  0xce   :  { %1975 = vmatprep.subr.bf16.mxu1 %v4086_v62  ;;  %v1246_v63 = vmul.f32 0.117071, %v1245_v28  ;;  %v1287_v56 = vadd.f32 %v1286_v17, %v1285_v35  ;;  %v1998_v57 = vpack.c.bf16 %v1430_v4, %v1429_v37  ;;  %v2001_v12 = vpack.c.bf16 %v1432_v43, %v1431_v33  ;;  %v1433_v17 = vld [vmem:[%s4040_s3 + $0x70] sm:$0xff] }
  0xcf   :  { %v1268_v52 = vadd.f32 %v1267_v48, %v3897_v3 }
  0xd0   :  { %v1248_v36 = vadd.f32 %v1247_v24, %v1246_v63  ;;  %v1289_v34 = vadd.f32 %v1288_v59, %v1287_v56 }
  0xd1   :  { %1977 = vmatpush1.bf16.msra.mxu1 %v1976_v41  ;;  %v1269_v61 = vmul.f32 %v1268_v52, %v1268_v52  ;;  %v1271_v5 = vmul.f32 0.5, %v1268_v52  ;;  %v2068_v41 = vmov 0.0  }
  0xd2   :  { %1978 = vmatprep.subr.bf16.mxu1 %v4086_v62  ;;  %v1249_v29 = vadd.f32 0.375373, %v1248_v36  ;;  %v1291_v45 = vadd.f32 %v1290_v60, %v1289_v34  ;;  %1775 = vmatprep.mubr.msk.f32.mxu0 %vm2069_vm4, %v2068_v41 }
  0xd3   :  { %v1270_v21 = vmul.f32 0.117071, %v1269_v61 }
  0xd4   :  { %v1292_v25 = vadd.f32 %v1291_v45, %v3897_v3  ;;  %v1250_v40 = vadd.f32 %v1249_v29, %v1226_v11  ;;  %v1420_v3 = vld [vmem:[%s4040_s3 + $0x8] sm:$0xff]  ;;  %v1727_v11 = vld [vmem:[%s4041_s4 + $0x1] ss:$0 sm:$0xff] }
  0xd5   :  { %1981 = vmatpush1.bf16.msk.msra.mxu1 %vm2669_vm2, %v1979_v58  ;;  %v1272_v30 = vadd.f32 %v1271_v5, %v1270_v21  ;;  %v1983_v55 = vpack.c.bf16 %v1420_v3, %v1419_v22 }
  0xd6   :  { %v1293_v20 = vmul.f32 %v1292_v25, %v1292_v25  ;;  %v1295_v39 = vmul.f32 0.5, %v1292_v25 }
  0xd7   :  { %v1273_v14 = vadd.f32 0.375373, %v1272_v30  ;;  %1984 = vmatpush3.bf16.msra.mxu0 %v1983_v55 }
  0xd8   :  { %v1294_v0 = vmul.f32 0.117071, %v1293_v20  ;;  %1985 = vmatprep.subr.bf16.mxu0 %v4086_v62 }
  0xd9   :  { %v1274_v53 = vadd.f32 %v1273_v14, %v1250_v40 }
  0xda   :  { %v1296_v19 = vadd.f32 %v1295_v39, %v1294_v0 }
  0xdc   :  { %v1297_v15 = vadd.f32 0.375373, %v1296_v19 }
  0xde   :  { %v1298_v54 = vadd.f32 %v1297_v15, %v1274_v53 }
  0xe0   :  { %v1329_v50 = vrot.slane %v1298_v54, %v2720_v31  ;;  %v1422_v31 = vld [vmem:[%s4040_s3 + $0x18] sm:$0xff] }
  0xe1   :  { %v1986_v47 = vpack.c.bf16 %v1422_v31, %v1421_v18 }
  0xe2   :  { %v1330_v49 = vcombine.high %v1329_v50, %v1329_v50 }
  0xe3   :  { %1987 = vmatpush3.bf16.msra.mxu0 %v1986_v47 }
  0xe4   :  { %1725 = vmatprep.mubr.msk.f32.mxu1 %vm390_vm3, %v1330_v49  ;;  %1988 = vmatprep.subr.bf16.mxu0 %v4086_v62 }
  0xe5   :  { %1402 = vmatmul.mubr.f32.vlgmr.msra.gmra.mrb[4].mxu1 %v1329_v50 }
  0xe7   :  { %1990 = vmatpush3.bf16.msra.mxu0 %v1989_v9 }
  0xe8   :  { %1991 = vmatprep.subr.bf16.mxu0 %v4086_v62 }
  0xeb   :  { %1993 = vmatpush3.bf16.msra.mxu0 %v1992_v16 }
  0xec   :  { %1994 = vmatprep.subr.bf16.mxu0 %v4086_v62 }
  0xef   :  { %1996 = vmatpush3.bf16.msra.mxu0 %v1995_v27 }
  0xf0   :  { %1997 = vmatprep.subr.bf16.mxu0 %v4086_v62 }
  0xf3   :  { %1999 = vmatpush3.bf16.msra.mxu0 %v1998_v57 }
  0xf4   :  { %2000 = vmatprep.subr.bf16.mxu0 %v4086_v62 }
  0xf7   :  { %2002 = vmatpush3.bf16.msra.mxu0 %v2001_v12 }
  0xf8   :  { %1773 = vmatprep.subr.mxu0 %v2068_v41 }
  0xfb   :  { %1774 = vmatpush3.msra.mxu0 %v1433_v17 }
 0x124   :  { %v463_v6 = vpop.f32.mrb[0].mxu0 }
 0x125   :  { %v465_v44 = vpop.f32.mrb[1].mxu0 }
 0x13f   :  { %v548_v51 = vpop.f32.mrb[0].mxu1 }
 0x140   :  { %v549_v8 = vadd.f32 %v548_v51, %v463_v6  ;;  %v550_v38 = vpop.f32.mrb[1].mxu1 }
 0x160   :  { %v761_v62 = vpop.f32.mrb[2].mxu0 }
 0x161   :  { %v765_v28 = vadd.f32 %v761_v62, %v549_v8  ;;  %v763_v24 = vpop.f32.mrb[3].mxu0 }
 0x17c   :  { %v975_v2 = vpop.f32.mrb[2].mxu1 }
 0x17d   :  { %v979_v7 = vadd.f32 %v975_v2, %v765_v28  ;;  %v977_v42 = vpop.f32.mrb[3].mxu1 }
 0x19d   :  { %v1189_v35 = vpop.f32.mrb[4].mxu0 }
 0x19e   :  { %v1193_v59 = vadd.f32 %v1189_v35, %v979_v7  ;;  %v1191_v63 = vpop.f32.mrb[5].mxu0 }
 0x1b8   :  { %v1403_v48 = vpop.f32.mrb[4].mxu1 }
 0x1b9   :  { %v1407_v56 = vadd.f32 %v1403_v48, %v1193_v59  ;;  %v1405_v60 = vpop.f32.mrb[5].mxu1 }
 0x1bb   :  { %v1413_v58 = vadd.f32 %v1726_v10, %v1407_v56 }
 0x1bd   :  { %v1414_v36 = vmul.f32 %v1413_v58, %v1413_v58  ;;  %v1416_v34 = vmul.f32 0.5, %v1413_v58 }
 0x1bf   :  { %v1415_v52 = vmul.f32 0.117071, %v1414_v36 }
 0x1c1   :  { %v1417_v61 = vadd.f32 %v1416_v34, %v1415_v52 }
 0x1c3   :  { %v1418_v5 = vadd.f32 0.375373, %v1417_v61 }
 0x1c5   :  { %1776 = vmatmul.mubr.msk.f32.vlgmr.msra.gmra.mrb[6].mxu0 %vm1439_vm5, %v1418_v5 }
 0x298   :  { %v1509_v29 = vpop.f32.mrb[6].mxu0 }
 0x299   :  { %v1510_v45 = vadd.f32 %v1727_v11, %v1509_v29  ;;  %v1777_v21 = vpop.f32.mrb[7].mxu0 }
 0x29b   :  { %1514 = vst.msk [vmem:[#allocation5] sm:$0x3] %vm1513_vm6, %v1510_v45 }
 0x29c   :  { %2049 = shalt.err (!%p2046_p9)
}
 0x29d   :  { %s2050_s14 = scalar_lea.hbm %s4042_s5, 32 }
 0x29e   :  { %p2051_p10 = scmp.ne.s32.totalorder %s4042_s5, %s2050_s14  ;;  %p2054_p11 = scmp.lt.u32.totalorder %s2050_s14, %s4042_s5 }
 0x2a0   :  { %p2056_p12 = pnand %p2054_p11, %p2051_p10 }
 0x2a2   :  { %2059 = shalt.err (!%p2056_p12)
}
 0x2a3   :  { %1524 = dma.vmem_to_hbm [thread:$0]  %s1522_s26, 32, %s4042_s5, [#allocation3]  }
 0x2a4   :  { %2062 = dma.done.wait [#allocation3], 32  }
 0x2a5   :  { %2063 = vsyncadd [#allocation3], 4294967264 }
 0x2a6   :  { %1528 = vsyncpa [#allocation3], 1 }
 0x2a7   :  { %1529 = vsyncpa [#allocation4], 1 }

</bundles_post_ra>
